<compile_context>
chip_gen: v7x
topology: tpu7x:2x2x1
jax: 0.10.0
libtpu: 0.0.40
codegen_flags: <defaults>
</compile_context>

<pallas_src>
import functools
import math

import jax
import jax.numpy as jnp
from jax.experimental import pallas as pl
from jax.experimental.pallas import tpu as pltpu

# ----------------------------- config ---------------------------------------
VOCAB_SIZE = 32
EMBED_SIZE = 32
HEADS = 4
HEAD_DIM = EMBED_SIZE // HEADS
FORWARD_EXP = 4
FF_DIM = FORWARD_EXP * EMBED_SIZE
ENC_LAYERS = 2
DEC_LAYERS = 2
MAX_LEN = 16
SRC_PAD_IDX = 0
TRG_PAD_IDX = 0   # unused by forward (trg mask is purely causal), kept for parity
LN_EPS = 1e-5

# ----------------------------- kernel helpers --------------------------------


def _add_layernorm(z, g_ref, b_ref):
    """LayerNorm(z) with affine gamma/beta, eps=1e-5 (PyTorch default)."""
    mu = jnp.mean(z, axis=-1, keepdims=True)
    var = jnp.mean((z - mu) ** 2, axis=-1, keepdims=True)
    return (z - mu) * jax.lax.rsqrt(var + LN_EPS) * g_ref[...] + b_ref[...]


def _mha(xq_ref, xkv_ref, pad_ref, wq_ref, wk_ref, wv_ref, wo_ref, bo_ref,
         attn_scr, *, B, Sq, Sk, H, hd, causal, scale):
    """Multi-head attention fully inside one kernel.

    xq_ref : (B*Sq, E)  query-side activations
    xkv_ref: (B*Sk, E)  key/value-side activations
    pad_ref: (B, 1, Sk) float {0,1} key padding mask (all ones when unused)
    wq/wk/wv_ref: (H, E, hd)  per-head projection (block-diag rows, pre-built)
    wo_ref : (H, hd, E)       output projection split per head (pre-transposed)
    bo_ref : (1, E)
    attn_scr: VMEM scratch (B*Sq, E) used to assemble the attention output.
    Returns the (B*Sq, E) attention output (fc_out applied, bias added).
    """
    E = H * hd
    neg = jnp.float32(-1e20)
    if causal:
        ri = jax.lax.broadcasted_iota(jnp.int32, (Sq, Sk), 0)
        ci = jax.lax.broadcasted_iota(jnp.int32, (Sq, Sk), 1)
        keep = ri >= ci
    bo = bo_ref[...]                                       # (1, E)

    for b in range(B):                                     # static unroll (tiny)
        xq_b = xq_ref[b * Sq:(b + 1) * Sq, :]              # (Sq, E)
        xkv_b = xkv_ref[b * Sk:(b + 1) * Sk, :]            # (Sk, E)
        pad_b = pad_ref[b]                                 # (1, Sk)
        acc = jnp.zeros((Sq, E), jnp.float32)
        for h in range(H):                                 # static unroll (tiny)
            qh = jnp.dot(xq_b, wq_ref[h], preferred_element_type=jnp.float32)   # (Sq, hd)
            kh = jnp.dot(xkv_b, wk_ref[h], preferred_element_type=jnp.float32)  # (Sk, hd)
            vh = jnp.dot(xkv_b, wv_ref[h], preferred_element_type=jnp.float32)  # (Sk, hd)
            en = jnp.dot(qh, kh.T, preferred_element_type=jnp.float32)          # (Sq, Sk)
            # matches PyTorch: masked_fill(mask == 0, -1e20) BEFORE the 1/sqrt(E) scale
            en = jnp.where(pad_b == 0.0, neg, en)
            if causal:
                en = jnp.where(keep, en, neg)
            en = en * scale
            en = en - jnp.max(en, axis=-1, keepdims=True)
            p = jnp.exp(en)
            attn = p / jnp.sum(p, axis=-1, keepdims=True)
            ov = jnp.dot(attn, vh, preferred_element_type=jnp.float32)           # (Sq, hd)
            # per-head slice of the output projection -> accumulate directly in E
            acc = acc + jnp.dot(ov, wo_ref[h], preferred_element_type=jnp.float32)
        attn_scr[b * Sq:(b + 1) * Sq, :] = acc + bo
    return attn_scr[...]


# ----------------------------- fused kernels ----------------------------------


def transformer_block_kernel(xq_ref, xkv_ref, pad_ref,
                             wq_ref, wk_ref, wv_ref, wo_ref, bo_ref,
                             g1_ref, bb1_ref, w1_ref, fb1_ref,
                             w2_ref, fb2_ref, g2_ref, bb2_ref,
                             o_ref, attn_scr,
                             *, B, Sq, Sk, H, hd, causal, scale):
    """Whole TransformerBlock: MHA -> add&LN -> FFN(W1,ReLU,W2) -> add&LN."""
    attn = _mha(xq_ref, xkv_ref, pad_ref, wq_ref, wk_ref, wv_ref, wo_ref, bo_ref,
                attn_scr, B=B, Sq=Sq, Sk=Sk, H=H, hd=hd, causal=causal, scale=scale)
    # dropout(p=0) is identity
    x1 = _add_layernorm(attn + xq_ref[...], g1_ref, bb1_ref)          # (B*Sq, E)
    h1 = jnp.dot(x1, w1_ref[...], preferred_element_type=jnp.float32) + fb1_ref[...]
    h1 = jnp.maximum(h1, 0.0)                                          # (B*Sq, FF)
    ff = jnp.dot(h1, w2_ref[...], preferred_element_type=jnp.float32) + fb2_ref[...]
    o_ref[...] = _add_layernorm(ff + x1, g2_ref, bb2_ref)


def attn_ln_kernel(x_ref, pad_ref, wq_ref, wk_ref, wv_ref, wo_ref, bo_ref,
                   g_ref, b_ref, o_ref, attn_scr,
                   *, B, S, H, hd, scale):
    """Decoder pre-block: causal self-attention + add&LayerNorm."""
    attn = _mha(x_ref, x_ref, pad_ref, wq_ref, wk_ref, wv_ref, wo_ref, bo_ref,
                attn_scr, B=B, Sq=S, Sk=S, H=H, hd=hd, causal=True, scale=scale)
    o_ref[...] = _add_layernorm(attn + x_ref[...], g_ref, b_ref)


def linear_kernel(x_ref, w_ref, b_ref, o_ref):
    """Final vocabulary projection: y = x @ w + b."""
    o_ref[...] = (jnp.dot(x_ref[...], w_ref[...], preferred_element_type=jnp.float32)
                  + b_ref[...])


# ----------------------------- wrappers ---------------------------------------


def fused_transformer_block(bp, xq, xkv, pad_mask, *, causal):
    """xq:(B,Sq,E) xkv:(B,Sk,E) pad_mask:(B,1,Sk). Returns (B,Sq,E)."""
    B, Sq, E = xq.shape
    Sk = xkv.shape[1]
    a = bp["attn"]
    kernel = functools.partial(
        transformer_block_kernel, B=B, Sq=Sq, Sk=Sk, H=HEADS, hd=HEAD_DIM,
        causal=causal, scale=1.0 / math.sqrt(float(E)))
    out = pl.pallas_call(
        kernel,
        out_shape=jax.ShapeDtypeStruct((B * Sq, E), jnp.float32),
        scratch_shapes=[pltpu.VMEM((B * Sq, E), jnp.float32)],
    )(xq.reshape(B * Sq, E), xkv.reshape(B * Sk, E), pad_mask,
      a["wq"], a["wk"], a["wv"], a["wo"], a["bo"],
      bp["ln1_g"], bp["ln1_b"], bp["W1"], bp["b1"], bp["W2"], bp["b2"],
      bp["ln2_g"], bp["ln2_b"])
    return out.reshape(B, Sq, E)


def fused_attn_ln(lp, x, pad_ones):
    """Decoder causal self-attention + add&LN. x:(B,S,E), pad_ones:(B,1,S)."""
    B, S, E = x.shape
    a = lp["attn"]
    kernel = functools.partial(
        attn_ln_kernel, B=B, S=S, H=HEADS, hd=HEAD_DIM,
        scale=1.0 / math.sqrt(float(E)))
    out = pl.pallas_call(
        kernel,
        out_shape=jax.ShapeDtypeStruct((B * S, E), jnp.float32),
        scratch_shapes=[pltpu.VMEM((B * S, E), jnp.float32)],
    )(x.reshape(B * S, E), pad_ones,
      a["wq"], a["wk"], a["wv"], a["wo"], a["bo"], lp["ln_g"], lp["ln_b"])
    return out.reshape(B, S, E)


def pallas_linear(x2d, w, b):
    """x2d:(R,K), w:(K,N) pre-transposed, b:(1,N) -> (R,N)."""
    R = x2d.shape[0]
    N = w.shape[1]
    return pl.pallas_call(
        linear_kernel,
        out_shape=jax.ShapeDtypeStruct((R, N), jnp.float32),
    )(x2d, w, b)


# ----------------------------- model glue (plain JAX) --------------------------


def encoder_forward(p, src, src_pad):
    B, S = src.shape
    # TODO(synk): embedding lookup is a plain-JAX gather (glue); all matmuls,
    # softmax and LayerNorm run inside the fused Pallas block kernels.
    x = p["word_emb"][src] + p["pos_emb"][:S][None, :, :]
    for lp in p["layers"]:
        x = fused_transformer_block(lp, x, x, src_pad, causal=False)
    return x


def decoder_forward(p, trg, enc_out, src_pad, trg_pad_ones):
    B, S = trg.shape
    x = p["word_emb"][trg] + p["pos_emb"][:S][None, :, :]
    for lp in p["layers"]:
        query = fused_attn_ln(lp, x, trg_pad_ones)                       # causal self-attn + LN
        x = fused_transformer_block(lp["block"], query, enc_out, src_pad,
                                    causal=False)                       # cross-attn block
    E = x.shape[-1]
    logits = pallas_linear(x.reshape(B * S, E), p["Wout"], p["bout"])
    return logits.reshape(B, S, VOCAB_SIZE)


def transformer_forward(params, src, trg):
    B, Ss = src.shape
    St = trg.shape[1]
    src_pad = (src != SRC_PAD_IDX).astype(jnp.float32)[:, None, :]       # (B,1,Ssrc)
    trg_pad_ones = jnp.ones((B, 1, St), jnp.float32)                     # trg mask is causal-only
    enc = encoder_forward(params["encoder"], src, src_pad)
    return decoder_forward(params["decoder"], trg, enc, src_pad, trg_pad_ones)


# ----------------------------- deterministic params ----------------------------


def init_params(key):
    keys = iter(jax.random.split(key, 256))

    def w(*shape):
        return (0.02 * jax.random.normal(next(keys), shape)).astype(jnp.float32)

    def expand_head_proj(w_hh):
        # shared per-head Linear(hd, hd, bias=False): y_h = x_h @ w_hh.T,
        # pre-built as (H, E, hd) with the block on rows h*hd:(h+1)*hd.
        wt = w_hh.T
        out = jnp.zeros((HEADS, EMBED_SIZE, HEAD_DIM), jnp.float32)
        for h in range(HEADS):
            out = out.at[h, h * HEAD_DIM:(h + 1) * HEAD_DIM, :].set(wt)
        return out

    def attn_params():
        return dict(
            wq=expand_head_proj(w(HEAD_DIM, HEAD_DIM)),
            wk=expand_head_proj(w(HEAD_DIM, HEAD_DIM)),
            wv=expand_head_proj(w(HEAD_DIM, HEAD_DIM)),
            # fc_out weight pre-transposed to (in,out) and split per head: (H, hd, E)
            wo=w(EMBED_SIZE, EMBED_SIZE).reshape(HEADS, HEAD_DIM, EMBED_SIZE),
            bo=jnp.zeros((1, EMBED_SIZE), jnp.float32),
        )

    def block_params():
        return dict(
            attn=attn_params(),
            ln1_g=jnp.ones((1, EMBED_SIZE), jnp.float32),
            ln1_b=jnp.zeros((1, EMBED_SIZE), jnp.float32),
            W1=w(EMBED_SIZE, FF_DIM), b1=jnp.zeros((1, FF_DIM), jnp.float32),
            W2=w(FF_DIM, EMBED_SIZE), b2=jnp.zeros((1, EMBED_SIZE), jnp.float32),
            ln2_g=jnp.ones((1, EMBED_SIZE), jnp.float32),
            ln2_b=jnp.zeros((1, EMBED_SIZE), jnp.float32),
        )

    encoder = dict(word_emb=w(VOCAB_SIZE, EMBED_SIZE),
                   pos_emb=w(MAX_LEN, EMBED_SIZE),
                   layers=[block_params() for _ in range(ENC_LAYERS)])

    def dec_layer_params():
        return dict(attn=attn_params(),
                    ln_g=jnp.ones((1, EMBED_SIZE), jnp.float32),
                    ln_b=jnp.zeros((1, EMBED_SIZE), jnp.float32),
                    block=block_params())

    decoder = dict(word_emb=w(VOCAB_SIZE, EMBED_SIZE),
                   pos_emb=w(MAX_LEN, EMBED_SIZE),
                   layers=[dec_layer_params() for _ in range(DEC_LAYERS)],
                   Wout=w(EMBED_SIZE, VOCAB_SIZE),
                   bout=jnp.zeros((1, VOCAB_SIZE), jnp.float32))

    return dict(encoder=encoder, decoder=decoder)


# ----------------------------- main --------------------------------------------

if __name__ == "__main__":
    root = jax.random.PRNGKey(0)
    k_params, k_src, k_trg = jax.random.split(root, 3)

    params = init_params(k_params)

    B, S_SRC, S_TRG = 2, 8, 8
    src = jax.random.randint(k_src, (B, S_SRC), 0, VOCAB_SIZE, dtype=jnp.int32)
    trg = jax.random.randint(k_trg, (B, S_TRG), 0, VOCAB_SIZE, dtype=jnp.int32)
    # include some pad tokens so src_mask is non-trivial
    src = src.at[:, -2:].set(SRC_PAD_IDX)

    fwd = jax.jit(transformer_forward)
    out = fwd(params, src, trg)                 # (B, S_TRG, VOCAB_SIZE)
    jax.block_until_ready(out)

    assert out.shape == (B, S_TRG, VOCAB_SIZE)
    assert out.dtype == jnp.float32
    # TODO(synk): dropout layers are identity (p=0 per module defaults).
    print("KERNEL_OK")
</pallas_src>

<mosaic_0001>
module attributes {stable_mosaic.version = 11 : i64} {
  func.func @linear_kernel(%arg0: memref<16x32xf32, #tpu.memory_space<vmem>>, %arg1: memref<32x32xf32, #tpu.memory_space<vmem>>, %arg2: memref<1x32xf32, #tpu.memory_space<vmem>>, %arg3: memref<16x32xf32, #tpu.memory_space<vmem>>) attributes {dimension_semantics = [], scalar_prefetch = 0 : i64, scratch_operands = 0 : i64, tpu.core_type = #tpu.core_type<tc>} {
    %c0 = arith.constant 0 : index
    %c0_0 = arith.constant 0 : index
    %0 = vector.load %arg0[%c0, %c0_0] : memref<16x32xf32, #tpu.memory_space<vmem>>, vector<16x32xf32>
    %c0_1 = arith.constant 0 : index
    %c0_2 = arith.constant 0 : index
    %1 = vector.load %arg1[%c0_1, %c0_2] : memref<32x32xf32, #tpu.memory_space<vmem>>, vector<32x32xf32>
    %cst = arith.constant dense<0.000000e+00> : vector<16x32xf32>
    %2 = tpu.matmul %0, %1, %cst {dimension_numbers = #tpu.dot_dimension_numbers<[1], [0], [0], [1], [0, 0, 1, 1], [], []>} : vector<16x32xf32>, vector<32x32xf32>, vector<16x32xf32> -> vector<16x32xf32>
    %c0_3 = arith.constant 0 : index
    %c0_4 = arith.constant 0 : index
    %3 = vector.load %arg2[%c0_3, %c0_4] : memref<1x32xf32, #tpu.memory_space<vmem>>, vector<1x32xf32>
    %4 = vector.broadcast %3 : vector<1x32xf32> to vector<16x32xf32>
    %5 = arith.addf %2, %4 : vector<16x32xf32>
    %c0_5 = arith.constant 0 : index
    %c0_6 = arith.constant 0 : index
    %6 = vector.load %arg3[%c0_5, %c0_6] : memref<16x32xf32, #tpu.memory_space<vmem>>, vector<16x32xf32>
    tpu.vector_store %arg3[%c0_5, %c0_6], %5 {strides = array<i32>} : memref<16x32xf32, #tpu.memory_space<vmem>>, vector<16x32xf32>,
    return
  }
}

module attributes {stable_mosaic.version = 11 : i64} {
  func.func @transformer_block_kernel(%arg0: memref<16x32xf32, #tpu.memory_space<vmem>>, %arg1: memref<16x32xf32, #tpu.memory_space<vmem>>, %arg2: memref<2x1x8xf32, #tpu.memory_space<vmem>>, %arg3: memref<4x32x8xf32, #tpu.memory_space<vmem>>, %arg4: memref<4x32x8xf32, #tpu.memory_space<vmem>>, %arg5: memref<4x32x8xf32, #tpu.memory_space<vmem>>, %arg6: memref<4x8x32xf32, #tpu.memory_space<vmem>>, %arg7: memref<1x32xf32, #tpu.memory_space<vmem>>, %arg8: memref<1x32xf32, #tpu.memory_space<vmem>>, %arg9: memref<1x32xf32, #tpu.memory_space<vmem>>, %arg10: memref<32x128xf32, #tpu.memory_space<vmem>>, %arg11: memref<1x128xf32, #tpu.memory_space<vmem>>, %arg12: memref<128x32xf32, #tpu.memory_space<vmem>>, %arg13: memref<1x32xf32, #tpu.memory_space<vmem>>, %arg14: memref<1x32xf32, #tpu.memory_space<vmem>>, %arg15: memref<1x32xf32, #tpu.memory_space<vmem>>, %arg16: memref<16x32xf32, #tpu.memory_space<vmem>>, %arg17: memref<16x32xf32, #tpu.memory_space<vmem>>) attributes {dimension_semantics = [], scalar_prefetch = 0 : i64, scratch_operands = 1 : i64, tpu.core_type = #tpu.core_type<tc>} {
    %c0 = arith.constant 0 : index
    %c0_0 = arith.constant 0 : index
    %0 = vector.load %arg7[%c0, %c0_0] : memref<1x32xf32, #tpu.memory_space<vmem>>, vector<1x32xf32>
    %c0_1 = arith.constant 0 : index
    %c0_2 = arith.constant 0 : index
    %1 = vector.load %arg0[%c0_1, %c0_2] : memref<16x32xf32, #tpu.memory_space<vmem>>, vector<8x32xf32>
    %c0_3 = arith.constant 0 : index
    %c0_4 = arith.constant 0 : index
    %2 = vector.load %arg1[%c0_3, %c0_4] : memref<16x32xf32, #tpu.memory_space<vmem>>, vector<8x32xf32>
    %c0_5 = arith.constant 0 : index
    %c0_6 = arith.constant 0 : index
    %c0_7 = arith.constant 0 : index
    %3 = vector.load %arg2[%c0_5, %c0_6, %c0_7] : memref<2x1x8xf32, #tpu.memory_space<vmem>>, vector<1x1x8xf32>
    %4 = vector.shape_cast %3 : vector<1x1x8xf32> to vector<1x8xf32>
    %cst = arith.constant 0.000000e+00 : f32
    %5 = vector.broadcast %cst : f32 to vector<8x32xf32>
    %c0_8 = arith.constant 0 : index
    %c0_9 = arith.constant 0 : index
    %c0_10 = arith.constant 0 : index
    %6 = vector.load %arg3[%c0_8, %c0_9, %c0_10] : memref<4x32x8xf32, #tpu.memory_space<vmem>>, vector<1x32x8xf32>
    %7 = vector.shape_cast %6 : vector<1x32x8xf32> to vector<32x8xf32>
    %cst_11 = arith.constant dense<0.000000e+00> : vector<8x8xf32>
    %8 = tpu.matmul %1, %7, %cst_11 {dimension_numbers = #tpu.dot_dimension_numbers<[1], [0], [0], [1], [0, 0, 1, 1], [], []>} : vector<8x32xf32>, vector<32x8xf32>, vector<8x8xf32> -> vector<8x8xf32>
    %c0_12 = arith.constant 0 : index
    %c0_13 = arith.constant 0 : index
    %c0_14 = arith.constant 0 : index
    %9 = vector.load %arg4[%c0_12, %c0_13, %c0_14] : memref<4x32x8xf32, #tpu.memory_space<vmem>>, vector<1x32x8xf32>
    %10 = vector.shape_cast %9 : vector<1x32x8xf32> to vector<32x8xf32>
    %cst_15 = arith.constant dense<0.000000e+00> : vector<8x8xf32>
    %11 = tpu.matmul %2, %10, %cst_15 {dimension_numbers = #tpu.dot_dimension_numbers<[1], [0], [0], [1], [0, 0, 1, 1], [], []>} : vector<8x32xf32>, vector<32x8xf32>, vector<8x8xf32> -> vector<8x8xf32>
    %c0_16 = arith.constant 0 : index
    %c0_17 = arith.constant 0 : index
    %c0_18 = arith.constant 0 : index
    %12 = vector.load %arg5[%c0_16, %c0_17, %c0_18] : memref<4x32x8xf32, #tpu.memory_space<vmem>>, vector<1x32x8xf32>
    %13 = vector.shape_cast %12 : vector<1x32x8xf32> to vector<32x8xf32>
    %cst_19 = arith.constant dense<0.000000e+00> : vector<8x8xf32>
    %14 = tpu.matmul %2, %13, %cst_19 {dimension_numbers = #tpu.dot_dimension_numbers<[1], [0], [0], [1], [0, 0, 1, 1], [], []>} : vector<8x32xf32>, vector<32x8xf32>, vector<8x8xf32> -> vector<8x8xf32>
    %15 = tpu.transpose %11, [1, 0] : vector<8x8xf32> -> vector<8x8xf32>
    %cst_20 = arith.constant dense<0.000000e+00> : vector<8x8xf32>
    %16 = tpu.matmul %8, %15, %cst_20 {dimension_numbers = #tpu.dot_dimension_numbers<[1], [0], [0], [1], [0, 0, 1, 1], [], []>} : vector<8x8xf32>, vector<8x8xf32>, vector<8x8xf32> -> vector<8x8xf32>
    %cst_21 = arith.constant 0.000000e+00 : f32
    %17 = vector.broadcast %cst_21 : f32 to vector<1x8xf32>
    %18 = arith.cmpf oeq, %4, %17 : vector<1x8xf32>
    %cst_22 = arith.constant -1.000000e+20 : f32
    %19 = vector.shape_cast %18 : vector<1x8xi1> to vector<1x8xi1>
    %20 = vector.broadcast %19 : vector<1x8xi1> to vector<8x8xi1>
    %21 = vector.broadcast %cst_22 : f32 to vector<8x8xf32>
    %22 = arith.select %20, %21, %16 : vector<8x8xi1>, vector<8x8xf32>
    %cst_23 = arith.constant 0.176776692 : f32
    %23 = vector.broadcast %cst_23 : f32 to vector<8x8xf32>
    %24 = arith.mulf %22, %23 : vector<8x8xf32>
    %cst_24 = arith.constant dense<0xFF800000> : vector<8xf32>
    %25 = vector.multi_reduction <maximumf>, %24, %cst_24 [1] : vector<8x8xf32> to vector<8xf32>
    %26 = vector.shape_cast %25 : vector<8xf32> to vector<8x1xf32>
    %27 = vector.broadcast %26 : vector<8x1xf32> to vector<8x8xf32>
    %28 = arith.subf %24, %27 : vector<8x8xf32>
    %29 = math.exp %28 : vector<8x8xf32>
    %cst_25 = arith.constant dense<0.000000e+00> : vector<8xf32>
    %30 = vector.multi_reduction <add>, %29, %cst_25 [1] : vector<8x8xf32> to vector<8xf32>
    %31 = vector.shape_cast %30 : vector<8xf32> to vector<8x1xf32>
    %32 = vector.broadcast %31 : vector<8x1xf32> to vector<8x8xf32>
    %33 = arith.divf %29, %32 : vector<8x8xf32>
    %cst_26 = arith.constant dense<0.000000e+00> : vector<8x8xf32>
    %34 = tpu.matmul %33, %14, %cst_26 {dimension_numbers = #tpu.dot_dimension_numbers<[1], [0], [0], [1], [0, 0, 1, 1], [], []>} : vector<8x8xf32>, vector<8x8xf32>, vector<8x8xf32> -> vector<8x8xf32>
    %c0_27 = arith.constant 0 : index
    %c0_28 = arith.constant 0 : index
    %c0_29 = arith.constant 0 : index
    %35 = vector.load %arg6[%c0_27, %c0_28, %c0_29] : memref<4x8x32xf32, #tpu.memory_space<vmem>>, vector<1x8x32xf32>
    %36 = vector.shape_cast %35 : vector<1x8x32xf32> to vector<8x32xf32>
    %cst_30 = arith.constant dense<0.000000e+00> : vector<8x32xf32>
    %37 = tpu.matmul %34, %36, %cst_30 {dimension_numbers = #tpu.dot_dimension_numbers<[1], [0], [0], [1], [0, 0, 1, 1], [], []>} : vector<8x8xf32>, vector<8x32xf32>, vector<8x32xf32> -> vector<8x32xf32>
    %38 = arith.addf %5, %37 : vector<8x32xf32>
    %c1 = arith.constant 1 : index
    %c0_31 = arith.constant 0 : index
    %c0_32 = arith.constant 0 : index
    %39 = vector.load %arg3[%c1, %c0_31, %c0_32] : memref<4x32x8xf32, #tpu.memory_space<vmem>>, vector<1x32x8xf32>
    %40 = vector.shape_cast %39 : vector<1x32x8xf32> to vector<32x8xf32>
    %cst_33 = arith.constant dense<0.000000e+00> : vector<8x8xf32>
    %41 = tpu.matmul %1, %40, %cst_33 {dimension_numbers = #tpu.dot_dimension_numbers<[1], [0], [0], [1], [0, 0, 1, 1], [], []>} : vector<8x32xf32>, vector<32x8xf32>, vector<8x8xf32> -> vector<8x8xf32>
    %c1_34 = arith.constant 1 : index
    %c0_35 = arith.constant 0 : index
    %c0_36 = arith.constant 0 : index
    %42 = vector.load %arg4[%c1_34, %c0_35, %c0_36] : memref<4x32x8xf32, #tpu.memory_space<vmem>>, vector<1x32x8xf32>
    %43 = vector.shape_cast %42 : vector<1x32x8xf32> to vector<32x8xf32>
    %cst_37 = arith.constant dense<0.000000e+00> : vector<8x8xf32>
    %44 = tpu.matmul %2, %43, %cst_37 {dimension_numbers = #tpu.dot_dimension_numbers<[1], [0], [0], [1], [0, 0, 1, 1], [], []>} : vector<8x32xf32>, vector<32x8xf32>, vector<8x8xf32> -> vector<8x8xf32>
    %c1_38 = arith.constant 1 : index
    %c0_39 = arith.constant 0 : index
    %c0_40 = arith.constant 0 : index
    %45 = vector.load %arg5[%c1_38, %c0_39, %c0_40] : memref<4x32x8xf32, #tpu.memory_space<vmem>>, vector<1x32x8xf32>
    %46 = vector.shape_cast %45 : vector<1x32x8xf32> to vector<32x8xf32>
    %cst_41 = arith.constant dense<0.000000e+00> : vector<8x8xf32>
    %47 = tpu.matmul %2, %46, %cst_41 {dimension_numbers = #tpu.dot_dimension_numbers<[1], [0], [0], [1], [0, 0, 1, 1], [], []>} : vector<8x32xf32>, vector<32x8xf32>, vector<8x8xf32> -> vector<8x8xf32>
    %48 = tpu.transpose %44, [1, 0] : vector<8x8xf32> -> vector<8x8xf32>
    %cst_42 = arith.constant dense<0.000000e+00> : vector<8x8xf32>
    %49 = tpu.matmul %41, %48, %cst_42 {dimension_numbers = #tpu.dot_dimension_numbers<[1], [0], [0], [1], [0, 0, 1, 1], [], []>} : vector<8x8xf32>, vector<8x8xf32>, vector<8x8xf32> -> vector<8x8xf32>
    %cst_43 = arith.constant 0.000000e+00 : f32
    %50 = vector.broadcast %cst_43 : f32 to vector<1x8xf32>
    %51 = arith.cmpf oeq, %4, %50 : vector<1x8xf32>
    %cst_44 = arith.constant -1.000000e+20 : f32
    %52 = vector.shape_cast %51 : vector<1x8xi1> to vector<1x8xi1>
    %53 = vector.broadcast %52 : vector<1x8xi1> to vector<8x8xi1>
    %54 = vector.broadcast %cst_44 : f32 to vector<8x8xf32>
    %55 = arith.select %53, %54, %49 : vector<8x8xi1>, vector<8x8xf32>
    %cst_45 = arith.constant 0.176776692 : f32
    %56 = vector.broadcast %cst_45 : f32 to vector<8x8xf32>
    %57 = arith.mulf %55, %56 : vector<8x8xf32>
    %cst_46 = arith.constant dense<0xFF800000> : vector<8xf32>
    %58 = vector.multi_reduction <maximumf>, %57, %cst_46 [1] : vector<8x8xf32> to vector<8xf32>
    %59 = vector.shape_cast %58 : vector<8xf32> to vector<8x1xf32>
    %60 = vector.broadcast %59 : vector<8x1xf32> to vector<8x8xf32>
    %61 = arith.subf %57, %60 : vector<8x8xf32>
    %62 = math.exp %61 : vector<8x8xf32>
    %cst_47 = arith.constant dense<0.000000e+00> : vector<8xf32>
    %63 = vector.multi_reduction <add>, %62, %cst_47 [1] : vector<8x8xf32> to vector<8xf32>
    %64 = vector.shape_cast %63 : vector<8xf32> to vector<8x1xf32>
    %65 = vector.broadcast %64 : vector<8x1xf32> to vector<8x8xf32>
    %66 = arith.divf %62, %65 : vector<8x8xf32>
    %cst_48 = arith.constant dense<0.000000e+00> : vector<8x8xf32>
    %67 = tpu.matmul %66, %47, %cst_48 {dimension_numbers = #tpu.dot_dimension_numbers<[1], [0], [0], [1], [0, 0, 1, 1], [], []>} : vector<8x8xf32>, vector<8x8xf32>, vector<8x8xf32> -> vector<8x8xf32>
    %c1_49 = arith.constant 1 : index
    %c0_50 = arith.constant 0 : index
    %c0_51 = arith.constant 0 : index
    %68 = vector.load %arg6[%c1_49, %c0_50, %c0_51] : memref<4x8x32xf32, #tpu.memory_space<vmem>>, vector<1x8x32xf32>
    %69 = vector.shape_cast %68 : vector<1x8x32xf32> to vector<8x32xf32>
    %cst_52 = arith.constant dense<0.000000e+00> : vector<8x32xf32>
    %70 = tpu.matmul %67, %69, %cst_52 {dimension_numbers = #tpu.dot_dimension_numbers<[1], [0], [0], [1], [0, 0, 1, 1], [], []>} : vector<8x8xf32>, vector<8x32xf32>, vector<8x32xf32> -> vector<8x32xf32>
    %71 = arith.addf %38, %70 : vector<8x32xf32>
    %c2 = arith.constant 2 : index
    %c0_53 = arith.constant 0 : index
    %c0_54 = arith.constant 0 : index
    %72 = vector.load %arg3[%c2, %c0_53, %c0_54] : memref<4x32x8xf32, #tpu.memory_space<vmem>>, vector<1x32x8xf32>
    %73 = vector.shape_cast %72 : vector<1x32x8xf32> to vector<32x8xf32>
    %cst_55 = arith.constant dense<0.000000e+00> : vector<8x8xf32>
    %74 = tpu.matmul %1, %73, %cst_55 {dimension_numbers = #tpu.dot_dimension_numbers<[1], [0], [0], [1], [0, 0, 1, 1], [], []>} : vector<8x32xf32>, vector<32x8xf32>, vector<8x8xf32> -> vector<8x8xf32>
    %c2_56 = arith.constant 2 : index
    %c0_57 = arith.constant 0 : index
    %c0_58 = arith.constant 0 : index
    %75 = vector.load %arg4[%c2_56, %c0_57, %c0_58] : memref<4x32x8xf32, #tpu.memory_space<vmem>>, vector<1x32x8xf32>
    %76 = vector.shape_cast %75 : vector<1x32x8xf32> to vector<32x8xf32>
    %cst_59 = arith.constant dense<0.000000e+00> : vector<8x8xf32>
    %77 = tpu.matmul %2, %76, %cst_59 {dimension_numbers = #tpu.dot_dimension_numbers<[1], [0], [0], [1], [0, 0, 1, 1], [], []>} : vector<8x32xf32>, vector<32x8xf32>, vector<8x8xf32> -> vector<8x8xf32>
    %c2_60 = arith.constant 2 : index
    %c0_61 = arith.constant 0 : index
    %c0_62 = arith.constant 0 : index
    %78 = vector.load %arg5[%c2_60, %c0_61, %c0_62] : memref<4x32x8xf32, #tpu.memory_space<vmem>>, vector<1x32x8xf32>
    %79 = vector.shape_cast %78 : vector<1x32x8xf32> to vector<32x8xf32>
    %cst_63 = arith.constant dense<0.000000e+00> : vector<8x8xf32>
    %80 = tpu.matmul %2, %79, %cst_63 {dimension_numbers = #tpu.dot_dimension_numbers<[1], [0], [0], [1], [0, 0, 1, 1], [], []>} : vector<8x32xf32>, vector<32x8xf32>, vector<8x8xf32> -> vector<8x8xf32>
    %81 = tpu.transpose %77, [1, 0] : vector<8x8xf32> -> vector<8x8xf32>
    %cst_64 = arith.constant dense<0.000000e+00> : vector<8x8xf32>
    %82 = tpu.matmul %74, %81, %cst_64 {dimension_numbers = #tpu.dot_dimension_numbers<[1], [0], [0], [1], [0, 0, 1, 1], [], []>} : vector<8x8xf32>, vector<8x8xf32>, vector<8x8xf32> -> vector<8x8xf32>
    %cst_65 = arith.constant 0.000000e+00 : f32
    %83 = vector.broadcast %cst_65 : f32 to vector<1x8xf32>
    %84 = arith.cmpf oeq, %4, %83 : vector<1x8xf32>
    %cst_66 = arith.constant -1.000000e+20 : f32
    %85 = vector.shape_cast %84 : vector<1x8xi1> to vector<1x8xi1>
    %86 = vector.broadcast %85 : vector<1x8xi1> to vector<8x8xi1>
    %87 = vector.broadcast %cst_66 : f32 to vector<8x8xf32>
    %88 = arith.select %86, %87, %82 : vector<8x8xi1>, vector<8x8xf32>
    %cst_67 = arith.constant 0.176776692 : f32
    %89 = vector.broadcast %cst_67 : f32 to vector<8x8xf32>
    %90 = arith.mulf %88, %89 : vector<8x8xf32>
    %cst_68 = arith.constant dense<0xFF800000> : vector<8xf32>
    %91 = vector.multi_reduction <maximumf>, %90, %cst_68 [1] : vector<8x8xf32> to vector<8xf32>
    %92 = vector.shape_cast %91 : vector<8xf32> to vector<8x1xf32>
    %93 = vector.broadcast %92 : vector<8x1xf32> to vector<8x8xf32>
    %94 = arith.subf %90, %93 : vector<8x8xf32>
    %95 = math.exp %94 : vector<8x8xf32>
    %cst_69 = arith.constant dense<0.000000e+00> : vector<8xf32>
    %96 = vector.multi_reduction <add>, %95, %cst_69 [1] : vector<8x8xf32> to vector<8xf32>
    %97 = vector.shape_cast %96 : vector<8xf32> to vector<8x1xf32>
    %98 = vector.broadcast %97 : vector<8x1xf32> to vector<8x8xf32>
    %99 = arith.divf %95, %98 : vector<8x8xf32>
    %cst_70 = arith.constant dense<0.000000e+00> : vector<8x8xf32>
    %100 = tpu.matmul %99, %80, %cst_70 {dimension_numbers = #tpu.dot_dimension_numbers<[1], [0], [0], [1], [0, 0, 1, 1], [], []>} : vector<8x8xf32>, vector<8x8xf32>, vector<8x8xf32> -> vector<8x8xf32>
    %c2_71 = arith.constant 2 : index
    %c0_72 = arith.constant 0 : index
    %c0_73 = arith.constant 0 : index
    %101 = vector.load %arg6[%c2_71, %c0_72, %c0_73] : memref<4x8x32xf32, #tpu.memory_space<vmem>>, vector<1x8x32xf32>
    %102 = vector.shape_cast %101 : vector<1x8x32xf32> to vector<8x32xf32>
    %cst_74 = arith.constant dense<0.000000e+00> : vector<8x32xf32>
    %103 = tpu.matmul %100, %102, %cst_74 {dimension_numbers = #tpu.dot_dimension_numbers<[1], [0], [0], [1], [0, 0, 1, 1], [], []>} : vector<8x8xf32>, vector<8x32xf32>, vector<8x32xf32> -> vector<8x32xf32>
    %104 = arith.addf %71, %103 : vector<8x32xf32>
    %c3 = arith.constant 3 : index
    %c0_75 = arith.constant 0 : index
    %c0_76 = arith.constant 0 : index
    %105 = vector.load %arg3[%c3, %c0_75, %c0_76] : memref<4x32x8xf32, #tpu.memory_space<vmem>>, vector<1x32x8xf32>
    %106 = vector.shape_cast %105 : vector<1x32x8xf32> to vector<32x8xf32>
    %cst_77 = arith.constant dense<0.000000e+00> : vector<8x8xf32>
    %107 = tpu.matmul %1, %106, %cst_77 {dimension_numbers = #tpu.dot_dimension_numbers<[1], [0], [0], [1], [0, 0, 1, 1], [], []>} : vector<8x32xf32>, vector<32x8xf32>, vector<8x8xf32> -> vector<8x8xf32>
    %c3_78 = arith.constant 3 : index
    %c0_79 = arith.constant 0 : index
    %c0_80 = arith.constant 0 : index
    %108 = vector.load %arg4[%c3_78, %c0_79, %c0_80] : memref<4x32x8xf32, #tpu.memory_space<vmem>>, vector<1x32x8xf32>
    %109 = vector.shape_cast %108 : vector<1x32x8xf32> to vector<32x8xf32>
    %cst_81 = arith.constant dense<0.000000e+00> : vector<8x8xf32>
    %110 = tpu.matmul %2, %109, %cst_81 {dimension_numbers = #tpu.dot_dimension_numbers<[1], [0], [0], [1], [0, 0, 1, 1], [], []>} : vector<8x32xf32>, vector<32x8xf32>, vector<8x8xf32> -> vector<8x8xf32>
    %c3_82 = arith.constant 3 : index
    %c0_83 = arith.constant 0 : index
    %c0_84 = arith.constant 0 : index
    %111 = vector.load %arg5[%c3_82, %c0_83, %c0_84] : memref<4x32x8xf32, #tpu.memory_space<vmem>>, vector<1x32x8xf32>
    %112 = vector.shape_cast %111 : vector<1x32x8xf32> to vector<32x8xf32>
    %cst_85 = arith.constant dense<0.000000e+00> : vector<8x8xf32>
    %113 = tpu.matmul %2, %112, %cst_85 {dimension_numbers = #tpu.dot_dimension_numbers<[1], [0], [0], [1], [0, 0, 1, 1], [], []>} : vector<8x32xf32>, vector<32x8xf32>, vector<8x8xf32> -> vector<8x8xf32>
    %114 = tpu.transpose %110, [1, 0] : vector<8x8xf32> -> vector<8x8xf32>
    %cst_86 = arith.constant dense<0.000000e+00> : vector<8x8xf32>
    %115 = tpu.matmul %107, %114, %cst_86 {dimension_numbers = #tpu.dot_dimension_numbers<[1], [0], [0], [1], [0, 0, 1, 1], [], []>} : vector<8x8xf32>, vector<8x8xf32>, vector<8x8xf32> -> vector<8x8xf32>
    %cst_87 = arith.constant 0.000000e+00 : f32
    %116 = vector.broadcast %cst_87 : f32 to vector<1x8xf32>
    %117 = arith.cmpf oeq, %4, %116 : vector<1x8xf32>
    %cst_88 = arith.constant -1.000000e+20 : f32
    %118 = vector.shape_cast %117 : vector<1x8xi1> to vector<1x8xi1>
    %119 = vector.broadcast %118 : vector<1x8xi1> to vector<8x8xi1>
    %120 = vector.broadcast %cst_88 : f32 to vector<8x8xf32>
    %121 = arith.select %119, %120, %115 : vector<8x8xi1>, vector<8x8xf32>
    %cst_89 = arith.constant 0.176776692 : f32
    %122 = vector.broadcast %cst_89 : f32 to vector<8x8xf32>
    %123 = arith.mulf %121, %122 : vector<8x8xf32>
    %cst_90 = arith.constant dense<0xFF800000> : vector<8xf32>
    %124 = vector.multi_reduction <maximumf>, %123, %cst_90 [1] : vector<8x8xf32> to vector<8xf32>
    %125 = vector.shape_cast %124 : vector<8xf32> to vector<8x1xf32>
    %126 = vector.broadcast %125 : vector<8x1xf32> to vector<8x8xf32>
    %127 = arith.subf %123, %126 : vector<8x8xf32>
    %128 = math.exp %127 : vector<8x8xf32>
    %cst_91 = arith.constant dense<0.000000e+00> : vector<8xf32>
    %129 = vector.multi_reduction <add>, %128, %cst_91 [1] : vector<8x8xf32> to vector<8xf32>
    %130 = vector.shape_cast %129 : vector<8xf32> to vector<8x1xf32>
    %131 = vector.broadcast %130 : vector<8x1xf32> to vector<8x8xf32>
    %132 = arith.divf %128, %131 : vector<8x8xf32>
    %cst_92 = arith.constant dense<0.000000e+00> : vector<8x8xf32>
    %133 = tpu.matmul %132, %113, %cst_92 {dimension_numbers = #tpu.dot_dimension_numbers<[1], [0], [0], [1], [0, 0, 1, 1], [], []>} : vector<8x8xf32>, vector<8x8xf32>, vector<8x8xf32> -> vector<8x8xf32>
    %c3_93 = arith.constant 3 : index
    %c0_94 = arith.constant 0 : index
    %c0_95 = arith.constant 0 : index
    %134 = vector.load %arg6[%c3_93, %c0_94, %c0_95] : memref<4x8x32xf32, #tpu.memory_space<vmem>>, vector<1x8x32xf32>
    %135 = vector.shape_cast %134 : vector<1x8x32xf32> to vector<8x32xf32>
    %cst_96 = arith.constant dense<0.000000e+00> : vector<8x32xf32>
    %136 = tpu.matmul %133, %135, %cst_96 {dimension_numbers = #tpu.dot_dimension_numbers<[1], [0], [0], [1], [0, 0, 1, 1], [], []>} : vector<8x8xf32>, vector<8x32xf32>, vector<8x32xf32> -> vector<8x32xf32>
    %137 = arith.addf %104, %136 : vector<8x32xf32>
    %138 = vector.broadcast %0 : vector<1x32xf32> to vector<8x32xf32>
    %139 = arith.addf %137, %138 : vector<8x32xf32>
    %c0_97 = arith.constant 0 : index
    %c0_98 = arith.constant 0 : index
    %140 = vector.load %arg17[%c0_97, %c0_98] : memref<16x32xf32, #tpu.memory_space<vmem>>, vector<8x32xf32>
    tpu.vector_store %arg17[%c0_97, %c0_98], %139 {strides = array<i32>} : memref<16x32xf32, #tpu.memory_space<vmem>>, vector<8x32xf32>,
    %c8 = arith.constant 8 : index
    %c0_99 = arith.constant 0 : index
    %141 = vector.load %arg0[%c8, %c0_99] : memref<16x32xf32, #tpu.memory_space<vmem>>, vector<8x32xf32>
    %c8_100 = arith.constant 8 : index
    %c0_101 = arith.constant 0 : index
    %142 = vector.load %arg1[%c8_100, %c0_101] : memref<16x32xf32, #tpu.memory_space<vmem>>, vector<8x32xf32>
    %c1_102 = arith.constant 1 : index
    %c0_103 = arith.constant 0 : index
    %c0_104 = arith.constant 0 : index
    %143 = vector.load %arg2[%c1_102, %c0_103, %c0_104] : memref<2x1x8xf32, #tpu.memory_space<vmem>>, vector<1x1x8xf32>
    %144 = vector.shape_cast %143 : vector<1x1x8xf32> to vector<1x8xf32>
    %cst_105 = arith.constant 0.000000e+00 : f32
    %145 = vector.broadcast %cst_105 : f32 to vector<8x32xf32>
    %c0_106 = arith.constant 0 : index
    %c0_107 = arith.constant 0 : index
    %c0_108 = arith.constant 0 : index
    %146 = vector.load %arg3[%c0_106, %c0_107, %c0_108] : memref<4x32x8xf32, #tpu.memory_space<vmem>>, vector<1x32x8xf32>
    %147 = vector.shape_cast %146 : vector<1x32x8xf32> to vector<32x8xf32>
    %cst_109 = arith.constant dense<0.000000e+00> : vector<8x8xf32>
    %148 = tpu.matmul %141, %147, %cst_109 {dimension_numbers = #tpu.dot_dimension_numbers<[1], [0], [0], [1], [0, 0, 1, 1], [], []>} : vector<8x32xf32>, vector<32x8xf32>, vector<8x8xf32> -> vector<8x8xf32>
    %c0_110 = arith.constant 0 : index
    %c0_111 = arith.constant 0 : index
    %c0_112 = arith.constant 0 : index
    %149 = vector.load %arg4[%c0_110, %c0_111, %c0_112] : memref<4x32x8xf32, #tpu.memory_space<vmem>>, vector<1x32x8xf32>
    %150 = vector.shape_cast %149 : vector<1x32x8xf32> to vector<32x8xf32>
    %cst_113 = arith.constant dense<0.000000e+00> : vector<8x8xf32>
    %151 = tpu.matmul %142, %150, %cst_113 {dimension_numbers = #tpu.dot_dimension_numbers<[1], [0], [0], [1], [0, 0, 1, 1], [], []>} : vector<8x32xf32>, vector<32x8xf32>, vector<8x8xf32> -> vector<8x8xf32>
    %c0_114 = arith.constant 0 : index
    %c0_115 = arith.constant 0 : index
    %c0_116 = arith.constant 0 : index
    %152 = vector.load %arg5[%c0_114, %c0_115, %c0_116] : memref<4x32x8xf32, #tpu.memory_space<vmem>>, vector<1x32x8xf32>
    %153 = vector.shape_cast %152 : vector<1x32x8xf32> to vector<32x8xf32>
    %cst_117 = arith.constant dense<0.000000e+00> : vector<8x8xf32>
    %154 = tpu.matmul %142, %153, %cst_117 {dimension_numbers = #tpu.dot_dimension_numbers<[1], [0], [0], [1], [0, 0, 1, 1], [], []>} : vector<8x32xf32>, vector<32x8xf32>, vector<8x8xf32> -> vector<8x8xf32>
    %155 = tpu.transpose %151, [1, 0] : vector<8x8xf32> -> vector<8x8xf32>
    %cst_118 = arith.constant dense<0.000000e+00> : vector<8x8xf32>
    %156 = tpu.matmul %148, %155, %cst_118 {dimension_numbers = #tpu.dot_dimension_numbers<[1], [0], [0], [1], [0, 0, 1, 1], [], []>} : vector<8x8xf32>, vector<8x8xf32>, vector<8x8xf32> -> vector<8x8xf32>
    %cst_119 = arith.constant 0.000000e+00 : f32
    %157 = vector.broadcast %cst_119 : f32 to vector<1x8xf32>
    %158 = arith.cmpf oeq, %144, %157 : vector<1x8xf32>
    %cst_120 = arith.constant -1.000000e+20 : f32
    %159 = vector.shape_cast %158 : vector<1x8xi1> to vector<1x8xi1>
    %160 = vector.broadcast %159 : vector<1x8xi1> to vector<8x8xi1>
    %161 = vector.broadcast %cst_120 : f32 to vector<8x8xf32>
    %162 = arith.select %160, %161, %156 : vector<8x8xi1>, vector<8x8xf32>
    %cst_121 = arith.constant 0.176776692 : f32
    %163 = vector.broadcast %cst_121 : f32 to vector<8x8xf32>
    %164 = arith.mulf %162, %163 : vector<8x8xf32>
    %cst_122 = arith.constant dense<0xFF800000> : vector<8xf32>
    %165 = vector.multi_reduction <maximumf>, %164, %cst_122 [1] : vector<8x8xf32> to vector<8xf32>
    %166 = vector.shape_cast %165 : vector<8xf32> to vector<8x1xf32>
    %167 = vector.broadcast %166 : vector<8x1xf32> to vector<8x8xf32>
    %168 = arith.subf %164, %167 : vector<8x8xf32>
    %169 = math.exp %168 : vector<8x8xf32>
    %cst_123 = arith.constant dense<0.000000e+00> : vector<8xf32>
    %170 = vector.multi_reduction <add>, %169, %cst_123 [1] : vector<8x8xf32> to vector<8xf32>
    %171 = vector.shape_cast %170 : vector<8xf32> to vector<8x1xf32>
    %172 = vector.broadcast %171 : vector<8x1xf32> to vector<8x8xf32>
    %173 = arith.divf %169, %172 : vector<8x8xf32>
    %cst_124 = arith.constant dense<0.000000e+00> : vector<8x8xf32>
    %174 = tpu.matmul %173, %154, %cst_124 {dimension_numbers = #tpu.dot_dimension_numbers<[1], [0], [0], [1], [0, 0, 1, 1], [], []>} : vector<8x8xf32>, vector<8x8xf32>, vector<8x8xf32> -> vector<8x8xf32>
    %c0_125 = arith.constant 0 : index
    %c0_126 = arith.constant 0 : index
    %c0_127 = arith.constant 0 : index
    %175 = vector.load %arg6[%c0_125, %c0_126, %c0_127] : memref<4x8x32xf32, #tpu.memory_space<vmem>>, vector<1x8x32xf32>
    %176 = vector.shape_cast %175 : vector<1x8x32xf32> to vector<8x32xf32>
    %cst_128 = arith.constant dense<0.000000e+00> : vector<8x32xf32>
    %177 = tpu.matmul %174, %176, %cst_128 {dimension_numbers = #tpu.dot_dimension_numbers<[1], [0], [0], [1], [0, 0, 1, 1], [], []>} : vector<8x8xf32>, vector<8x32xf32>, vector<8x32xf32> -> vector<8x32xf32>
    %178 = arith.addf %145, %177 : vector<8x32xf32>
    %c1_129 = arith.constant 1 : index
    %c0_130 = arith.constant 0 : index
    %c0_131 = arith.constant 0 : index
    %179 = vector.load %arg3[%c1_129, %c0_130, %c0_131] : memref<4x32x8xf32, #tpu.memory_space<vmem>>, vector<1x32x8xf32>
    %180 = vector.shape_cast %179 : vector<1x32x8xf32> to vector<32x8xf32>
    %cst_132 = arith.constant dense<0.000000e+00> : vector<8x8xf32>
    %181 = tpu.matmul %141, %180, %cst_132 {dimension_numbers = #tpu.dot_dimension_numbers<[1], [0], [0], [1], [0, 0, 1, 1], [], []>} : vector<8x32xf32>, vector<32x8xf32>, vector<8x8xf32> -> vector<8x8xf32>
    %c1_133 = arith.constant 1 : index
    %c0_134 = arith.constant 0 : index
    %c0_135 = arith.constant 0 : index
    %182 = vector.load %arg4[%c1_133, %c0_134, %c0_135] : memref<4x32x8xf32, #tpu.memory_space<vmem>>, vector<1x32x8xf32>
    %183 = vector.shape_cast %182 : vector<1x32x8xf32> to vector<32x8xf32>
    %cst_136 = arith.constant dense<0.000000e+00> : vector<8x8xf32>
    %184 = tpu.matmul %142, %183, %cst_136 {dimension_numbers = #tpu.dot_dimension_numbers<[1], [0], [0], [1], [0, 0, 1, 1], [], []>} : vector<8x32xf32>, vector<32x8xf32>, vector<8x8xf32> -> vector<8x8xf32>
    %c1_137 = arith.constant 1 : index
    %c0_138 = arith.constant 0 : index
    %c0_139 = arith.constant 0 : index
    %185 = vector.load %arg5[%c1_137, %c0_138, %c0_139] : memref<4x32x8xf32, #tpu.memory_space<vmem>>, vector<1x32x8xf32>
    %186 = vector.shape_cast %185 : vector<1x32x8xf32> to vector<32x8xf32>
    %cst_140 = arith.constant dense<0.000000e+00> : vector<8x8xf32>
    %187 = tpu.matmul %142, %186, %cst_140 {dimension_numbers = #tpu.dot_dimension_numbers<[1], [0], [0], [1], [0, 0, 1, 1], [], []>} : vector<8x32xf32>, vector<32x8xf32>, vector<8x8xf32> -> vector<8x8xf32>
    %188 = tpu.transpose %184, [1, 0] : vector<8x8xf32> -> vector<8x8xf32>
    %cst_141 = arith.constant dense<0.000000e+00> : vector<8x8xf32>
    %189 = tpu.matmul %181, %188, %cst_141 {dimension_numbers = #tpu.dot_dimension_numbers<[1], [0], [0], [1], [0, 0, 1, 1], [], []>} : vector<8x8xf32>, vector<8x8xf32>, vector<8x8xf32> -> vector<8x8xf32>
    %cst_142 = arith.constant 0.000000e+00 : f32
    %190 = vector.broadcast %cst_142 : f32 to vector<1x8xf32>
    %191 = arith.cmpf oeq, %144, %190 : vector<1x8xf32>
    %cst_143 = arith.constant -1.000000e+20 : f32
    %192 = vector.shape_cast %191 : vector<1x8xi1> to vector<1x8xi1>
    %193 = vector.broadcast %192 : vector<1x8xi1> to vector<8x8xi1>
    %194 = vector.broadcast %cst_143 : f32 to vector<8x8xf32>
    %195 = arith.select %193, %194, %189 : vector<8x8xi1>, vector<8x8xf32>
    %cst_144 = arith.constant 0.176776692 : f32
    %196 = vector.broadcast %cst_144 : f32 to vector<8x8xf32>
    %197 = arith.mulf %195, %196 : vector<8x8xf32>
    %cst_145 = arith.constant dense<0xFF800000> : vector<8xf32>
    %198 = vector.multi_reduction <maximumf>, %197, %cst_145 [1] : vector<8x8xf32> to vector<8xf32>
    %199 = vector.shape_cast %198 : vector<8xf32> to vector<8x1xf32>
    %200 = vector.broadcast %199 : vector<8x1xf32> to vector<8x8xf32>
    %201 = arith.subf %197, %200 : vector<8x8xf32>
    %202 = math.exp %201 : vector<8x8xf32>
    %cst_146 = arith.constant dense<0.000000e+00> : vector<8xf32>
    %203 = vector.multi_reduction <add>, %202, %cst_146 [1] : vector<8x8xf32> to vector<8xf32>
    %204 = vector.shape_cast %203 : vector<8xf32> to vector<8x1xf32>
    %205 = vector.broadcast %204 : vector<8x1xf32> to vector<8x8xf32>
    %206 = arith.divf %202, %205 : vector<8x8xf32>
    %cst_147 = arith.constant dense<0.000000e+00> : vector<8x8xf32>
    %207 = tpu.matmul %206, %187, %cst_147 {dimension_numbers = #tpu.dot_dimension_numbers<[1], [0], [0], [1], [0, 0, 1, 1], [], []>} : vector<8x8xf32>, vector<8x8xf32>, vector<8x8xf32> -> vector<8x8xf32>
    %c1_148 = arith.constant 1 : index
    %c0_149 = arith.constant 0 : index
    %c0_150 = arith.constant 0 : index
    %208 = vector.load %arg6[%c1_148, %c0_149, %c0_150] : memref<4x8x32xf32, #tpu.memory_space<vmem>>, vector<1x8x32xf32>
    %209 = vector.shape_cast %208 : vector<1x8x32xf32> to vector<8x32xf32>
    %cst_151 = arith.constant dense<0.000000e+00> : vector<8x32xf32>
    %210 = tpu.matmul %207, %209, %cst_151 {dimension_numbers = #tpu.dot_dimension_numbers<[1], [0], [0], [1], [0, 0, 1, 1], [], []>} : vector<8x8xf32>, vector<8x32xf32>, vector<8x32xf32> -> vector<8x32xf32>
    %211 = arith.addf %178, %210 : vector<8x32xf32>
    %c2_152 = arith.constant 2 : index
    %c0_153 = arith.constant 0 : index
    %c0_154 = arith.constant 0 : index
    %212 = vector.load %arg3[%c2_152, %c0_153, %c0_154] : memref<4x32x8xf32, #tpu.memory_space<vmem>>, vector<1x32x8xf32>
    %213 = vector.shape_cast %212 : vector<1x32x8xf32> to vector<32x8xf32>
    %cst_155 = arith.constant dense<0.000000e+00> : vector<8x8xf32>
    %214 = tpu.matmul %141, %213, %cst_155 {dimension_numbers = #tpu.dot_dimension_numbers<[1], [0], [0], [1], [0, 0, 1, 1], [], []>} : vector<8x32xf32>, vector<32x8xf32>, vector<8x8xf32> -> vector<8x8xf32>
    %c2_156 = arith.constant 2 : index
    %c0_157 = arith.constant 0 : index
    %c0_158 = arith.constant 0 : index
    %215 = vector.load %arg4[%c2_156, %c0_157, %c0_158] : memref<4x32x8xf32, #tpu.memory_space<vmem>>, vector<1x32x8xf32>
    %216 = vector.shape_cast %215 : vector<1x32x8xf32> to vector<32x8xf32>
    %cst_159 = arith.constant dense<0.000000e+00> : vector<8x8xf32>
    %217 = tpu.matmul %142, %216, %cst_159 {dimension_numbers = #tpu.dot_dimension_numbers<[1], [0], [0], [1], [0, 0, 1, 1], [], []>} : vector<8x32xf32>, vector<32x8xf32>, vector<8x8xf32> -> vector<8x8xf32>
    %c2_160 = arith.constant 2 : index
    %c0_161 = arith.constant 0 : index
    %c0_162 = arith.constant 0 : index
    %218 = vector.load %arg5[%c2_160, %c0_161, %c0_162] : memref<4x32x8xf32, #tpu.memory_space<vmem>>, vector<1x32x8xf32>
    %219 = vector.shape_cast %218 : vector<1x32x8xf32> to vector<32x8xf32>
    %cst_163 = arith.constant dense<0.000000e+00> : vector<8x8xf32>
    %220 = tpu.matmul %142, %219, %cst_163 {dimension_numbers = #tpu.dot_dimension_numbers<[1], [0], [0], [1], [0, 0, 1, 1], [], []>} : vector<8x32xf32>, vector<32x8xf32>, vector<8x8xf32> -> vector<8x8xf32>
    %221 = tpu.transpose %217, [1, 0] : vector<8x8xf32> -> vector<8x8xf32>
    %cst_164 = arith.constant dense<0.000000e+00> : vector<8x8xf32>
    %222 = tpu.matmul %214, %221, %cst_164 {dimension_numbers = #tpu.dot_dimension_numbers<[1], [0], [0], [1], [0, 0, 1, 1], [], []>} : vector<8x8xf32>, vector<8x8xf32>, vector<8x8xf32> -> vector<8x8xf32>
    %cst_165 = arith.constant 0.000000e+00 : f32
    %223 = vector.broadcast %cst_165 : f32 to vector<1x8xf32>
    %224 = arith.cmpf oeq, %144, %223 : vector<1x8xf32>
    %cst_166 = arith.constant -1.000000e+20 : f32
    %225 = vector.shape_cast %224 : vector<1x8xi1> to vector<1x8xi1>
    %226 = vector.broadcast %225 : vector<1x8xi1> to vector<8x8xi1>
    %227 = vector.broadcast %cst_166 : f32 to vector<8x8xf32>
    %228 = arith.select %226, %227, %222 : vector<8x8xi1>, vector<8x8xf32>
    %cst_167 = arith.constant 0.176776692 : f32
    %229 = vector.broadcast %cst_167 : f32 to vector<8x8xf32>
    %230 = arith.mulf %228, %229 : vector<8x8xf32>
    %cst_168 = arith.constant dense<0xFF800000> : vector<8xf32>
    %231 = vector.multi_reduction <maximumf>, %230, %cst_168 [1] : vector<8x8xf32> to vector<8xf32>
    %232 = vector.shape_cast %231 : vector<8xf32> to vector<8x1xf32>
    %233 = vector.broadcast %232 : vector<8x1xf32> to vector<8x8xf32>
    %234 = arith.subf %230, %233 : vector<8x8xf32>
    %235 = math.exp %234 : vector<8x8xf32>
    %cst_169 = arith.constant dense<0.000000e+00> : vector<8xf32>
    %236 = vector.multi_reduction <add>, %235, %cst_169 [1] : vector<8x8xf32> to vector<8xf32>
    %237 = vector.shape_cast %236 : vector<8xf32> to vector<8x1xf32>
    %238 = vector.broadcast %237 : vector<8x1xf32> to vector<8x8xf32>
    %239 = arith.divf %235, %238 : vector<8x8xf32>
    %cst_170 = arith.constant dense<0.000000e+00> : vector<8x8xf32>
    %240 = tpu.matmul %239, %220, %cst_170 {dimension_numbers = #tpu.dot_dimension_numbers<[1], [0], [0], [1], [0, 0, 1, 1], [], []>} : vector<8x8xf32>, vector<8x8xf32>, vector<8x8xf32> -> vector<8x8xf32>
    %c2_171 = arith.constant 2 : index
    %c0_172 = arith.constant 0 : index
    %c0_173 = arith.constant 0 : index
    %241 = vector.load %arg6[%c2_171, %c0_172, %c0_173] : memref<4x8x32xf32, #tpu.memory_space<vmem>>, vector<1x8x32xf32>
    %242 = vector.shape_cast %241 : vector<1x8x32xf32> to vector<8x32xf32>
    %cst_174 = arith.constant dense<0.000000e+00> : vector<8x32xf32>
    %243 = tpu.matmul %240, %242, %cst_174 {dimension_numbers = #tpu.dot_dimension_numbers<[1], [0], [0], [1], [0, 0, 1, 1], [], []>} : vector<8x8xf32>, vector<8x32xf32>, vector<8x32xf32> -> vector<8x32xf32>
    %244 = arith.addf %211, %243 : vector<8x32xf32>
    %c3_175 = arith.constant 3 : index
    %c0_176 = arith.constant 0 : index
    %c0_177 = arith.constant 0 : index
    %245 = vector.load %arg3[%c3_175, %c0_176, %c0_177] : memref<4x32x8xf32, #tpu.memory_space<vmem>>, vector<1x32x8xf32>
    %246 = vector.shape_cast %245 : vector<1x32x8xf32> to vector<32x8xf32>
    %cst_178 = arith.constant dense<0.000000e+00> : vector<8x8xf32>
    %247 = tpu.matmul %141, %246, %cst_178 {dimension_numbers = #tpu.dot_dimension_numbers<[1], [0], [0], [1], [0, 0, 1, 1], [], []>} : vector<8x32xf32>, vector<32x8xf32>, vector<8x8xf32> -> vector<8x8xf32>
    %c3_179 = arith.constant 3 : index
    %c0_180 = arith.constant 0 : index
    %c0_181 = arith.constant 0 : index
    %248 = vector.load %arg4[%c3_179, %c0_180, %c0_181] : memref<4x32x8xf32, #tpu.memory_space<vmem>>, vector<1x32x8xf32>
    %249 = vector.shape_cast %248 : vector<1x32x8xf32> to vector<32x8xf32>
    %cst_182 = arith.constant dense<0.000000e+00> : vector<8x8xf32>
    %250 = tpu.matmul %142, %249, %cst_182 {dimension_numbers = #tpu.dot_dimension_numbers<[1], [0], [0], [1], [0, 0, 1, 1], [], []>} : vector<8x32xf32>, vector<32x8xf32>, vector<8x8xf32> -> vector<8x8xf32>
    %c3_183 = arith.constant 3 : index
    %c0_184 = arith.constant 0 : index
    %c0_185 = arith.constant 0 : index
    %251 = vector.load %arg5[%c3_183, %c0_184, %c0_185] : memref<4x32x8xf32, #tpu.memory_space<vmem>>, vector<1x32x8xf32>
    %252 = vector.shape_cast %251 : vector<1x32x8xf32> to vector<32x8xf32>
    %cst_186 = arith.constant dense<0.000000e+00> : vector<8x8xf32>
    %253 = tpu.matmul %142, %252, %cst_186 {dimension_numbers = #tpu.dot_dimension_numbers<[1], [0], [0], [1], [0, 0, 1, 1], [], []>} : vector<8x32xf32>, vector<32x8xf32>, vector<8x8xf32> -> vector<8x8xf32>
    %254 = tpu.transpose %250, [1, 0] : vector<8x8xf32> -> vector<8x8xf32>
    %cst_187 = arith.constant dense<0.000000e+00> : vector<8x8xf32>
    %255 = tpu.matmul %247, %254, %cst_187 {dimension_numbers = #tpu.dot_dimension_numbers<[1], [0], [0], [1], [0, 0, 1, 1], [], []>} : vector<8x8xf32>, vector<8x8xf32>, vector<8x8xf32> -> vector<8x8xf32>
    %cst_188 = arith.constant 0.000000e+00 : f32
    %256 = vector.broadcast %cst_188 : f32 to vector<1x8xf32>
    %257 = arith.cmpf oeq, %144, %256 : vector<1x8xf32>
    %cst_189 = arith.constant -1.000000e+20 : f32
    %258 = vector.shape_cast %257 : vector<1x8xi1> to vector<1x8xi1>
    %259 = vector.broadcast %258 : vector<1x8xi1> to vector<8x8xi1>
    %260 = vector.broadcast %cst_189 : f32 to vector<8x8xf32>
    %261 = arith.select %259, %260, %255 : vector<8x8xi1>, vector<8x8xf32>
    %cst_190 = arith.constant 0.176776692 : f32
    %262 = vector.broadcast %cst_190 : f32 to vector<8x8xf32>
    %263 = arith.mulf %261, %262 : vector<8x8xf32>
    %cst_191 = arith.constant dense<0xFF800000> : vector<8xf32>
    %264 = vector.multi_reduction <maximumf>, %263, %cst_191 [1] : vector<8x8xf32> to vector<8xf32>
    %265 = vector.shape_cast %264 : vector<8xf32> to vector<8x1xf32>
    %266 = vector.broadcast %265 : vector<8x1xf32> to vector<8x8xf32>
    %267 = arith.subf %263, %266 : vector<8x8xf32>
    %268 = math.exp %267 : vector<8x8xf32>
    %cst_192 = arith.constant dense<0.000000e+00> : vector<8xf32>
    %269 = vector.multi_reduction <add>, %268, %cst_192 [1] : vector<8x8xf32> to vector<8xf32>
    %270 = vector.shape_cast %269 : vector<8xf32> to vector<8x1xf32>
    %271 = vector.broadcast %270 : vector<8x1xf32> to vector<8x8xf32>
    %272 = arith.divf %268, %271 : vector<8x8xf32>
    %cst_193 = arith.constant dense<0.000000e+00> : vector<8x8xf32>
    %273 = tpu.matmul %272, %253, %cst_193 {dimension_numbers = #tpu.dot_dimension_numbers<[1], [0], [0], [1], [0, 0, 1, 1], [], []>} : vector<8x8xf32>, vector<8x8xf32>, vector<8x8xf32> -> vector<8x8xf32>
    %c3_194 = arith.constant 3 : index
    %c0_195 = arith.constant 0 : index
    %c0_196 = arith.constant 0 : index
    %274 = vector.load %arg6[%c3_194, %c0_195, %c0_196] : memref<4x8x32xf32, #tpu.memory_space<vmem>>, vector<1x8x32xf32>
    %275 = vector.shape_cast %274 : vector<1x8x32xf32> to vector<8x32xf32>
    %cst_197 = arith.constant dense<0.000000e+00> : vector<8x32xf32>
    %276 = tpu.matmul %273, %275, %cst_197 {dimension_numbers = #tpu.dot_dimension_numbers<[1], [0], [0], [1], [0, 0, 1, 1], [], []>} : vector<8x8xf32>, vector<8x32xf32>, vector<8x32xf32> -> vector<8x32xf32>
    %277 = arith.addf %244, %276 : vector<8x32xf32>
    %278 = vector.broadcast %0 : vector<1x32xf32> to vector<8x32xf32>
    %279 = arith.addf %277, %278 : vector<8x32xf32>
    %c8_198 = arith.constant 8 : index
    %c0_199 = arith.constant 0 : index
    %280 = vector.load %arg17[%c8_198, %c0_199] : memref<16x32xf32, #tpu.memory_space<vmem>>, vector<8x32xf32>
    tpu.vector_store %arg17[%c8_198, %c0_199], %279 {strides = array<i32>} : memref<16x32xf32, #tpu.memory_space<vmem>>, vector<8x32xf32>,
    %c0_200 = arith.constant 0 : index
    %c0_201 = arith.constant 0 : index
    %281 = vector.load %arg17[%c0_200, %c0_201] : memref<16x32xf32, #tpu.memory_space<vmem>>, vector<16x32xf32>
    %c0_202 = arith.constant 0 : index
    %c0_203 = arith.constant 0 : index
    %282 = vector.load %arg0[%c0_202, %c0_203] : memref<16x32xf32, #tpu.memory_space<vmem>>, vector<16x32xf32>
    %283 = arith.addf %281, %282 : vector<16x32xf32>
    %cst_204 = arith.constant dense<0.000000e+00> : vector<16xf32>
    %284 = vector.multi_reduction <add>, %283, %cst_204 [1] : vector<16x32xf32> to vector<16xf32>
    %285 = vector.shape_cast %284 : vector<16xf32> to vector<16x1xf32>
    %cst_205 = arith.constant 3.200000e+01 : f32
    %286 = vector.broadcast %cst_205 : f32 to vector<16x1xf32>
    %287 = arith.divf %285, %286 : vector<16x1xf32>
    %288 = vector.broadcast %287 : vector<16x1xf32> to vector<16x32xf32>
    %289 = arith.subf %283, %288 : vector<16x32xf32>
    %290 = arith.mulf %289, %289 : vector<16x32xf32>
    %cst_206 = arith.constant dense<0.000000e+00> : vector<16xf32>
    %291 = vector.multi_reduction <add>, %290, %cst_206 [1] : vector<16x32xf32> to vector<16xf32>
    %292 = vector.shape_cast %291 : vector<16xf32> to vector<16x1xf32>
    %cst_207 = arith.constant 3.200000e+01 : f32
    %293 = vector.broadcast %cst_207 : f32 to vector<16x1xf32>
    %294 = arith.divf %292, %293 : vector<16x1xf32>
    %295 = vector.broadcast %287 : vector<16x1xf32> to vector<16x32xf32>
    %296 = arith.subf %283, %295 : vector<16x32xf32>
    %cst_208 = arith.constant 9.99999974E-6 : f32
    %297 = vector.broadcast %cst_208 : f32 to vector<16x1xf32>
    %298 = arith.addf %294, %297 : vector<16x1xf32>
    %299 = math.rsqrt %298 : vector<16x1xf32>
    %300 = vector.broadcast %299 : vector<16x1xf32> to vector<16x32xf32>
    %301 = arith.mulf %296, %300 : vector<16x32xf32>
    %c0_209 = arith.constant 0 : index
    %c0_210 = arith.constant 0 : index
    %302 = vector.load %arg8[%c0_209, %c0_210] : memref<1x32xf32, #tpu.memory_space<vmem>>, vector<1x32xf32>
    %303 = vector.broadcast %302 : vector<1x32xf32> to vector<16x32xf32>
    %304 = arith.mulf %301, %303 : vector<16x32xf32>
    %c0_211 = arith.constant 0 : index
    %c0_212 = arith.constant 0 : index
    %305 = vector.load %arg9[%c0_211, %c0_212] : memref<1x32xf32, #tpu.memory_space<vmem>>, vector<1x32xf32>
    %306 = vector.broadcast %305 : vector<1x32xf32> to vector<16x32xf32>
    %307 = arith.addf %304, %306 : vector<16x32xf32>
    %c0_213 = arith.constant 0 : index
    %c0_214 = arith.constant 0 : index
    %308 = vector.load %arg10[%c0_213, %c0_214] : memref<32x128xf32, #tpu.memory_space<vmem>>, vector<32x128xf32>
    %cst_215 = arith.constant dense<0.000000e+00> : vector<16x128xf32>
    %309 = tpu.matmul %307, %308, %cst_215 {dimension_numbers = #tpu.dot_dimension_numbers<[1], [0], [0], [1], [0, 0, 1, 1], [], []>} : vector<16x32xf32>, vector<32x128xf32>, vector<16x128xf32> -> vector<16x128xf32>
    %c0_216 = arith.constant 0 : index
    %c0_217 = arith.constant 0 : index
    %310 = vector.load %arg11[%c0_216, %c0_217] : memref<1x128xf32, #tpu.memory_space<vmem>>, vector<1x128xf32>
    %311 = vector.broadcast %310 : vector<1x128xf32> to vector<16x128xf32>
    %312 = arith.addf %309, %311 : vector<16x128xf32>
    %cst_218 = arith.constant 0.000000e+00 : f32
    %313 = vector.broadcast %cst_218 : f32 to vector<16x128xf32>
    %314 = arith.maximumf %312, %313 : vector<16x128xf32>
    %c0_219 = arith.constant 0 : index
    %c0_220 = arith.constant 0 : index
    %315 = vector.load %arg12[%c0_219, %c0_220] : memref<128x32xf32, #tpu.memory_space<vmem>>, vector<128x32xf32>
    %cst_221 = arith.constant dense<0.000000e+00> : vector<16x32xf32>
    %316 = tpu.matmul %314, %315, %cst_221 {dimension_numbers = #tpu.dot_dimension_numbers<[1], [0], [0], [1], [0, 0, 1, 1], [], []>} : vector<16x128xf32>, vector<128x32xf32>, vector<16x32xf32> -> vector<16x32xf32>
    %c0_222 = arith.constant 0 : index
    %c0_223 = arith.constant 0 : index
    %317 = vector.load %arg13[%c0_222, %c0_223] : memref<1x32xf32, #tpu.memory_space<vmem>>, vector<1x32xf32>
    %318 = vector.broadcast %317 : vector<1x32xf32> to vector<16x32xf32>
    %319 = arith.addf %316, %318 : vector<16x32xf32>
    %320 = arith.addf %319, %307 : vector<16x32xf32>
    %cst_224 = arith.constant dense<0.000000e+00> : vector<16xf32>
    %321 = vector.multi_reduction <add>, %320, %cst_224 [1] : vector<16x32xf32> to vector<16xf32>
    %322 = vector.shape_cast %321 : vector<16xf32> to vector<16x1xf32>
    %cst_225 = arith.constant 3.200000e+01 : f32
    %323 = vector.broadcast %cst_225 : f32 to vector<16x1xf32>
    %324 = arith.divf %322, %323 : vector<16x1xf32>
    %325 = vector.broadcast %324 : vector<16x1xf32> to vector<16x32xf32>
    %326 = arith.subf %320, %325 : vector<16x32xf32>
    %327 = arith.mulf %326, %326 : vector<16x32xf32>
    %cst_226 = arith.constant dense<0.000000e+00> : vector<16xf32>
    %328 = vector.multi_reduction <add>, %327, %cst_226 [1] : vector<16x32xf32> to vector<16xf32>
    %329 = vector.shape_cast %328 : vector<16xf32> to vector<16x1xf32>
    %cst_227 = arith.constant 3.200000e+01 : f32
    %330 = vector.broadcast %cst_227 : f32 to vector<16x1xf32>
    %331 = arith.divf %329, %330 : vector<16x1xf32>
    %332 = vector.broadcast %324 : vector<16x1xf32> to vector<16x32xf32>
    %333 = arith.subf %320, %332 : vector<16x32xf32>
    %cst_228 = arith.constant 9.99999974E-6 : f32
    %334 = vector.broadcast %cst_228 : f32 to vector<16x1xf32>
    %335 = arith.addf %331, %334 : vector<16x1xf32>
    %336 = math.rsqrt %335 : vector<16x1xf32>
    %337 = vector.broadcast %336 : vector<16x1xf32> to vector<16x32xf32>
    %338 = arith.mulf %333, %337 : vector<16x32xf32>
    %c0_229 = arith.constant 0 : index
    %c0_230 = arith.constant 0 : index
    %339 = vector.load %arg14[%c0_229, %c0_230] : memref<1x32xf32, #tpu.memory_space<vmem>>, vector<1x32xf32>
    %340 = vector.broadcast %339 : vector<1x32xf32> to vector<16x32xf32>
    %341 = arith.mulf %338, %340 : vector<16x32xf32>
    %c0_231 = arith.constant 0 : index
    %c0_232 = arith.constant 0 : index
    %342 = vector.load %arg15[%c0_231, %c0_232] : memref<1x32xf32, #tpu.memory_space<vmem>>, vector<1x32xf32>
    %343 = vector.broadcast %342 : vector<1x32xf32> to vector<16x32xf32>
    %344 = arith.addf %341, %343 : vector<16x32xf32>
    %c0_233 = arith.constant 0 : index
    %c0_234 = arith.constant 0 : index
    %345 = vector.load %arg16[%c0_233, %c0_234] : memref<16x32xf32, #tpu.memory_space<vmem>>, vector<16x32xf32>
    tpu.vector_store %arg16[%c0_233, %c0_234], %344 {strides = array<i32>} : memref<16x32xf32, #tpu.memory_space<vmem>>, vector<16x32xf32>,
    return
  }
}

module attributes {stable_mosaic.version = 11 : i64} {
  func.func @attn_ln_kernel(%arg0: memref<16x32xf32, #tpu.memory_space<vmem>>, %arg1: memref<2x1x8xf32, #tpu.memory_space<vmem>>, %arg2: memref<4x32x8xf32, #tpu.memory_space<vmem>>, %arg3: memref<4x32x8xf32, #tpu.memory_space<vmem>>, %arg4: memref<4x32x8xf32, #tpu.memory_space<vmem>>, %arg5: memref<4x8x32xf32, #tpu.memory_space<vmem>>, %arg6: memref<1x32xf32, #tpu.memory_space<vmem>>, %arg7: memref<1x32xf32, #tpu.memory_space<vmem>>, %arg8: memref<1x32xf32, #tpu.memory_space<vmem>>, %arg9: memref<16x32xf32, #tpu.memory_space<vmem>>, %arg10: memref<16x32xf32, #tpu.memory_space<vmem>>) attributes {dimension_semantics = [], scalar_prefetch = 0 : i64, scratch_operands = 1 : i64, tpu.core_type = #tpu.core_type<tc>} {
    %0 = tpu.iota {dimensions = array<i32: 0>} : vector<8x8xi32>
    %1 = tpu.iota {dimensions = array<i32: 1>} : vector<8x8xi32>
    %2 = arith.cmpi sge, %0, %1 : vector<8x8xi32>
    %c0 = arith.constant 0 : index
    %c0_0 = arith.constant 0 : index
    %3 = vector.load %arg6[%c0, %c0_0] : memref<1x32xf32, #tpu.memory_space<vmem>>, vector<1x32xf32>
    %c0_1 = arith.constant 0 : index
    %c0_2 = arith.constant 0 : index
    %4 = vector.load %arg0[%c0_1, %c0_2] : memref<16x32xf32, #tpu.memory_space<vmem>>, vector<8x32xf32>
    %c0_3 = arith.constant 0 : index
    %c0_4 = arith.constant 0 : index
    %5 = vector.load %arg0[%c0_3, %c0_4] : memref<16x32xf32, #tpu.memory_space<vmem>>, vector<8x32xf32>
    %c0_5 = arith.constant 0 : index
    %c0_6 = arith.constant 0 : index
    %c0_7 = arith.constant 0 : index
    %6 = vector.load %arg1[%c0_5, %c0_6, %c0_7] : memref<2x1x8xf32, #tpu.memory_space<vmem>>, vector<1x1x8xf32>
    %7 = vector.shape_cast %6 : vector<1x1x8xf32> to vector<1x8xf32>
    %cst = arith.constant 0.000000e+00 : f32
    %8 = vector.broadcast %cst : f32 to vector<8x32xf32>
    %c0_8 = arith.constant 0 : index
    %c0_9 = arith.constant 0 : index
    %c0_10 = arith.constant 0 : index
    %9 = vector.load %arg2[%c0_8, %c0_9, %c0_10] : memref<4x32x8xf32, #tpu.memory_space<vmem>>, vector<1x32x8xf32>
    %10 = vector.shape_cast %9 : vector<1x32x8xf32> to vector<32x8xf32>
    %cst_11 = arith.constant dense<0.000000e+00> : vector<8x8xf32>
    %11 = tpu.matmul %4, %10, %cst_11 {dimension_numbers = #tpu.dot_dimension_numbers<[1], [0], [0], [1], [0, 0, 1, 1], [], []>} : vector<8x32xf32>, vector<32x8xf32>, vector<8x8xf32> -> vector<8x8xf32>
    %c0_12 = arith.constant 0 : index
    %c0_13 = arith.constant 0 : index
    %c0_14 = arith.constant 0 : index
    %12 = vector.load %arg3[%c0_12, %c0_13, %c0_14] : memref<4x32x8xf32, #tpu.memory_space<vmem>>, vector<1x32x8xf32>
    %13 = vector.shape_cast %12 : vector<1x32x8xf32> to vector<32x8xf32>
    %cst_15 = arith.constant dense<0.000000e+00> : vector<8x8xf32>
    %14 = tpu.matmul %5, %13, %cst_15 {dimension_numbers = #tpu.dot_dimension_numbers<[1], [0], [0], [1], [0, 0, 1, 1], [], []>} : vector<8x32xf32>, vector<32x8xf32>, vector<8x8xf32> -> vector<8x8xf32>
    %c0_16 = arith.constant 0 : index
    %c0_17 = arith.constant 0 : index
    %c0_18 = arith.constant 0 : index
    %15 = vector.load %arg4[%c0_16, %c0_17, %c0_18] : memref<4x32x8xf32, #tpu.memory_space<vmem>>, vector<1x32x8xf32>
    %16 = vector.shape_cast %15 : vector<1x32x8xf32> to vector<32x8xf32>
    %cst_19 = arith.constant dense<0.000000e+00> : vector<8x8xf32>
    %17 = tpu.matmul %5, %16, %cst_19 {dimension_numbers = #tpu.dot_dimension_numbers<[1], [0], [0], [1], [0, 0, 1, 1], [], []>} : vector<8x32xf32>, vector<32x8xf32>, vector<8x8xf32> -> vector<8x8xf32>
    %18 = tpu.transpose %14, [1, 0] : vector<8x8xf32> -> vector<8x8xf32>
    %cst_20 = arith.constant dense<0.000000e+00> : vector<8x8xf32>
    %19 = tpu.matmul %11, %18, %cst_20 {dimension_numbers = #tpu.dot_dimension_numbers<[1], [0], [0], [1], [0, 0, 1, 1], [], []>} : vector<8x8xf32>, vector<8x8xf32>, vector<8x8xf32> -> vector<8x8xf32>
    %cst_21 = arith.constant 0.000000e+00 : f32
    %20 = vector.broadcast %cst_21 : f32 to vector<1x8xf32>
    %21 = arith.cmpf oeq, %7, %20 : vector<1x8xf32>
    %cst_22 = arith.constant -1.000000e+20 : f32
    %22 = vector.shape_cast %21 : vector<1x8xi1> to vector<1x8xi1>
    %23 = vector.broadcast %22 : vector<1x8xi1> to vector<8x8xi1>
    %24 = vector.broadcast %cst_22 : f32 to vector<8x8xf32>
    %25 = arith.select %23, %24, %19 : vector<8x8xi1>, vector<8x8xf32>
    %cst_23 = arith.constant -1.000000e+20 : f32
    %26 = vector.broadcast %cst_23 : f32 to vector<8x8xf32>
    %27 = arith.select %2, %25, %26 : vector<8x8xi1>, vector<8x8xf32>
    %cst_24 = arith.constant 0.176776692 : f32
    %28 = vector.broadcast %cst_24 : f32 to vector<8x8xf32>
    %29 = arith.mulf %27, %28 : vector<8x8xf32>
    %cst_25 = arith.constant dense<0xFF800000> : vector<8xf32>
    %30 = vector.multi_reduction <maximumf>, %29, %cst_25 [1] : vector<8x8xf32> to vector<8xf32>
    %31 = vector.shape_cast %30 : vector<8xf32> to vector<8x1xf32>
    %32 = vector.broadcast %31 : vector<8x1xf32> to vector<8x8xf32>
    %33 = arith.subf %29, %32 : vector<8x8xf32>
    %34 = math.exp %33 : vector<8x8xf32>
    %cst_26 = arith.constant dense<0.000000e+00> : vector<8xf32>
    %35 = vector.multi_reduction <add>, %34, %cst_26 [1] : vector<8x8xf32> to vector<8xf32>
    %36 = vector.shape_cast %35 : vector<8xf32> to vector<8x1xf32>
    %37 = vector.broadcast %36 : vector<8x1xf32> to vector<8x8xf32>
    %38 = arith.divf %34, %37 : vector<8x8xf32>
    %cst_27 = arith.constant dense<0.000000e+00> : vector<8x8xf32>
    %39 = tpu.matmul %38, %17, %cst_27 {dimension_numbers = #tpu.dot_dimension_numbers<[1], [0], [0], [1], [0, 0, 1, 1], [], []>} : vector<8x8xf32>, vector<8x8xf32>, vector<8x8xf32> -> vector<8x8xf32>
    %c0_28 = arith.constant 0 : index
    %c0_29 = arith.constant 0 : index
    %c0_30 = arith.constant 0 : index
    %40 = vector.load %arg5[%c0_28, %c0_29, %c0_30] : memref<4x8x32xf32, #tpu.memory_space<vmem>>, vector<1x8x32xf32>
    %41 = vector.shape_cast %40 : vector<1x8x32xf32> to vector<8x32xf32>
    %cst_31 = arith.constant dense<0.000000e+00> : vector<8x32xf32>
    %42 = tpu.matmul %39, %41, %cst_31 {dimension_numbers = #tpu.dot_dimension_numbers<[1], [0], [0], [1], [0, 0, 1, 1], [], []>} : vector<8x8xf32>, vector<8x32xf32>, vector<8x32xf32> -> vector<8x32xf32>
    %43 = arith.addf %8, %42 : vector<8x32xf32>
    %c1 = arith.constant 1 : index
    %c0_32 = arith.constant 0 : index
    %c0_33 = arith.constant 0 : index
    %44 = vector.load %arg2[%c1, %c0_32, %c0_33] : memref<4x32x8xf32, #tpu.memory_space<vmem>>, vector<1x32x8xf32>
    %45 = vector.shape_cast %44 : vector<1x32x8xf32> to vector<32x8xf32>
    %cst_34 = arith.constant dense<0.000000e+00> : vector<8x8xf32>
    %46 = tpu.matmul %4, %45, %cst_34 {dimension_numbers = #tpu.dot_dimension_numbers<[1], [0], [0], [1], [0, 0, 1, 1], [], []>} : vector<8x32xf32>, vector<32x8xf32>, vector<8x8xf32> -> vector<8x8xf32>
    %c1_35 = arith.constant 1 : index
    %c0_36 = arith.constant 0 : index
    %c0_37 = arith.constant 0 : index
    %47 = vector.load %arg3[%c1_35, %c0_36, %c0_37] : memref<4x32x8xf32, #tpu.memory_space<vmem>>, vector<1x32x8xf32>
    %48 = vector.shape_cast %47 : vector<1x32x8xf32> to vector<32x8xf32>
    %cst_38 = arith.constant dense<0.000000e+00> : vector<8x8xf32>
    %49 = tpu.matmul %5, %48, %cst_38 {dimension_numbers = #tpu.dot_dimension_numbers<[1], [0], [0], [1], [0, 0, 1, 1], [], []>} : vector<8x32xf32>, vector<32x8xf32>, vector<8x8xf32> -> vector<8x8xf32>
    %c1_39 = arith.constant 1 : index
    %c0_40 = arith.constant 0 : index
    %c0_41 = arith.constant 0 : index
    %50 = vector.load %arg4[%c1_39, %c0_40, %c0_41] : memref<4x32x8xf32, #tpu.memory_space<vmem>>, vector<1x32x8xf32>
    %51 = vector.shape_cast %50 : vector<1x32x8xf32> to vector<32x8xf32>
    %cst_42 = arith.constant dense<0.000000e+00> : vector<8x8xf32>
    %52 = tpu.matmul %5, %51, %cst_42 {dimension_numbers = #tpu.dot_dimension_numbers<[1], [0], [0], [1], [0, 0, 1, 1], [], []>} : vector<8x32xf32>, vector<32x8xf32>, vector<8x8xf32> -> vector<8x8xf32>
    %53 = tpu.transpose %49, [1, 0] : vector<8x8xf32> -> vector<8x8xf32>
    %cst_43 = arith.constant dense<0.000000e+00> : vector<8x8xf32>
    %54 = tpu.matmul %46, %53, %cst_43 {dimension_numbers = #tpu.dot_dimension_numbers<[1], [0], [0], [1], [0, 0, 1, 1], [], []>} : vector<8x8xf32>, vector<8x8xf32>, vector<8x8xf32> -> vector<8x8xf32>
    %cst_44 = arith.constant 0.000000e+00 : f32
    %55 = vector.broadcast %cst_44 : f32 to vector<1x8xf32>
    %56 = arith.cmpf oeq, %7, %55 : vector<1x8xf32>
    %cst_45 = arith.constant -1.000000e+20 : f32
    %57 = vector.shape_cast %56 : vector<1x8xi1> to vector<1x8xi1>
    %58 = vector.broadcast %57 : vector<1x8xi1> to vector<8x8xi1>
    %59 = vector.broadcast %cst_45 : f32 to vector<8x8xf32>
    %60 = arith.select %58, %59, %54 : vector<8x8xi1>, vector<8x8xf32>
    %cst_46 = arith.constant -1.000000e+20 : f32
    %61 = vector.broadcast %cst_46 : f32 to vector<8x8xf32>
    %62 = arith.select %2, %60, %61 : vector<8x8xi1>, vector<8x8xf32>
    %cst_47 = arith.constant 0.176776692 : f32
    %63 = vector.broadcast %cst_47 : f32 to vector<8x8xf32>
    %64 = arith.mulf %62, %63 : vector<8x8xf32>
    %cst_48 = arith.constant dense<0xFF800000> : vector<8xf32>
    %65 = vector.multi_reduction <maximumf>, %64, %cst_48 [1] : vector<8x8xf32> to vector<8xf32>
    %66 = vector.shape_cast %65 : vector<8xf32> to vector<8x1xf32>
    %67 = vector.broadcast %66 : vector<8x1xf32> to vector<8x8xf32>
    %68 = arith.subf %64, %67 : vector<8x8xf32>
    %69 = math.exp %68 : vector<8x8xf32>
    %cst_49 = arith.constant dense<0.000000e+00> : vector<8xf32>
    %70 = vector.multi_reduction <add>, %69, %cst_49 [1] : vector<8x8xf32> to vector<8xf32>
    %71 = vector.shape_cast %70 : vector<8xf32> to vector<8x1xf32>
    %72 = vector.broadcast %71 : vector<8x1xf32> to vector<8x8xf32>
    %73 = arith.divf %69, %72 : vector<8x8xf32>
    %cst_50 = arith.constant dense<0.000000e+00> : vector<8x8xf32>
    %74 = tpu.matmul %73, %52, %cst_50 {dimension_numbers = #tpu.dot_dimension_numbers<[1], [0], [0], [1], [0, 0, 1, 1], [], []>} : vector<8x8xf32>, vector<8x8xf32>, vector<8x8xf32> -> vector<8x8xf32>
    %c1_51 = arith.constant 1 : index
    %c0_52 = arith.constant 0 : index
    %c0_53 = arith.constant 0 : index
    %75 = vector.load %arg5[%c1_51, %c0_52, %c0_53] : memref<4x8x32xf32, #tpu.memory_space<vmem>>, vector<1x8x32xf32>
    %76 = vector.shape_cast %75 : vector<1x8x32xf32> to vector<8x32xf32>
    %cst_54 = arith.constant dense<0.000000e+00> : vector<8x32xf32>
    %77 = tpu.matmul %74, %76, %cst_54 {dimension_numbers = #tpu.dot_dimension_numbers<[1], [0], [0], [1], [0, 0, 1, 1], [], []>} : vector<8x8xf32>, vector<8x32xf32>, vector<8x32xf32> -> vector<8x32xf32>
    %78 = arith.addf %43, %77 : vector<8x32xf32>
    %c2 = arith.constant 2 : index
    %c0_55 = arith.constant 0 : index
    %c0_56 = arith.constant 0 : index
    %79 = vector.load %arg2[%c2, %c0_55, %c0_56] : memref<4x32x8xf32, #tpu.memory_space<vmem>>, vector<1x32x8xf32>
    %80 = vector.shape_cast %79 : vector<1x32x8xf32> to vector<32x8xf32>
    %cst_57 = arith.constant dense<0.000000e+00> : vector<8x8xf32>
    %81 = tpu.matmul %4, %80, %cst_57 {dimension_numbers = #tpu.dot_dimension_numbers<[1], [0], [0], [1], [0, 0, 1, 1], [], []>} : vector<8x32xf32>, vector<32x8xf32>, vector<8x8xf32> -> vector<8x8xf32>
    %c2_58 = arith.constant 2 : index
    %c0_59 = arith.constant 0 : index
    %c0_60 = arith.constant 0 : index
    %82 = vector.load %arg3[%c2_58, %c0_59, %c0_60] : memref<4x32x8xf32, #tpu.memory_space<vmem>>, vector<1x32x8xf32>
    %83 = vector.shape_cast %82 : vector<1x32x8xf32> to vector<32x8xf32>
    %cst_61 = arith.constant dense<0.000000e+00> : vector<8x8xf32>
    %84 = tpu.matmul %5, %83, %cst_61 {dimension_numbers = #tpu.dot_dimension_numbers<[1], [0], [0], [1], [0, 0, 1, 1], [], []>} : vector<8x32xf32>, vector<32x8xf32>, vector<8x8xf32> -> vector<8x8xf32>
    %c2_62 = arith.constant 2 : index
    %c0_63 = arith.constant 0 : index
    %c0_64 = arith.constant 0 : index
    %85 = vector.load %arg4[%c2_62, %c0_63, %c0_64] : memref<4x32x8xf32, #tpu.memory_space<vmem>>, vector<1x32x8xf32>
    %86 = vector.shape_cast %85 : vector<1x32x8xf32> to vector<32x8xf32>
    %cst_65 = arith.constant dense<0.000000e+00> : vector<8x8xf32>
    %87 = tpu.matmul %5, %86, %cst_65 {dimension_numbers = #tpu.dot_dimension_numbers<[1], [0], [0], [1], [0, 0, 1, 1], [], []>} : vector<8x32xf32>, vector<32x8xf32>, vector<8x8xf32> -> vector<8x8xf32>
    %88 = tpu.transpose %84, [1, 0] : vector<8x8xf32> -> vector<8x8xf32>
    %cst_66 = arith.constant dense<0.000000e+00> : vector<8x8xf32>
    %89 = tpu.matmul %81, %88, %cst_66 {dimension_numbers = #tpu.dot_dimension_numbers<[1], [0], [0], [1], [0, 0, 1, 1], [], []>} : vector<8x8xf32>, vector<8x8xf32>, vector<8x8xf32> -> vector<8x8xf32>
    %cst_67 = arith.constant 0.000000e+00 : f32
    %90 = vector.broadcast %cst_67 : f32 to vector<1x8xf32>
    %91 = arith.cmpf oeq, %7, %90 : vector<1x8xf32>
    %cst_68 = arith.constant -1.000000e+20 : f32
    %92 = vector.shape_cast %91 : vector<1x8xi1> to vector<1x8xi1>
    %93 = vector.broadcast %92 : vector<1x8xi1> to vector<8x8xi1>
    %94 = vector.broadcast %cst_68 : f32 to vector<8x8xf32>
    %95 = arith.select %93, %94, %89 : vector<8x8xi1>, vector<8x8xf32>
    %cst_69 = arith.constant -1.000000e+20 : f32
    %96 = vector.broadcast %cst_69 : f32 to vector<8x8xf32>
    %97 = arith.select %2, %95, %96 : vector<8x8xi1>, vector<8x8xf32>
    %cst_70 = arith.constant 0.176776692 : f32
    %98 = vector.broadcast %cst_70 : f32 to vector<8x8xf32>
    %99 = arith.mulf %97, %98 : vector<8x8xf32>
    %cst_71 = arith.constant dense<0xFF800000> : vector<8xf32>
    %100 = vector.multi_reduction <maximumf>, %99, %cst_71 [1] : vector<8x8xf32> to vector<8xf32>
    %101 = vector.shape_cast %100 : vector<8xf32> to vector<8x1xf32>
    %102 = vector.broadcast %101 : vector<8x1xf32> to vector<8x8xf32>
    %103 = arith.subf %99, %102 : vector<8x8xf32>
    %104 = math.exp %103 : vector<8x8xf32>
    %cst_72 = arith.constant dense<0.000000e+00> : vector<8xf32>
    %105 = vector.multi_reduction <add>, %104, %cst_72 [1] : vector<8x8xf32> to vector<8xf32>
    %106 = vector.shape_cast %105 : vector<8xf32> to vector<8x1xf32>
    %107 = vector.broadcast %106 : vector<8x1xf32> to vector<8x8xf32>
    %108 = arith.divf %104, %107 : vector<8x8xf32>
    %cst_73 = arith.constant dense<0.000000e+00> : vector<8x8xf32>
    %109 = tpu.matmul %108, %87, %cst_73 {dimension_numbers = #tpu.dot_dimension_numbers<[1], [0], [0], [1], [0, 0, 1, 1], [], []>} : vector<8x8xf32>, vector<8x8xf32>, vector<8x8xf32> -> vector<8x8xf32>
    %c2_74 = arith.constant 2 : index
    %c0_75 = arith.constant 0 : index
    %c0_76 = arith.constant 0 : index
    %110 = vector.load %arg5[%c2_74, %c0_75, %c0_76] : memref<4x8x32xf32, #tpu.memory_space<vmem>>, vector<1x8x32xf32>
    %111 = vector.shape_cast %110 : vector<1x8x32xf32> to vector<8x32xf32>
    %cst_77 = arith.constant dense<0.000000e+00> : vector<8x32xf32>
    %112 = tpu.matmul %109, %111, %cst_77 {dimension_numbers = #tpu.dot_dimension_numbers<[1], [0], [0], [1], [0, 0, 1, 1], [], []>} : vector<8x8xf32>, vector<8x32xf32>, vector<8x32xf32> -> vector<8x32xf32>
    %113 = arith.addf %78, %112 : vector<8x32xf32>
    %c3 = arith.constant 3 : index
    %c0_78 = arith.constant 0 : index
    %c0_79 = arith.constant 0 : index
    %114 = vector.load %arg2[%c3, %c0_78, %c0_79] : memref<4x32x8xf32, #tpu.memory_space<vmem>>, vector<1x32x8xf32>
    %115 = vector.shape_cast %114 : vector<1x32x8xf32> to vector<32x8xf32>
    %cst_80 = arith.constant dense<0.000000e+00> : vector<8x8xf32>
    %116 = tpu.matmul %4, %115, %cst_80 {dimension_numbers = #tpu.dot_dimension_numbers<[1], [0], [0], [1], [0, 0, 1, 1], [], []>} : vector<8x32xf32>, vector<32x8xf32>, vector<8x8xf32> -> vector<8x8xf32>
    %c3_81 = arith.constant 3 : index
    %c0_82 = arith.constant 0 : index
    %c0_83 = arith.constant 0 : index
    %117 = vector.load %arg3[%c3_81, %c0_82, %c0_83] : memref<4x32x8xf32, #tpu.memory_space<vmem>>, vector<1x32x8xf32>
    %118 = vector.shape_cast %117 : vector<1x32x8xf32> to vector<32x8xf32>
    %cst_84 = arith.constant dense<0.000000e+00> : vector<8x8xf32>
    %119 = tpu.matmul %5, %118, %cst_84 {dimension_numbers = #tpu.dot_dimension_numbers<[1], [0], [0], [1], [0, 0, 1, 1], [], []>} : vector<8x32xf32>, vector<32x8xf32>, vector<8x8xf32> -> vector<8x8xf32>
    %c3_85 = arith.constant 3 : index
    %c0_86 = arith.constant 0 : index
    %c0_87 = arith.constant 0 : index
    %120 = vector.load %arg4[%c3_85, %c0_86, %c0_87] : memref<4x32x8xf32, #tpu.memory_space<vmem>>, vector<1x32x8xf32>
    %121 = vector.shape_cast %120 : vector<1x32x8xf32> to vector<32x8xf32>
    %cst_88 = arith.constant dense<0.000000e+00> : vector<8x8xf32>
    %122 = tpu.matmul %5, %121, %cst_88 {dimension_numbers = #tpu.dot_dimension_numbers<[1], [0], [0], [1], [0, 0, 1, 1], [], []>} : vector<8x32xf32>, vector<32x8xf32>, vector<8x8xf32> -> vector<8x8xf32>
    %123 = tpu.transpose %119, [1, 0] : vector<8x8xf32> -> vector<8x8xf32>
    %cst_89 = arith.constant dense<0.000000e+00> : vector<8x8xf32>
    %124 = tpu.matmul %116, %123, %cst_89 {dimension_numbers = #tpu.dot_dimension_numbers<[1], [0], [0], [1], [0, 0, 1, 1], [], []>} : vector<8x8xf32>, vector<8x8xf32>, vector<8x8xf32> -> vector<8x8xf32>
    %cst_90 = arith.constant 0.000000e+00 : f32
    %125 = vector.broadcast %cst_90 : f32 to vector<1x8xf32>
    %126 = arith.cmpf oeq, %7, %125 : vector<1x8xf32>
    %cst_91 = arith.constant -1.000000e+20 : f32
    %127 = vector.shape_cast %126 : vector<1x8xi1> to vector<1x8xi1>
    %128 = vector.broadcast %127 : vector<1x8xi1> to vector<8x8xi1>
    %129 = vector.broadcast %cst_91 : f32 to vector<8x8xf32>
    %130 = arith.select %128, %129, %124 : vector<8x8xi1>, vector<8x8xf32>
    %cst_92 = arith.constant -1.000000e+20 : f32
    %131 = vector.broadcast %cst_92 : f32 to vector<8x8xf32>
    %132 = arith.select %2, %130, %131 : vector<8x8xi1>, vector<8x8xf32>
    %cst_93 = arith.constant 0.176776692 : f32
    %133 = vector.broadcast %cst_93 : f32 to vector<8x8xf32>
    %134 = arith.mulf %132, %133 : vector<8x8xf32>
    %cst_94 = arith.constant dense<0xFF800000> : vector<8xf32>
    %135 = vector.multi_reduction <maximumf>, %134, %cst_94 [1] : vector<8x8xf32> to vector<8xf32>
    %136 = vector.shape_cast %135 : vector<8xf32> to vector<8x1xf32>
    %137 = vector.broadcast %136 : vector<8x1xf32> to vector<8x8xf32>
    %138 = arith.subf %134, %137 : vector<8x8xf32>
    %139 = math.exp %138 : vector<8x8xf32>
    %cst_95 = arith.constant dense<0.000000e+00> : vector<8xf32>
    %140 = vector.multi_reduction <add>, %139, %cst_95 [1] : vector<8x8xf32> to vector<8xf32>
    %141 = vector.shape_cast %140 : vector<8xf32> to vector<8x1xf32>
    %142 = vector.broadcast %141 : vector<8x1xf32> to vector<8x8xf32>
    %143 = arith.divf %139, %142 : vector<8x8xf32>
    %cst_96 = arith.constant dense<0.000000e+00> : vector<8x8xf32>
    %144 = tpu.matmul %143, %122, %cst_96 {dimension_numbers = #tpu.dot_dimension_numbers<[1], [0], [0], [1], [0, 0, 1, 1], [], []>} : vector<8x8xf32>, vector<8x8xf32>, vector<8x8xf32> -> vector<8x8xf32>
    %c3_97 = arith.constant 3 : index
    %c0_98 = arith.constant 0 : index
    %c0_99 = arith.constant 0 : index
    %145 = vector.load %arg5[%c3_97, %c0_98, %c0_99] : memref<4x8x32xf32, #tpu.memory_space<vmem>>, vector<1x8x32xf32>
    %146 = vector.shape_cast %145 : vector<1x8x32xf32> to vector<8x32xf32>
    %cst_100 = arith.constant dense<0.000000e+00> : vector<8x32xf32>
    %147 = tpu.matmul %144, %146, %cst_100 {dimension_numbers = #tpu.dot_dimension_numbers<[1], [0], [0], [1], [0, 0, 1, 1], [], []>} : vector<8x8xf32>, vector<8x32xf32>, vector<8x32xf32> -> vector<8x32xf32>
    %148 = arith.addf %113, %147 : vector<8x32xf32>
    %149 = vector.broadcast %3 : vector<1x32xf32> to vector<8x32xf32>
    %150 = arith.addf %148, %149 : vector<8x32xf32>
    %c0_101 = arith.constant 0 : index
    %c0_102 = arith.constant 0 : index
    %151 = vector.load %arg10[%c0_101, %c0_102] : memref<16x32xf32, #tpu.memory_space<vmem>>, vector<8x32xf32>
    tpu.vector_store %arg10[%c0_101, %c0_102], %150 {strides = array<i32>} : memref<16x32xf32, #tpu.memory_space<vmem>>, vector<8x32xf32>,
    %c8 = arith.constant 8 : index
    %c0_103 = arith.constant 0 : index
    %152 = vector.load %arg0[%c8, %c0_103] : memref<16x32xf32, #tpu.memory_space<vmem>>, vector<8x32xf32>
    %c8_104 = arith.constant 8 : index
    %c0_105 = arith.constant 0 : index
    %153 = vector.load %arg0[%c8_104, %c0_105] : memref<16x32xf32, #tpu.memory_space<vmem>>, vector<8x32xf32>
    %c1_106 = arith.constant 1 : index
    %c0_107 = arith.constant 0 : index
    %c0_108 = arith.constant 0 : index
    %154 = vector.load %arg1[%c1_106, %c0_107, %c0_108] : memref<2x1x8xf32, #tpu.memory_space<vmem>>, vector<1x1x8xf32>
    %155 = vector.shape_cast %154 : vector<1x1x8xf32> to vector<1x8xf32>
    %cst_109 = arith.constant 0.000000e+00 : f32
    %156 = vector.broadcast %cst_109 : f32 to vector<8x32xf32>
    %c0_110 = arith.constant 0 : index
    %c0_111 = arith.constant 0 : index
    %c0_112 = arith.constant 0 : index
    %157 = vector.load %arg2[%c0_110, %c0_111, %c0_112] : memref<4x32x8xf32, #tpu.memory_space<vmem>>, vector<1x32x8xf32>
    %158 = vector.shape_cast %157 : vector<1x32x8xf32> to vector<32x8xf32>
    %cst_113 = arith.constant dense<0.000000e+00> : vector<8x8xf32>
    %159 = tpu.matmul %152, %158, %cst_113 {dimension_numbers = #tpu.dot_dimension_numbers<[1], [0], [0], [1], [0, 0, 1, 1], [], []>} : vector<8x32xf32>, vector<32x8xf32>, vector<8x8xf32> -> vector<8x8xf32>
    %c0_114 = arith.constant 0 : index
    %c0_115 = arith.constant 0 : index
    %c0_116 = arith.constant 0 : index
    %160 = vector.load %arg3[%c0_114, %c0_115, %c0_116] : memref<4x32x8xf32, #tpu.memory_space<vmem>>, vector<1x32x8xf32>
    %161 = vector.shape_cast %160 : vector<1x32x8xf32> to vector<32x8xf32>
    %cst_117 = arith.constant dense<0.000000e+00> : vector<8x8xf32>
    %162 = tpu.matmul %153, %161, %cst_117 {dimension_numbers = #tpu.dot_dimension_numbers<[1], [0], [0], [1], [0, 0, 1, 1], [], []>} : vector<8x32xf32>, vector<32x8xf32>, vector<8x8xf32> -> vector<8x8xf32>
    %c0_118 = arith.constant 0 : index
    %c0_119 = arith.constant 0 : index
    %c0_120 = arith.constant 0 : index
    %163 = vector.load %arg4[%c0_118, %c0_119, %c0_120] : memref<4x32x8xf32, #tpu.memory_space<vmem>>, vector<1x32x8xf32>
    %164 = vector.shape_cast %163 : vector<1x32x8xf32> to vector<32x8xf32>
    %cst_121 = arith.constant dense<0.000000e+00> : vector<8x8xf32>
    %165 = tpu.matmul %153, %164, %cst_121 {dimension_numbers = #tpu.dot_dimension_numbers<[1], [0], [0], [1], [0, 0, 1, 1], [], []>} : vector<8x32xf32>, vector<32x8xf32>, vector<8x8xf32> -> vector<8x8xf32>
    %166 = tpu.transpose %162, [1, 0] : vector<8x8xf32> -> vector<8x8xf32>
    %cst_122 = arith.constant dense<0.000000e+00> : vector<8x8xf32>
    %167 = tpu.matmul %159, %166, %cst_122 {dimension_numbers = #tpu.dot_dimension_numbers<[1], [0], [0], [1], [0, 0, 1, 1], [], []>} : vector<8x8xf32>, vector<8x8xf32>, vector<8x8xf32> -> vector<8x8xf32>
    %cst_123 = arith.constant 0.000000e+00 : f32
    %168 = vector.broadcast %cst_123 : f32 to vector<1x8xf32>
    %169 = arith.cmpf oeq, %155, %168 : vector<1x8xf32>
    %cst_124 = arith.constant -1.000000e+20 : f32
    %170 = vector.shape_cast %169 : vector<1x8xi1> to vector<1x8xi1>
    %171 = vector.broadcast %170 : vector<1x8xi1> to vector<8x8xi1>
    %172 = vector.broadcast %cst_124 : f32 to vector<8x8xf32>
    %173 = arith.select %171, %172, %167 : vector<8x8xi1>, vector<8x8xf32>
    %cst_125 = arith.constant -1.000000e+20 : f32
    %174 = vector.broadcast %cst_125 : f32 to vector<8x8xf32>
    %175 = arith.select %2, %173, %174 : vector<8x8xi1>, vector<8x8xf32>
    %cst_126 = arith.constant 0.176776692 : f32
    %176 = vector.broadcast %cst_126 : f32 to vector<8x8xf32>
    %177 = arith.mulf %175, %176 : vector<8x8xf32>
    %cst_127 = arith.constant dense<0xFF800000> : vector<8xf32>
    %178 = vector.multi_reduction <maximumf>, %177, %cst_127 [1] : vector<8x8xf32> to vector<8xf32>
    %179 = vector.shape_cast %178 : vector<8xf32> to vector<8x1xf32>
    %180 = vector.broadcast %179 : vector<8x1xf32> to vector<8x8xf32>
    %181 = arith.subf %177, %180 : vector<8x8xf32>
    %182 = math.exp %181 : vector<8x8xf32>
    %cst_128 = arith.constant dense<0.000000e+00> : vector<8xf32>
    %183 = vector.multi_reduction <add>, %182, %cst_128 [1] : vector<8x8xf32> to vector<8xf32>
    %184 = vector.shape_cast %183 : vector<8xf32> to vector<8x1xf32>
    %185 = vector.broadcast %184 : vector<8x1xf32> to vector<8x8xf32>
    %186 = arith.divf %182, %185 : vector<8x8xf32>
    %cst_129 = arith.constant dense<0.000000e+00> : vector<8x8xf32>
    %187 = tpu.matmul %186, %165, %cst_129 {dimension_numbers = #tpu.dot_dimension_numbers<[1], [0], [0], [1], [0, 0, 1, 1], [], []>} : vector<8x8xf32>, vector<8x8xf32>, vector<8x8xf32> -> vector<8x8xf32>
    %c0_130 = arith.constant 0 : index
    %c0_131 = arith.constant 0 : index
    %c0_132 = arith.constant 0 : index
    %188 = vector.load %arg5[%c0_130, %c0_131, %c0_132] : memref<4x8x32xf32, #tpu.memory_space<vmem>>, vector<1x8x32xf32>
    %189 = vector.shape_cast %188 : vector<1x8x32xf32> to vector<8x32xf32>
    %cst_133 = arith.constant dense<0.000000e+00> : vector<8x32xf32>
    %190 = tpu.matmul %187, %189, %cst_133 {dimension_numbers = #tpu.dot_dimension_numbers<[1], [0], [0], [1], [0, 0, 1, 1], [], []>} : vector<8x8xf32>, vector<8x32xf32>, vector<8x32xf32> -> vector<8x32xf32>
    %191 = arith.addf %156, %190 : vector<8x32xf32>
    %c1_134 = arith.constant 1 : index
    %c0_135 = arith.constant 0 : index
    %c0_136 = arith.constant 0 : index
    %192 = vector.load %arg2[%c1_134, %c0_135, %c0_136] : memref<4x32x8xf32, #tpu.memory_space<vmem>>, vector<1x32x8xf32>
    %193 = vector.shape_cast %192 : vector<1x32x8xf32> to vector<32x8xf32>
    %cst_137 = arith.constant dense<0.000000e+00> : vector<8x8xf32>
    %194 = tpu.matmul %152, %193, %cst_137 {dimension_numbers = #tpu.dot_dimension_numbers<[1], [0], [0], [1], [0, 0, 1, 1], [], []>} : vector<8x32xf32>, vector<32x8xf32>, vector<8x8xf32> -> vector<8x8xf32>
    %c1_138 = arith.constant 1 : index
    %c0_139 = arith.constant 0 : index
    %c0_140 = arith.constant 0 : index
    %195 = vector.load %arg3[%c1_138, %c0_139, %c0_140] : memref<4x32x8xf32, #tpu.memory_space<vmem>>, vector<1x32x8xf32>
    %196 = vector.shape_cast %195 : vector<1x32x8xf32> to vector<32x8xf32>
    %cst_141 = arith.constant dense<0.000000e+00> : vector<8x8xf32>
    %197 = tpu.matmul %153, %196, %cst_141 {dimension_numbers = #tpu.dot_dimension_numbers<[1], [0], [0], [1], [0, 0, 1, 1], [], []>} : vector<8x32xf32>, vector<32x8xf32>, vector<8x8xf32> -> vector<8x8xf32>
    %c1_142 = arith.constant 1 : index
    %c0_143 = arith.constant 0 : index
    %c0_144 = arith.constant 0 : index
    %198 = vector.load %arg4[%c1_142, %c0_143, %c0_144] : memref<4x32x8xf32, #tpu.memory_space<vmem>>, vector<1x32x8xf32>
    %199 = vector.shape_cast %198 : vector<1x32x8xf32> to vector<32x8xf32>
    %cst_145 = arith.constant dense<0.000000e+00> : vector<8x8xf32>
    %200 = tpu.matmul %153, %199, %cst_145 {dimension_numbers = #tpu.dot_dimension_numbers<[1], [0], [0], [1], [0, 0, 1, 1], [], []>} : vector<8x32xf32>, vector<32x8xf32>, vector<8x8xf32> -> vector<8x8xf32>
    %201 = tpu.transpose %197, [1, 0] : vector<8x8xf32> -> vector<8x8xf32>
    %cst_146 = arith.constant dense<0.000000e+00> : vector<8x8xf32>
    %202 = tpu.matmul %194, %201, %cst_146 {dimension_numbers = #tpu.dot_dimension_numbers<[1], [0], [0], [1], [0, 0, 1, 1], [], []>} : vector<8x8xf32>, vector<8x8xf32>, vector<8x8xf32> -> vector<8x8xf32>
    %cst_147 = arith.constant 0.000000e+00 : f32
    %203 = vector.broadcast %cst_147 : f32 to vector<1x8xf32>
    %204 = arith.cmpf oeq, %155, %203 : vector<1x8xf32>
    %cst_148 = arith.constant -1.000000e+20 : f32
    %205 = vector.shape_cast %204 : vector<1x8xi1> to vector<1x8xi1>
    %206 = vector.broadcast %205 : vector<1x8xi1> to vector<8x8xi1>
    %207 = vector.broadcast %cst_148 : f32 to vector<8x8xf32>
    %208 = arith.select %206, %207, %202 : vector<8x8xi1>, vector<8x8xf32>
    %cst_149 = arith.constant -1.000000e+20 : f32
    %209 = vector.broadcast %cst_149 : f32 to vector<8x8xf32>
    %210 = arith.select %2, %208, %209 : vector<8x8xi1>, vector<8x8xf32>
    %cst_150 = arith.constant 0.176776692 : f32
    %211 = vector.broadcast %cst_150 : f32 to vector<8x8xf32>
    %212 = arith.mulf %210, %211 : vector<8x8xf32>
    %cst_151 = arith.constant dense<0xFF800000> : vector<8xf32>
    %213 = vector.multi_reduction <maximumf>, %212, %cst_151 [1] : vector<8x8xf32> to vector<8xf32>
    %214 = vector.shape_cast %213 : vector<8xf32> to vector<8x1xf32>
    %215 = vector.broadcast %214 : vector<8x1xf32> to vector<8x8xf32>
    %216 = arith.subf %212, %215 : vector<8x8xf32>
    %217 = math.exp %216 : vector<8x8xf32>
    %cst_152 = arith.constant dense<0.000000e+00> : vector<8xf32>
    %218 = vector.multi_reduction <add>, %217, %cst_152 [1] : vector<8x8xf32> to vector<8xf32>
    %219 = vector.shape_cast %218 : vector<8xf32> to vector<8x1xf32>
    %220 = vector.broadcast %219 : vector<8x1xf32> to vector<8x8xf32>
    %221 = arith.divf %217, %220 : vector<8x8xf32>
    %cst_153 = arith.constant dense<0.000000e+00> : vector<8x8xf32>
    %222 = tpu.matmul %221, %200, %cst_153 {dimension_numbers = #tpu.dot_dimension_numbers<[1], [0], [0], [1], [0, 0, 1, 1], [], []>} : vector<8x8xf32>, vector<8x8xf32>, vector<8x8xf32> -> vector<8x8xf32>
    %c1_154 = arith.constant 1 : index
    %c0_155 = arith.constant 0 : index
    %c0_156 = arith.constant 0 : index
    %223 = vector.load %arg5[%c1_154, %c0_155, %c0_156] : memref<4x8x32xf32, #tpu.memory_space<vmem>>, vector<1x8x32xf32>
    %224 = vector.shape_cast %223 : vector<1x8x32xf32> to vector<8x32xf32>
    %cst_157 = arith.constant dense<0.000000e+00> : vector<8x32xf32>
    %225 = tpu.matmul %222, %224, %cst_157 {dimension_numbers = #tpu.dot_dimension_numbers<[1], [0], [0], [1], [0, 0, 1, 1], [], []>} : vector<8x8xf32>, vector<8x32xf32>, vector<8x32xf32> -> vector<8x32xf32>
    %226 = arith.addf %191, %225 : vector<8x32xf32>
    %c2_158 = arith.constant 2 : index
    %c0_159 = arith.constant 0 : index
    %c0_160 = arith.constant 0 : index
    %227 = vector.load %arg2[%c2_158, %c0_159, %c0_160] : memref<4x32x8xf32, #tpu.memory_space<vmem>>, vector<1x32x8xf32>
    %228 = vector.shape_cast %227 : vector<1x32x8xf32> to vector<32x8xf32>
    %cst_161 = arith.constant dense<0.000000e+00> : vector<8x8xf32>
    %229 = tpu.matmul %152, %228, %cst_161 {dimension_numbers = #tpu.dot_dimension_numbers<[1], [0], [0], [1], [0, 0, 1, 1], [], []>} : vector<8x32xf32>, vector<32x8xf32>, vector<8x8xf32> -> vector<8x8xf32>
    %c2_162 = arith.constant 2 : index
    %c0_163 = arith.constant 0 : index
    %c0_164 = arith.constant 0 : index
    %230 = vector.load %arg3[%c2_162, %c0_163, %c0_164] : memref<4x32x8xf32, #tpu.memory_space<vmem>>, vector<1x32x8xf32>
    %231 = vector.shape_cast %230 : vector<1x32x8xf32> to vector<32x8xf32>
    %cst_165 = arith.constant dense<0.000000e+00> : vector<8x8xf32>
    %232 = tpu.matmul %153, %231, %cst_165 {dimension_numbers = #tpu.dot_dimension_numbers<[1], [0], [0], [1], [0, 0, 1, 1], [], []>} : vector<8x32xf32>, vector<32x8xf32>, vector<8x8xf32> -> vector<8x8xf32>
    %c2_166 = arith.constant 2 : index
    %c0_167 = arith.constant 0 : index
    %c0_168 = arith.constant 0 : index
    %233 = vector.load %arg4[%c2_166, %c0_167, %c0_168] : memref<4x32x8xf32, #tpu.memory_space<vmem>>, vector<1x32x8xf32>
    %234 = vector.shape_cast %233 : vector<1x32x8xf32> to vector<32x8xf32>
    %cst_169 = arith.constant dense<0.000000e+00> : vector<8x8xf32>
    %235 = tpu.matmul %153, %234, %cst_169 {dimension_numbers = #tpu.dot_dimension_numbers<[1], [0], [0], [1], [0, 0, 1, 1], [], []>} : vector<8x32xf32>, vector<32x8xf32>, vector<8x8xf32> -> vector<8x8xf32>
    %236 = tpu.transpose %232, [1, 0] : vector<8x8xf32> -> vector<8x8xf32>
    %cst_170 = arith.constant dense<0.000000e+00> : vector<8x8xf32>
    %237 = tpu.matmul %229, %236, %cst_170 {dimension_numbers = #tpu.dot_dimension_numbers<[1], [0], [0], [1], [0, 0, 1, 1], [], []>} : vector<8x8xf32>, vector<8x8xf32>, vector<8x8xf32> -> vector<8x8xf32>
    %cst_171 = arith.constant 0.000000e+00 : f32
    %238 = vector.broadcast %cst_171 : f32 to vector<1x8xf32>
    %239 = arith.cmpf oeq, %155, %238 : vector<1x8xf32>
    %cst_172 = arith.constant -1.000000e+20 : f32
    %240 = vector.shape_cast %239 : vector<1x8xi1> to vector<1x8xi1>
    %241 = vector.broadcast %240 : vector<1x8xi1> to vector<8x8xi1>
    %242 = vector.broadcast %cst_172 : f32 to vector<8x8xf32>
    %243 = arith.select %241, %242, %237 : vector<8x8xi1>, vector<8x8xf32>
    %cst_173 = arith.constant -1.000000e+20 : f32
    %244 = vector.broadcast %cst_173 : f32 to vector<8x8xf32>
    %245 = arith.select %2, %243, %244 : vector<8x8xi1>, vector<8x8xf32>
    %cst_174 = arith.constant 0.176776692 : f32
    %246 = vector.broadcast %cst_174 : f32 to vector<8x8xf32>
    %247 = arith.mulf %245, %246 : vector<8x8xf32>
    %cst_175 = arith.constant dense<0xFF800000> : vector<8xf32>
    %248 = vector.multi_reduction <maximumf>, %247, %cst_175 [1] : vector<8x8xf32> to vector<8xf32>
    %249 = vector.shape_cast %248 : vector<8xf32> to vector<8x1xf32>
    %250 = vector.broadcast %249 : vector<8x1xf32> to vector<8x8xf32>
    %251 = arith.subf %247, %250 : vector<8x8xf32>
    %252 = math.exp %251 : vector<8x8xf32>
    %cst_176 = arith.constant dense<0.000000e+00> : vector<8xf32>
    %253 = vector.multi_reduction <add>, %252, %cst_176 [1] : vector<8x8xf32> to vector<8xf32>
    %254 = vector.shape_cast %253 : vector<8xf32> to vector<8x1xf32>
    %255 = vector.broadcast %254 : vector<8x1xf32> to vector<8x8xf32>
    %256 = arith.divf %252, %255 : vector<8x8xf32>
    %cst_177 = arith.constant dense<0.000000e+00> : vector<8x8xf32>
    %257 = tpu.matmul %256, %235, %cst_177 {dimension_numbers = #tpu.dot_dimension_numbers<[1], [0], [0], [1], [0, 0, 1, 1], [], []>} : vector<8x8xf32>, vector<8x8xf32>, vector<8x8xf32> -> vector<8x8xf32>
    %c2_178 = arith.constant 2 : index
    %c0_179 = arith.constant 0 : index
    %c0_180 = arith.constant 0 : index
    %258 = vector.load %arg5[%c2_178, %c0_179, %c0_180] : memref<4x8x32xf32, #tpu.memory_space<vmem>>, vector<1x8x32xf32>
    %259 = vector.shape_cast %258 : vector<1x8x32xf32> to vector<8x32xf32>
    %cst_181 = arith.constant dense<0.000000e+00> : vector<8x32xf32>
    %260 = tpu.matmul %257, %259, %cst_181 {dimension_numbers = #tpu.dot_dimension_numbers<[1], [0], [0], [1], [0, 0, 1, 1], [], []>} : vector<8x8xf32>, vector<8x32xf32>, vector<8x32xf32> -> vector<8x32xf32>
    %261 = arith.addf %226, %260 : vector<8x32xf32>
    %c3_182 = arith.constant 3 : index
    %c0_183 = arith.constant 0 : index
    %c0_184 = arith.constant 0 : index
    %262 = vector.load %arg2[%c3_182, %c0_183, %c0_184] : memref<4x32x8xf32, #tpu.memory_space<vmem>>, vector<1x32x8xf32>
    %263 = vector.shape_cast %262 : vector<1x32x8xf32> to vector<32x8xf32>
    %cst_185 = arith.constant dense<0.000000e+00> : vector<8x8xf32>
    %264 = tpu.matmul %152, %263, %cst_185 {dimension_numbers = #tpu.dot_dimension_numbers<[1], [0], [0], [1], [0, 0, 1, 1], [], []>} : vector<8x32xf32>, vector<32x8xf32>, vector<8x8xf32> -> vector<8x8xf32>
    %c3_186 = arith.constant 3 : index
    %c0_187 = arith.constant 0 : index
    %c0_188 = arith.constant 0 : index
    %265 = vector.load %arg3[%c3_186, %c0_187, %c0_188] : memref<4x32x8xf32, #tpu.memory_space<vmem>>, vector<1x32x8xf32>
    %266 = vector.shape_cast %265 : vector<1x32x8xf32> to vector<32x8xf32>
    %cst_189 = arith.constant dense<0.000000e+00> : vector<8x8xf32>
    %267 = tpu.matmul %153, %266, %cst_189 {dimension_numbers = #tpu.dot_dimension_numbers<[1], [0], [0], [1], [0, 0, 1, 1], [], []>} : vector<8x32xf32>, vector<32x8xf32>, vector<8x8xf32> -> vector<8x8xf32>
    %c3_190 = arith.constant 3 : index
    %c0_191 = arith.constant 0 : index
    %c0_192 = arith.constant 0 : index
    %268 = vector.load %arg4[%c3_190, %c0_191, %c0_192] : memref<4x32x8xf32, #tpu.memory_space<vmem>>, vector<1x32x8xf32>
    %269 = vector.shape_cast %268 : vector<1x32x8xf32> to vector<32x8xf32>
    %cst_193 = arith.constant dense<0.000000e+00> : vector<8x8xf32>
    %270 = tpu.matmul %153, %269, %cst_193 {dimension_numbers = #tpu.dot_dimension_numbers<[1], [0], [0], [1], [0, 0, 1, 1], [], []>} : vector<8x32xf32>, vector<32x8xf32>, vector<8x8xf32> -> vector<8x8xf32>
    %271 = tpu.transpose %267, [1, 0] : vector<8x8xf32> -> vector<8x8xf32>
    %cst_194 = arith.constant dense<0.000000e+00> : vector<8x8xf32>
    %272 = tpu.matmul %264, %271, %cst_194 {dimension_numbers = #tpu.dot_dimension_numbers<[1], [0], [0], [1], [0, 0, 1, 1], [], []>} : vector<8x8xf32>, vector<8x8xf32>, vector<8x8xf32> -> vector<8x8xf32>
    %cst_195 = arith.constant 0.000000e+00 : f32
    %273 = vector.broadcast %cst_195 : f32 to vector<1x8xf32>
    %274 = arith.cmpf oeq, %155, %273 : vector<1x8xf32>
    %cst_196 = arith.constant -1.000000e+20 : f32
    %275 = vector.shape_cast %274 : vector<1x8xi1> to vector<1x8xi1>
    %276 = vector.broadcast %275 : vector<1x8xi1> to vector<8x8xi1>
    %277 = vector.broadcast %cst_196 : f32 to vector<8x8xf32>
    %278 = arith.select %276, %277, %272 : vector<8x8xi1>, vector<8x8xf32>
    %cst_197 = arith.constant -1.000000e+20 : f32
    %279 = vector.broadcast %cst_197 : f32 to vector<8x8xf32>
    %280 = arith.select %2, %278, %279 : vector<8x8xi1>, vector<8x8xf32>
    %cst_198 = arith.constant 0.176776692 : f32
    %281 = vector.broadcast %cst_198 : f32 to vector<8x8xf32>
    %282 = arith.mulf %280, %281 : vector<8x8xf32>
    %cst_199 = arith.constant dense<0xFF800000> : vector<8xf32>
    %283 = vector.multi_reduction <maximumf>, %282, %cst_199 [1] : vector<8x8xf32> to vector<8xf32>
    %284 = vector.shape_cast %283 : vector<8xf32> to vector<8x1xf32>
    %285 = vector.broadcast %284 : vector<8x1xf32> to vector<8x8xf32>
    %286 = arith.subf %282, %285 : vector<8x8xf32>
    %287 = math.exp %286 : vector<8x8xf32>
    %cst_200 = arith.constant dense<0.000000e+00> : vector<8xf32>
    %288 = vector.multi_reduction <add>, %287, %cst_200 [1] : vector<8x8xf32> to vector<8xf32>
    %289 = vector.shape_cast %288 : vector<8xf32> to vector<8x1xf32>
    %290 = vector.broadcast %289 : vector<8x1xf32> to vector<8x8xf32>
    %291 = arith.divf %287, %290 : vector<8x8xf32>
    %cst_201 = arith.constant dense<0.000000e+00> : vector<8x8xf32>
    %292 = tpu.matmul %291, %270, %cst_201 {dimension_numbers = #tpu.dot_dimension_numbers<[1], [0], [0], [1], [0, 0, 1, 1], [], []>} : vector<8x8xf32>, vector<8x8xf32>, vector<8x8xf32> -> vector<8x8xf32>
    %c3_202 = arith.constant 3 : index
    %c0_203 = arith.constant 0 : index
    %c0_204 = arith.constant 0 : index
    %293 = vector.load %arg5[%c3_202, %c0_203, %c0_204] : memref<4x8x32xf32, #tpu.memory_space<vmem>>, vector<1x8x32xf32>
    %294 = vector.shape_cast %293 : vector<1x8x32xf32> to vector<8x32xf32>
    %cst_205 = arith.constant dense<0.000000e+00> : vector<8x32xf32>
    %295 = tpu.matmul %292, %294, %cst_205 {dimension_numbers = #tpu.dot_dimension_numbers<[1], [0], [0], [1], [0, 0, 1, 1], [], []>} : vector<8x8xf32>, vector<8x32xf32>, vector<8x32xf32> -> vector<8x32xf32>
    %296 = arith.addf %261, %295 : vector<8x32xf32>
    %297 = vector.broadcast %3 : vector<1x32xf32> to vector<8x32xf32>
    %298 = arith.addf %296, %297 : vector<8x32xf32>
    %c8_206 = arith.constant 8 : index
    %c0_207 = arith.constant 0 : index
    %299 = vector.load %arg10[%c8_206, %c0_207] : memref<16x32xf32, #tpu.memory_space<vmem>>, vector<8x32xf32>
    tpu.vector_store %arg10[%c8_206, %c0_207], %298 {strides = array<i32>} : memref<16x32xf32, #tpu.memory_space<vmem>>, vector<8x32xf32>,
    %c0_208 = arith.constant 0 : index
    %c0_209 = arith.constant 0 : index
    %300 = vector.load %arg10[%c0_208, %c0_209] : memref<16x32xf32, #tpu.memory_space<vmem>>, vector<16x32xf32>
    %c0_210 = arith.constant 0 : index
    %c0_211 = arith.constant 0 : index
    %301 = vector.load %arg0[%c0_210, %c0_211] : memref<16x32xf32, #tpu.memory_space<vmem>>, vector<16x32xf32>
    %302 = arith.addf %300, %301 : vector<16x32xf32>
    %cst_212 = arith.constant dense<0.000000e+00> : vector<16xf32>
    %303 = vector.multi_reduction <add>, %302, %cst_212 [1] : vector<16x32xf32> to vector<16xf32>
    %304 = vector.shape_cast %303 : vector<16xf32> to vector<16x1xf32>
    %cst_213 = arith.constant 3.200000e+01 : f32
    %305 = vector.broadcast %cst_213 : f32 to vector<16x1xf32>
    %306 = arith.divf %304, %305 : vector<16x1xf32>
    %307 = vector.broadcast %306 : vector<16x1xf32> to vector<16x32xf32>
    %308 = arith.subf %302, %307 : vector<16x32xf32>
    %309 = arith.mulf %308, %308 : vector<16x32xf32>
    %cst_214 = arith.constant dense<0.000000e+00> : vector<16xf32>
    %310 = vector.multi_reduction <add>, %309, %cst_214 [1] : vector<16x32xf32> to vector<16xf32>
    %311 = vector.shape_cast %310 : vector<16xf32> to vector<16x1xf32>
    %cst_215 = arith.constant 3.200000e+01 : f32
    %312 = vector.broadcast %cst_215 : f32 to vector<16x1xf32>
    %313 = arith.divf %311, %312 : vector<16x1xf32>
    %314 = vector.broadcast %306 : vector<16x1xf32> to vector<16x32xf32>
    %315 = arith.subf %302, %314 : vector<16x32xf32>
    %cst_216 = arith.constant 9.99999974E-6 : f32
    %316 = vector.broadcast %cst_216 : f32 to vector<16x1xf32>
    %317 = arith.addf %313, %316 : vector<16x1xf32>
    %318 = math.rsqrt %317 : vector<16x1xf32>
    %319 = vector.broadcast %318 : vector<16x1xf32> to vector<16x32xf32>
    %320 = arith.mulf %315, %319 : vector<16x32xf32>
    %c0_217 = arith.constant 0 : index
    %c0_218 = arith.constant 0 : index
    %321 = vector.load %arg7[%c0_217, %c0_218] : memref<1x32xf32, #tpu.memory_space<vmem>>, vector<1x32xf32>
    %322 = vector.broadcast %321 : vector<1x32xf32> to vector<16x32xf32>
    %323 = arith.mulf %320, %322 : vector<16x32xf32>
    %c0_219 = arith.constant 0 : index
    %c0_220 = arith.constant 0 : index
    %324 = vector.load %arg8[%c0_219, %c0_220] : memref<1x32xf32, #tpu.memory_space<vmem>>, vector<1x32xf32>
    %325 = vector.broadcast %324 : vector<1x32xf32> to vector<16x32xf32>
    %326 = arith.addf %323, %325 : vector<16x32xf32>
    %c0_221 = arith.constant 0 : index
    %c0_222 = arith.constant 0 : index
    %327 = vector.load %arg9[%c0_221, %c0_222] : memref<16x32xf32, #tpu.memory_space<vmem>>, vector<16x32xf32>
    tpu.vector_store %arg9[%c0_221, %c0_222], %326 {strides = array<i32>} : memref<16x32xf32, #tpu.memory_space<vmem>>, vector<16x32xf32>,
    return
  }
}

</mosaic_0001>

<bundles_post_ra>
// kernel: transformer_forward.13
= control target key start
LH: loop header
LB: loop body
LE: loop exit
PB: predicated region body
PF: predicated region fallthrough
CT: control target
= control target key end

     0   :  { %vm28_vm0 = vcmask 261120   ;;  %s243_s0 = inlined_call_operand.vmem [shape: f32[16,32], index: 0, kind: input, shape index: {}]   ;;  %s244_s1 = inlined_call_operand.vmem [shape: f32[32,32], index: 1, kind: input, shape index: {}]   ;;  %s245_s2 = inlined_call_operand.vmem [shape: f32[1,32], index: 2, kind: input, shape index: {}]   ;;  %s246_s3 = inlined_call_operand.hbm [shape: f32[16,32], index: 3, kind: output, shape index: {}]  }
   0x1   :  { %v17_v0 = vld [vmem:[%s244_s1] sm:$0xff]  ;;  %v18_v1 = vld [vmem:[%s244_s1 + $0x8] sm:$0xff]  ;;  %v19_v2 = vld [vmem:[%s244_s1 + $0x10] sm:$0xff] }
   0x2   :  { %v148_v3 = vpack.c.bf16 %v18_v1, %v17_v0  ;;  %v20_v4 = vld [vmem:[%s244_s1 + $0x18] sm:$0xff]  ;;  %v15_v5 = vld [vmem:[%s243_s0] sm:$0xff] }
   0x3   :  { %v152_v6 = vpack.c.bf16 %v20_v4, %v19_v2  ;;  %145 = vmatprep.mubr.msk.f32.mxu0 %vm28_vm0, %v15_v5 }
   0x4   :  { %8 = vsyncpa [#allocation3], 0  ;;  %149 = vmatprep.subr.bf16.mxu0 %v148_v3  ;;  %v16_v7 = vld [vmem:[%s243_s0 + $0x8] sm:$0xff]  ;;  %v128_v8 = vld [vmem:[%s245_s2] ss:$0 sm:$0xff]  ;;  %s183_s25 = smov [#allocation2]  }
   0x5   :  { %151 = vmatpush3.bf16.msra.mxu0 %v148_v3  ;;  %s117_s26 = sshll.u32 %s183_s25, 4  ;;  %s118_s26 = int_to_ptr.vmem [resolvable:$true] %s117_s26 }
   0x6   :  { %153 = vmatprep.subr.bf16.mxu0 %v152_v6  ;;  %s159_s27 = scalar_lea.vmem %s118_s26, 256  ;;  %p164_p1 = scmp.lt.s32.totalorder %s118_s26, %s118_s26 }
   0x7   :  { %p160_p0 = scmp.ne.s32.totalorder %s118_s26, %s159_s27  ;;  %p165_p2 = scmp.lt.s32.totalorder %s159_s27, %s159_s27 }
   0x9   :  { %155 = vmatpush3.bf16.msra.mxu0 %v152_v6  ;;  %p166_p3 = por %p165_p2, %p164_p1 }
   0xb   :  { %p167_p4 = pnand %p166_p3, %p160_p0 }
   0xc   :  { %146 = vmatmul.mubr.msk.f32.vlgmr.msra.gmra.mrb[0].mxu0 %vm28_vm0, %v16_v7 }
  0xdf   :  { %v147_v9 = vpop.f32.mrb[0].mxu0 }
  0xe0   :  { %v107_v10 = vadd.f32 %v147_v9, %v128_v8  ;;  %v101_v11 = vpop.f32.mrb[1].mxu0 }
  0xe1   :  { %v102_v12 = vadd.f32 %v128_v8, %v101_v11 }
  0xe2   :  { %111 = vst.msk [vmem:[#allocation2 + $0x8] sm:$0xff] %vm28_vm0, %v107_v10 }
  0xe3   :  { %110 = vst.msk [vmem:[#allocation2] sm:$0xff] %vm28_vm0, %v102_v12 }
  0xe4   :  { %170 = shalt.err (!%p167_p4)
}
  0xe5   :  { %s171_s28 = scalar_lea.hbm %s246_s3, 256 }
  0xe6   :  { %p172_p5 = scmp.ne.s32.totalorder %s246_s3, %s171_s28  ;;  %p175_p6 = scmp.lt.u32.totalorder %s171_s28, %s246_s3 }
  0xe8   :  { %p177_p7 = pnand %p175_p6, %p172_p5 }
  0xea   :  { %180 = shalt.err (!%p177_p7)
}
  0xeb   :  { %s184_s6 = smov 128   ;;  %s185_s7 = smov 8  }
  0xec   :  { %123 = dma.vmem_to_hbm [thread:$0]  %s118_s26, 256, %s246_s3, [#allocation3], %s184_s6, %s184_s6, %s185_s7  }
  0xed   :  { %181 = dma.done.wait [#allocation3], 256  }
  0xee   :  { %182 = vsyncadd [#allocation3], 4294967040 }
  0xef   :  { %127 = vsyncpa [#allocation3], 1 }

// kernel: transformer_forward.9
= control target key start
LH: loop header
LB: loop body
LE: loop exit
PB: predicated region body
PF: predicated region fallthrough
CT: control target
= control target key end

     0   :  { %v4694_v0 = vmov 0.0|0.0   ;;  %vm4695_vm0 = vmmov 0   ;;  %v4696_v8 = vmov 0.0   ;;  %vm44_vm1 = vcmask 261120   ;;  %s5385_s3 = inlined_call_operand.vmem [shape: f32[4,32,8], index: 3, kind: input, shape index: {}]   ;;  %s5386_s2 = inlined_call_operand.vmem [shape: f32[4,32,8], index: 2, kind: input, shape index: {}]   ;;  %s5387_s0 = inlined_call_operand.vmem [shape: f32[16,32], index: 0, kind: input, shape index: {}]   ;;  %s5388_s4 = inlined_call_operand.vmem [shape: f32[4,32,8], index: 4, kind: input, shape index: {}]   ;;  %s5389_s1 = inlined_call_operand.vmem [shape: f32[2,1,8], index: 1, kind: input, shape index: {}]   ;;  %s5390_s5 = inlined_call_operand.vmem [shape: f32[4,8,32], index: 5, kind: input, shape index: {}]   ;;  %s5391_s6 = inlined_call_operand.vmem [shape: f32[1,32], index: 6, kind: input, shape index: {}]   ;;  %s5392_s7 = inlined_call_operand.vmem [shape: f32[1,32], index: 7, kind: input, shape index: {}]   ;;  %s5393_s8 = inlined_call_operand.vmem [shape: f32[1,32], index: 8, kind: input, shape index: {}]   ;;  %s5394_s9 = inlined_call_operand.vmem [shape: f32[16,32], index: 9, kind: output, shape index: {}]  }
   0x1   :  { %4516 = vmatprep.subr.bf16.mxu1 %v4694_v0  ;;  %v118_v1 = vld [vmem:[%s5385_s3] sm:$0xff]  ;;  %v119_v2 = vld [vmem:[%s5385_s3 + $0x8] sm:$0xff]  ;;  %4510 = vmatprep.subr.bf16.mxu0 %v4694_v0  ;;  %v120_v6 = vld [vmem:[%s5385_s3 + $0x10] sm:$0xff]  ;;  %vm266_vm2 = vcmask 64512   ;;  %v32_v25 = vlaneseq  ;;  %v4697_v29 = vmov 0  }
   0x2   :  { %v40_v3 = vld [vmem:[%s5386_s2] sm:$0xff]  ;;  %v4759_v4 = vpack.c.bf16 %v119_v2, %v118_v1  ;;  %v41_v5 = vld [vmem:[%s5386_s2 + $0x8] sm:$0xff]  ;;  %v121_v7 = vld [vmem:[%s5385_s3 + $0x18] sm:$0xff]  ;;  %4145 = vmatprep.mubr.msk.f32.mxu1 %vm4695_vm0, %v4696_v8  ;;  %4134 = vmatprep.mubr.msk.f32.mxu0 %vm4695_vm0, %v4696_v8 }
   0x3   :  { %v4774_v9 = vpack.c.bf16 %v41_v5, %v40_v3  ;;  %v42_v10 = vld [vmem:[%s5386_s2 + $0x10] sm:$0xff]  ;;  %v43_v11 = vld [vmem:[%s5386_s2 + $0x18] sm:$0xff]  ;;  %v4783_v12 = vpack.c.bf16 %v121_v7, %v120_v6  ;;  %v4794_v14 = vld [vmem:[%s5387_s0] sm:$0xff]  ;;  %v4839_v27 = vshrl.u32 %v32_v25, 7  ;;  %v35_v32 = vand.u32 127, %v32_v25 }
   0x4   :  { %4518 = vmatpush3.bf16.msra.mxu1 %v4759_v4  ;;  %v4787_v13 = vpack.c.bf16 %v43_v11, %v42_v10  ;;  %v192_v19 = vld [vmem:[%s5388_s4] sm:$0xff]  ;;  %v193_v20 = vld [vmem:[%s5388_s4 + $0x8] sm:$0xff]  ;;  %v194_v21 = vld [vmem:[%s5388_s4 + $0x10] sm:$0xff] }
   0x5   :  { %4512 = vmatpush3.bf16.msra.mxu0 %v4774_v9  ;;  %4519 = vmatprep.subr.bf16.mxu1 %v4694_v0  ;;  %v4821_v22 = vpack.c.bf16 %v193_v20, %v192_v19  ;;  %v195_v23 = vld [vmem:[%s5388_s4 + $0x18] sm:$0xff]  ;;  %v39_v26 = vld [vmem:[%s5389_s1] sm:$0x1]  ;;  %v347_v28 = vsub.s32 0, %v4839_v27  ;;  %vm4849_vm5 = vcmp.ge.s32.totalorder %v4839_v27, %v35_v32  ;;  %v3827_v48 = vld [vmem:[%s5386_s2 + $0x28] sm:$0xff] }
   0x6   :  { %4513 = vmatprep.subr.bf16.mxu0 %v4694_v0  ;;  %v4827_v24 = vpack.c.bf16 %v195_v23, %v194_v21  ;;  %vm343_vm3 = vcmp.eq.f32.partialorder %v39_v26, 0.0  ;;  %v3826_v47 = vld [vmem:[%s5386_s2 + $0x20] sm:$0xff]  ;;  %v3828_v50 = vld [vmem:[%s5386_s2 + $0x30] sm:$0xff]  ;;  %v3829_v51 = vld [vmem:[%s5386_s2 + $0x38] sm:$0xff] }
   0x7   :  { %v344_v30 = vsel %vm343_vm3, 1, %v4697_v29  ;;  %v4866_v49 = vpack.c.bf16 %v3827_v48, %v3826_v47  ;;  %v4876_v52 = vpack.c.bf16 %v3829_v51, %v3828_v50  ;;  %v3831_v54 = vld [vmem:[%s5385_s3 + $0x20] sm:$0xff]  ;;  %v3832_v55 = vld [vmem:[%s5385_s3 + $0x28] sm:$0xff]  ;;  %v3833_v59 = vld [vmem:[%s5385_s3 + $0x30] sm:$0xff] }
   0x8   :  { %4521 = vmatpush3.bf16.msra.mxu1 %v4783_v12  ;;  %v4845_v31 = vrot.slane %v344_v30, %v347_v28  ;;  %v4890_v57 = vpack.c.bf16 %v3832_v55, %v3831_v54  ;;  %v3834_v60 = vld [vmem:[%s5385_s3 + $0x38] sm:$0xff]  ;;  %v3836_v6 = vld [vmem:[%s5388_s4 + $0x20] sm:$0xff]  ;;  %v3837_v7 = vld [vmem:[%s5388_s4 + $0x28] sm:$0xff] }
   0x9   :  { %4515 = vmatpush3.bf16.msra.mxu0 %v4787_v13  ;;  %4159 = vmatprep.subr.mxu1 %v4696_v8  ;;  %v4900_v61 = vpack.c.bf16 %v3834_v60, %v3833_v59  ;;  %v3838_v10 = vld [vmem:[%s5388_s4 + $0x30] sm:$0xff]  ;;  %v4925_v11 = vpack.c.bf16 %v3837_v7, %v3836_v6  ;;  %v3847_v48 = vld [vmem:[%s5386_s2 + $0x40] sm:$0xff]  ;;  %v3848_v50 = vld [vmem:[%s5386_s2 + $0x48] sm:$0xff] }
   0xa   :  { %4522 = vmatprep.subr.bf16.mxu0 %v4694_v0  ;;  %vm349_vm4 = vcmp.eq.s32.totalorder %v4845_v31, 1  ;;  %v4997_v51 = vpack.c.bf16 %v3848_v50, %v3847_v48  ;;  %v3850_v54 = vld [vmem:[%s5386_s2 + $0x58] sm:$0xff]  ;;  %v3857_v7 = vld [vmem:[%s5388_s4 + $0x40] sm:$0xff]  ;;  %v3868_v50 = vld [vmem:[%s5386_s2 + $0x68] sm:$0xff] }
   0xb   :  { %4146 = vmatmul.mubr.msk.f32.vlgmr.msra.gmra.mrb[0].mxu1 %vm44_vm1, %v4794_v14  ;;  %v3867_v48 = vld [vmem:[%s5386_s2 + $0x60] sm:$0xff]  ;;  %v5159_v31 = vld [vmem:[%s5390_s5 + $0x18] sm:$0xff] }
   0xc   :  { %4135 = vmatmul.mubr.msk.f32.vlgmr.msra.gmra.mrb[0].mxu0 %vm44_vm1, %v4794_v14  ;;  %4161 = vmatprep.mubr.msk.f32.mxu1 %vm4695_vm0, %v4696_v8 }
   0xd   :  { %4156 = vmatprep.mubr.msk.f32.mxu0 %vm4695_vm0, %v4696_v8  ;;  %4524 = vmatpush3.bf16.msra.mxu0 %v4821_v22 }
   0xe   :  { %4525 = vmatprep.subr.bf16.mxu0 %v4694_v0 }
  0x11   :  { %4527 = vmatpush3.bf16.msra.mxu0 %v4827_v24 }
  0x12   :  { %4528 = vmatprep.subr.bf16.mxu0 %v4694_v0 }
  0x14   :  { %4157 = vmatmul.mubr.msk.f32.vlgmr.msra.gmra.mrb[2].mxu0 %vm44_vm1, %v4794_v14 }
  0x15   :  { %4177 = vmatprep.mubr.msk.f32.mxu0 %vm4695_vm0, %v4696_v8  ;;  %4530 = vmatpush3.bf16.msra.mxu0 %v4866_v49 }
  0x16   :  { %4531 = vmatprep.subr.bf16.mxu0 %v4694_v0 }
  0x19   :  { %4533 = vmatpush3.bf16.msra.mxu0 %v4876_v52 }
  0x1a   :  { %4540 = vmatprep.subr.bf16.mxu0 %v4694_v0 }
  0x1c   :  { %4178 = vmatmul.mubr.msk.f32.vlgmr.msra.gmra.mrb[4].mxu0 %vm44_vm1, %v4794_v14 }
  0x1d   :  { %4199 = vmatprep.mubr.msk.f32.mxu0 %vm4695_vm0, %v4696_v8  ;;  %4542 = vmatpush3.bf16.msra.mxu0 %v4925_v11 }
  0x1e   :  { %4543 = vmatprep.subr.bf16.mxu0 %v4694_v0 }
  0xde   :  { %v188_v15 = vpop.f32.mrb[0].mxu1 }
  0xdf   :  { %v4147_v16 = vpop.f32.mrb[1].mxu1  ;;  %4160 = vmatpush3.xpose.msk.msra.mxu1 %vm266_vm2, %v188_v15  ;;  %v114_v17 = vpop.f32.mrb[0].mxu0  ;;  %v3839_v15 = vld [vmem:[%s5388_s4 + $0x38] sm:$0xff] }
  0xe0   :  { %v4136_v18 = vpop.f32.mrb[1].mxu0  ;;  %4164 = vmatprep.subr.mxu1 %v4696_v8  ;;  %v4931_v16 = vpack.c.bf16 %v3839_v15, %v3838_v10  ;;  %v3858_v10 = vld [vmem:[%s5388_s4 + $0x48] sm:$0xff]  ;;  %v3859_v15 = vld [vmem:[%s5388_s4 + $0x50] sm:$0xff] }
  0xe2   :  { %4162 = vmatmul.mubr.msk.f32.vlgmr.msra.gmra.mrb[2].mxu1 %vm266_vm2, %v114_v17  ;;  %4545 = vmatpush3.bf16.msra.mxu0 %v4931_v16 }
  0xe3   :  { %4166 = vmatprep.mubr.msk.f32.mxu1 %vm4695_vm0, %v4696_v8  ;;  %4212 = vmatprep.subr.mxu0 %v4696_v8 }
  0xe5   :  { %4200 = vmatmul.mubr.msk.f32.vlgmr.msra.gmra.mrb[6].mxu0 %vm44_vm1, %v4794_v14 }
  0xe6   :  { %4214 = vmatprep.mubr.msk.f32.mxu0 %vm4695_vm0, %v4696_v8 }
  0xe7   :  { %v262_v45 = vpop.f32.mrb[2].mxu0 }
  0xe8   :  { %v4158_v46 = vpop.f32.mrb[3].mxu0  ;;  %4165 = vmatpush3.msra.mxu1 %v262_v45  ;;  %v3854_v45 = vld [vmem:[%s5385_s3 + $0x50] sm:$0xff] }
  0xe9   :  { %4534 = vmatprep.subr.bf16.mxu1 %v4694_v0  ;;  %v3855_v46 = vld [vmem:[%s5385_s3 + $0x58] sm:$0xff] }
  0xea   :  { %v4983_v47 = vpack.c.bf16 %v3855_v46, %v3854_v45 }
  0xef   :  { %v509_v62 = vpop.f32.mrb[4].mxu0 }
  0xf0   :  { %v4179_v63 = vpop.f32.mrb[5].mxu0 }
 0x1b5   :  { %v339_v34 = vpop.f32.mrb[2].mxu1 }
 0x1b6   :  { %v350_v35 = vsel %vm349_vm4, -1e+20, %v339_v34  ;;  %v4163_v36 = vpop.f32.mrb[3].mxu1 }
 0x1b7   :  { %v351_v37 = vsel %vm4849_vm5, %v350_v35, -1e+20 }
 0x1b8   :  { %v352_v38 = vmul.f32 0.17677669, %v351_v37  ;;  %v659_v35 = vpop.f32.mrb[6].mxu0  ;;  %v4950_v37 = vld [vmem:[%s5390_s5 + $0x8] sm:$0xff] }
 0x1b9   :  { %v4201_v36 = vpop.f32.mrb[7].mxu0  ;;  %4213 = vmatpush3.msra.mxu0 %v4950_v37 }
 0x1ba   :  { %v353_v39 = vsel %vm266_vm2, %v352_v38, -inf  ;;  %4546 = vmatprep.subr.bf16.mxu0 %v4694_v0 }
 0x1bb   :  { %354 = vmax.xlane.f32.xlu0 %v353_v39 }
 0x248   :  { %v355_v40 = vpop.xlane.xlu0 %354 }
 0x249   :  { %v356_v41 = vsub.f32 %v352_v38, %v355_v40 }
 0x24b   :  { %v357_v42 = vmul.f32 1.442695, %v356_v41  ;;  %v4957_v41 = vld [vmem:[%s5390_s5] sm:$0xff] }
 0x24d   :  { %4658 = vpow2.f32 %v357_v42  ;;  %v3852_v42 = vld [vmem:[%s5385_s3 + $0x40] sm:$0xff] }
 0x257   :  { %v4659_v43 = vpop.eup %4658 }
 0x258   :  { %v359_v44 = vsel %vm266_vm2, %v4659_v43, 0.0 }
 0x259   :  { %360 = vadd.xlane.f32.xlu0 %v359_v44 }
 0x2e6   :  { %v361_v53 = vpop.xlane.xlu0 %360 }
 0x2e7   :  { %4660 = vrcp.f32 %v361_v53  ;;  %v3849_v53 = vld [vmem:[%s5386_s2 + $0x50] sm:$0xff] }
 0x2f1   :  { %v4661_v56 = vpop.eup %4660 }
 0x2f2   :  { %v363_v58 = vmul.f32 %v4661_v56, %v4659_v43  ;;  %v3853_v43 = vld [vmem:[%s5385_s3 + $0x48] sm:$0xff] }
 0x2f3   :  { %v4969_v44 = vpack.c.bf16 %v3853_v43, %v3852_v42  ;;  %v5059_v42 = vld [vmem:[%s5390_s5 + $0x10] sm:$0xff] }
 0x2f4   :  { %4167 = vmatmul.mubr.msk.f32.vlgmr.msra.gmra.mrb[4].mxu1 %vm266_vm2, %v363_v58  ;;  %v5007_v58 = vpack.c.bf16 %v3850_v54, %v3849_v53  ;;  %v5072_v53 = vpack.c.bf16 %v3868_v50, %v3867_v48  ;;  %v3869_v54 = vld [vmem:[%s5386_s2 + $0x70] sm:$0xff] }
 0x2f5   :  { %4536 = vmatpush3.bf16.msra.mxu1 %v4890_v57  ;;  %4188 = vmatprep.mubr.msk.f32.mxu1 %vm4695_vm0, %v4696_v8 }
 0x2f6   :  { %4537 = vmatprep.subr.bf16.mxu1 %v4694_v0 }
 0x2f9   :  { %4539 = vmatpush3.bf16.msra.mxu1 %v4900_v61 }
 0x2fa   :  { %4202 = vmatprep.subr.mxu1 %v4696_v8 }
 0x2fc   :  { %4189 = vmatmul.mubr.msk.f32.vlgmr.msra.gmra.mrb[6].mxu1 %vm44_vm1, %v4794_v14 }
 0x2fd   :  { %4204 = vmatprep.mubr.msk.f32.mxu1 %vm4695_vm0, %v4696_v8 }
 0x3c7   :  { %v433_v1 = vpop.f32.mrb[4].mxu1 }
 0x3c8   :  { %v4168_v2 = vpop.f32.mrb[5].mxu1 }
 0x3cf   :  { %v584_v3 = vpop.f32.mrb[6].mxu1 }
 0x3d0   :  { %v4190_v5 = vpop.f32.mrb[7].mxu1  ;;  %4203 = vmatpush3.xpose.msk.msra.mxu1 %vm266_vm2, %v584_v3 }
 0x3d1   :  { %4207 = vmatprep.subr.mxu1 %v4696_v8 }
 0x3d3   :  { %4205 = vmatmul.mubr.msk.f32.vlgmr.msra.gmra.mrb[8].mxu1 %vm266_vm2, %v509_v62 }
 0x3d4   :  { %4209 = vmatprep.mubr.msk.f32.mxu1 %vm4695_vm0, %v4696_v8  ;;  %4208 = vmatpush3.msra.mxu1 %v659_v35 }
 0x3d5   :  { %4217 = vmatprep.subr.mxu1 %v4696_v8 }
 0x4a6   :  { %v735_v17 = vpop.f32.mrb[8].mxu1 }
 0x4a7   :  { %v739_v18 = vsel %vm349_vm4, -1e+20, %v735_v17  ;;  %v4206_v19 = vpop.f32.mrb[9].mxu1  ;;  %v5034_v17 = vpack.c.bf16 %v3858_v10, %v3857_v7 }
 0x4a8   :  { %v740_v20 = vsel %vm4849_vm5, %v739_v18, -1e+20  ;;  %v3860_v18 = vld [vmem:[%s5388_s4 + $0x58] sm:$0xff] }
 0x4a9   :  { %v741_v21 = vmul.f32 0.17677669, %v740_v20  ;;  %v5040_v19 = vpack.c.bf16 %v3860_v18, %v3859_v15 }
 0x4ab   :  { %v742_v23 = vsel %vm266_vm2, %v741_v21, -inf }
 0x4ac   :  { %743 = vmax.xlane.f32.xlu1 %v742_v23 }
 0x539   :  { %v744_v25 = vpop.xlane.xlu1 %743 }
 0x53a   :  { %v745_v26 = vsub.f32 %v741_v21, %v744_v25 }
 0x53c   :  { %v746_v30 = vmul.f32 1.442695, %v745_v26 }
 0x53e   :  { %4662 = vpow2.f32 %v746_v30 }
 0x548   :  { %v4663_v32 = vpop.eup %4662 }
 0x549   :  { %v748_v34 = vsel %vm266_vm2, %v4663_v32, 0.0 }
 0x54a   :  { %749 = vadd.xlane.f32.xlu1 %v748_v34 }
 0x5d7   :  { %v750_v38 = vpop.xlane.xlu1 %749 }
 0x5d8   :  { %4664 = vrcp.f32 %v750_v38 }
 0x5e2   :  { %v4665_v39 = vpop.eup %4664 }
 0x5e3   :  { %v752_v40 = vmul.f32 %v4665_v39, %v4663_v32 }
 0x5e5   :  { %4210 = vmatmul.mubr.msk.f32.vlgmr.msra.gmra.mrb[10].mxu1 %vm266_vm2, %v752_v40 }
 0x5e6   :  { %4218 = vmatpush3.msra.mxu1 %v4957_v41  ;;  %4219 = vmatprep.mubr.msk.f32.mxu1 %vm4695_vm0, %v4696_v8 }
 0x5e7   :  { %4552 = vmatprep.subr.bf16.mxu1 %v4694_v0 }
 0x5e9   :  { %4220 = vmatmul.mubr.msk.f32.vlgmr.msra.gmra.mrb[12].mxu1 %vm266_vm2, %v433_v1 }
 0x5ea   :  { %4554 = vmatpush3.bf16.msra.mxu1 %v4969_v44  ;;  %4241 = vmatprep.mubr.msk.f32.mxu1 %vm4695_vm0, %v4696_v8 }
 0x5eb   :  { %4555 = vmatprep.subr.bf16.mxu1 %v4694_v0 }
 0x5ee   :  { %4557 = vmatpush3.bf16.msra.mxu1 %v4983_v47 }
 0x5ef   :  { %4255 = vmatprep.subr.mxu1 %v4696_v8 }
 0x5f1   :  { %4242 = vmatmul.mubr.msk.f32.vlgmr.msra.gmra.mrb[14].mxu1 %vm44_vm1, %v4794_v14 }
 0x5f2   :  { %4257 = vmatprep.mubr.msk.f32.mxu1 %vm4695_vm0, %v4696_v8 }
 0x6b8   :  { %v822_v55 = vpop.f32.mrb[10].mxu1 }
 0x6b9   :  { %v4211_v56 = vpop.f32.mrb[11].mxu1  ;;  %4215 = vmatmul.mubr.msk.f32.vlgmr.msra.gmra.mrb[8].mxu0 %vm266_vm2, %v822_v55  ;;  %v3870_v55 = vld [vmem:[%s5386_s2 + $0x78] sm:$0xff] }
 0x6ba   :  { %4548 = vmatpush3.bf16.msra.mxu0 %v4997_v51  ;;  %4230 = vmatprep.mubr.msk.f32.mxu0 %vm4695_vm0, %v4696_v8  ;;  %v5082_v56 = vpack.c.bf16 %v3870_v55, %v3869_v54 }
 0x6bb   :  { %4549 = vmatprep.subr.bf16.mxu0 %v4694_v0 }
 0x6bc   :  { %v970_v59 = vpop.f32.mrb[12].mxu1 }
 0x6bd   :  { %v4221_v60 = vpop.f32.mrb[13].mxu1 }
 0x6be   :  { %4551 = vmatpush3.bf16.msra.mxu0 %v5007_v58  ;;  %v3873_v60 = vld [vmem:[%s5385_s3 + $0x68] sm:$0xff] }
 0x6bf   :  { %4558 = vmatprep.subr.bf16.mxu0 %v4694_v0 }
 0x6c1   :  { %4231 = vmatmul.mubr.msk.f32.vlgmr.msra.gmra.mrb[10].mxu0 %vm44_vm1, %v4794_v14 }
 0x6c2   :  { %4252 = vmatprep.mubr.msk.f32.mxu0 %vm4695_vm0, %v4696_v8  ;;  %4560 = vmatpush3.bf16.msra.mxu0 %v5034_v17 }
 0x6c3   :  { %4561 = vmatprep.subr.bf16.mxu0 %v4694_v0 }
 0x6c4   :  { %v1120_v62 = vpop.f32.mrb[14].mxu1 }
 0x6c5   :  { %v4243_v63 = vpop.f32.mrb[15].mxu1  ;;  %4256 = vmatpush3.xpose.msk.msra.mxu1 %vm266_vm2, %v1120_v62 }
 0x6c6   :  { %4260 = vmatprep.subr.mxu1 %v4696_v8  ;;  %4563 = vmatpush3.bf16.msra.mxu0 %v5040_v19  ;;  %v3874_v63 = vld [vmem:[%s5385_s3 + $0x70] sm:$0xff] }
 0x6c7   :  { %4265 = vmatprep.subr.mxu0 %v4696_v8 }
 0x6c9   :  { %4253 = vmatmul.mubr.msk.f32.vlgmr.msra.gmra.mrb[12].mxu0 %vm44_vm1, %v4794_v14 }
 0x6ca   :  { %4267 = vmatprep.mubr.msk.f32.mxu0 %vm4695_vm0, %v4696_v8  ;;  %4266 = vmatpush3.msra.mxu0 %v5059_v42 }
 0x6cb   :  { %4570 = vmatprep.subr.bf16.mxu0 %v4694_v0 }
 0x78c   :  { %v897_v1 = vpop.f32.mrb[8].mxu0 }
 0x78d   :  { %v5020_v2 = vadd.f32 %v970_v59, %v897_v1  ;;  %v4216_v3 = vpop.f32.mrb[9].mxu0  ;;  %v3872_v59 = vld [vmem:[%s5385_s3 + $0x60] sm:$0xff]  ;;  %v3875_v1 = vld [vmem:[%s5385_s3 + $0x78] sm:$0xff] }
 0x78e   :  { %v5096_v62 = vpack.c.bf16 %v3873_v60, %v3872_v59 }
 0x794   :  { %v1045_v5 = vpop.f32.mrb[10].mxu0 }
 0x795   :  { %v4232_v6 = vpop.f32.mrb[11].mxu0  ;;  %4258 = vmatmul.mubr.msk.f32.vlgmr.msra.gmra.mrb[16].mxu1 %vm266_vm2, %v1045_v5 }
 0x796   :  { %4262 = vmatprep.mubr.msk.f32.mxu1 %vm4695_vm0, %v4696_v8  ;;  %v5106_v6 = vpack.c.bf16 %v3875_v1, %v3874_v63  ;;  %v5173_v1 = vld [vmem:[%s5387_s0 + $0x8] sm:$0xff] }
 0x79c   :  { %v1195_v39 = vpop.f32.mrb[12].mxu0 }
 0x79d   :  { %v4254_v40 = vpop.f32.mrb[13].mxu0  ;;  %4261 = vmatpush3.msra.mxu1 %v1195_v39 }
 0x79e   :  { %4564 = vmatprep.subr.bf16.mxu1 %v4694_v0 }
 0x868   :  { %v1271_v20 = vpop.f32.mrb[16].mxu1 }
 0x869   :  { %v1275_v21 = vsel %vm349_vm4, -1e+20, %v1271_v20  ;;  %v4259_v23 = vpop.f32.mrb[17].mxu1 }
 0x86a   :  { %v1276_v25 = vsel %vm4849_vm5, %v1275_v21, -1e+20 }
 0x86b   :  { %v1277_v26 = vmul.f32 0.17677669, %v1276_v25  ;;  %v3877_v25 = vld [vmem:[%s5388_s4 + $0x60] sm:$0xff] }
 0x86d   :  { %v1278_v30 = vsel %vm266_vm2, %v1277_v26, -inf }
 0x86e   :  { %1279 = vmax.xlane.f32.xlu0 %v1278_v30 }
 0x8fb   :  { %v1280_v32 = vpop.xlane.xlu0 %1279 }
 0x8fc   :  { %v1281_v34 = vsub.f32 %v1277_v26, %v1280_v32  ;;  %v3879_v26 = vld [vmem:[%s5388_s4 + $0x70] sm:$0xff]  ;;  %v3880_v32 = vld [vmem:[%s5388_s4 + $0x78] sm:$0xff] }
 0x8fe   :  { %v1282_v35 = vmul.f32 1.442695, %v1281_v34  ;;  %v5140_v34 = vpack.c.bf16 %v3880_v32, %v3879_v26 }
 0x900   :  { %4666 = vpow2.f32 %v1282_v35 }
 0x90a   :  { %v4667_v36 = vpop.eup %4666 }
 0x90b   :  { %v1284_v38 = vsel %vm266_vm2, %v4667_v36, 0.0 }
 0x90c   :  { %1285 = vadd.xlane.f32.xlu1 %v1284_v38 }
 0x999   :  { %v1286_v43 = vpop.xlane.xlu1 %1285 }
 0x99a   :  { %4668 = vrcp.f32 %v1286_v43 }
 0x9a4   :  { %v4669_v45 = vpop.eup %4668 }
 0x9a5   :  { %v1288_v46 = vmul.f32 %v4669_v45, %v4667_v36 }
 0x9a7   :  { %4263 = vmatmul.mubr.msk.f32.vlgmr.msra.gmra.mrb[18].mxu1 %vm266_vm2, %v1288_v46 }
 0x9a8   :  { %4278 = vmatprep.mubr.msk.f32.mxu1 %vm4695_vm0, %v4696_v8  ;;  %4566 = vmatpush3.bf16.msra.mxu1 %v5072_v53 }
 0x9a9   :  { %4567 = vmatprep.subr.bf16.mxu1 %v4694_v0 }
 0x9ac   :  { %4569 = vmatpush3.bf16.msra.mxu1 %v5082_v56 }
 0x9ad   :  { %4576 = vmatprep.subr.bf16.mxu1 %v4694_v0 }
 0x9af   :  { %4279 = vmatmul.mubr.msk.f32.vlgmr.msra.gmra.mrb[20].mxu1 %vm44_vm1, %v4794_v14 }
 0x9b0   :  { %4300 = vmatprep.mubr.msk.f32.mxu1 %vm4695_vm0, %v4696_v8 }
 0xa7a   :  { %v1358_v3 = vpop.f32.mrb[18].mxu1 }
 0xa7b   :  { %v4264_v5 = vpop.f32.mrb[19].mxu1  ;;  %4268 = vmatmul.mubr.msk.f32.vlgmr.msra.gmra.mrb[14].mxu0 %vm266_vm2, %v1358_v3  ;;  %v3888_v3 = vld [vmem:[%s5389_s1 + $0x1] sm:$0x1] }
 0xa7c   :  { %4572 = vmatpush3.bf16.msra.mxu0 %v5096_v62  ;;  %4289 = vmatprep.mubr.msk.f32.mxu0 %vm4695_vm0, %v4696_v8  ;;  %vm2214_vm6 = vcmp.eq.f32.partialorder %v3888_v3, 0.0 }
 0xa7d   :  { %4573 = vmatprep.subr.bf16.mxu0 %v4694_v0  ;;  %v2215_v5 = vsel %vm2214_vm6, 1, %v4697_v29 }
 0xa80   :  { %4575 = vmatpush3.bf16.msra.mxu0 %v5106_v6 }
 0xa81   :  { %4303 = vmatprep.subr.mxu0 %v4696_v8 }
 0xa82   :  { %v1509_v7 = vpop.f32.mrb[20].mxu1 }
 0xa83   :  { %4290 = vmatmul.mubr.msk.f32.vlgmr.msra.gmra.mrb[16].mxu0 %vm44_vm1, %v4794_v14  ;;  %v4280_v10 = vpop.f32.mrb[21].mxu1 }
 0xa84   :  { %4305 = vmatprep.mubr.msk.f32.mxu0 %vm4695_vm0, %v4696_v8 }
 0xb4e   :  { %v1433_v15 = vpop.f32.mrb[14].mxu0 }
 0xb4f   :  { %v5118_v18 = vadd.f32 %v1433_v15, %v5020_v2  ;;  %v4269_v20 = vpop.f32.mrb[15].mxu0  ;;  %v3878_v2 = vld [vmem:[%s5388_s4 + $0x68] sm:$0xff] }
 0xb50   :  { %v5134_v30 = vpack.c.bf16 %v3878_v2, %v3877_v25 }
 0xb52   :  { %4578 = vmatpush3.bf16.msra.mxu1 %v5134_v30 }
 0xb53   :  { %4579 = vmatprep.subr.bf16.mxu1 %v4694_v0 }
 0xb56   :  { %v1584_v21 = vpop.f32.mrb[16].mxu0  ;;  %4581 = vmatpush3.bf16.msra.mxu1 %v5140_v34 }
 0xb57   :  { %v4291_v23 = vpop.f32.mrb[17].mxu0  ;;  %4304 = vmatpush3.xpose.msk.msra.mxu0 %vm266_vm2, %v1584_v21  ;;  %4313 = vmatprep.subr.mxu1 %v4696_v8 }
 0xb58   :  { %4308 = vmatprep.subr.mxu0 %v4696_v8 }
 0xb59   :  { %4301 = vmatmul.mubr.msk.f32.vlgmr.msra.gmra.mrb[22].mxu1 %vm44_vm1, %v4794_v14 }
 0xb5a   :  { %4306 = vmatmul.mubr.msk.f32.vlgmr.msra.gmra.mrb[18].mxu0 %vm266_vm2, %v1509_v7  ;;  %4315 = vmatprep.mubr.msk.f32.mxu1 %vm4695_vm0, %v4696_v8  ;;  %v5235_v7 = vrot.slane %v2215_v5, %v347_v28 }
 0xb5b   :  { %4310 = vmatprep.mubr.msk.f32.mxu0 %vm4695_vm0, %v4696_v8  ;;  %4314 = vmatpush3.msra.mxu1 %v5159_v31 }
 0xb5c   :  { %4588 = vmatprep.subr.bf16.mxu1 %v4694_v0  ;;  %vm2220_vm7 = vcmp.eq.s32.totalorder %v5235_v7, 1 }
 0xc2c   :  { %v1659_v54 = vpop.f32.mrb[22].mxu1 }
 0xc2d   :  { %v1735_v35 = vpop.f32.mrb[18].mxu0  ;;  %v4302_v55 = vpop.f32.mrb[23].mxu1  ;;  %4309 = vmatpush3.msra.mxu0 %v1659_v54 }
 0xc2e   :  { %v1739_v36 = vsel %vm349_vm4, -1e+20, %v1735_v35  ;;  %v4307_v38 = vpop.f32.mrb[19].mxu0  ;;  %4582 = vmatprep.subr.bf16.mxu0 %v4694_v0 }
 0xc2f   :  { %v1740_v39 = vsel %vm4849_vm5, %v1739_v36, -1e+20 }
 0xc30   :  { %v1741_v40 = vmul.f32 0.17677669, %v1740_v39 }
 0xc32   :  { %v1742_v43 = vsel %vm266_vm2, %v1741_v40, -inf }
 0xc33   :  { %1743 = vmax.xlane.f32.xlu0 %v1742_v43 }
 0xcc0   :  { %v1744_v45 = vpop.xlane.xlu0 %1743 }
 0xcc1   :  { %v1745_v46 = vsub.f32 %v1741_v40, %v1744_v45 }
 0xcc3   :  { %v1746_v48 = vmul.f32 1.442695, %v1745_v46 }
 0xcc5   :  { %4670 = vpow2.f32 %v1746_v48 }
 0xccf   :  { %v4671_v14 = vpop.eup %4670 }
 0xcd0   :  { %v1748_v50 = vsel %vm266_vm2, %v4671_v14, 0.0 }
 0xcd1   :  { %1749 = vadd.xlane.f32.xlu1 %v1748_v50 }
 0xd5e   :  { %v1750_v59 = vpop.xlane.xlu1 %1749 }
 0xd5f   :  { %4672 = vrcp.f32 %v1750_v59 }
 0xd69   :  { %v4673_v60 = vpop.eup %4672 }
 0xd6a   :  { %v1752_v63 = vmul.f32 %v4673_v60, %v4671_v14 }
 0xd6c   :  { %4311 = vmatmul.mubr.msk.f32.vlgmr.msra.gmra.mrb[20].mxu0 %vm266_vm2, %v1752_v63 }
 0xd6d   :  { %4584 = vmatpush3.bf16.msra.mxu0 %v4774_v9  ;;  %4326 = vmatprep.mubr.msk.f32.mxu0 %vm4695_vm0, %v4696_v8 }
 0xd6e   :  { %4585 = vmatprep.subr.bf16.mxu0 %v4694_v0 }
 0xd71   :  { %4587 = vmatpush3.bf16.msra.mxu0 %v4787_v13 }
 0xd72   :  { %4594 = vmatprep.subr.bf16.mxu0 %v4694_v0 }
 0xd74   :  { %4327 = vmatmul.mubr.msk.f32.vlgmr.msra.gmra.mrb[22].mxu0 %vm44_vm1, %v5173_v1 }
 0xd75   :  { %4596 = vmatpush3.bf16.msra.mxu0 %v4821_v22  ;;  %4348 = vmatprep.mubr.msk.f32.mxu0 %vm4695_vm0, %v4696_v8 }
 0xd76   :  { %4597 = vmatprep.subr.bf16.mxu0 %v4694_v0 }
 0xd79   :  { %4599 = vmatpush3.bf16.msra.mxu0 %v4827_v24 }
 0xd7a   :  { %4600 = vmatprep.subr.bf16.mxu0 %v4694_v0 }
 0xd7c   :  { %4349 = vmatmul.mubr.msk.f32.vlgmr.msra.gmra.mrb[24].mxu0 %vm44_vm1, %v5173_v1 }
 0xd7d   :  { %4602 = vmatpush3.bf16.msra.mxu0 %v4866_v49  ;;  %4369 = vmatprep.mubr.msk.f32.mxu0 %vm4695_vm0, %v4696_v8 }
 0xd7e   :  { %4603 = vmatprep.subr.bf16.mxu0 %v4694_v0 }
 0xd81   :  { %4605 = vmatpush3.bf16.msra.mxu0 %v4876_v52 }
 0xd82   :  { %4612 = vmatprep.subr.bf16.mxu0 %v4694_v0 }
 0xd84   :  { %4370 = vmatmul.mubr.msk.f32.vlgmr.msra.gmra.mrb[26].mxu0 %vm44_vm1, %v5173_v1 }
 0xd85   :  { %4614 = vmatpush3.bf16.msra.mxu0 %v4925_v11  ;;  %4391 = vmatprep.mubr.msk.f32.mxu0 %vm4695_vm0, %v4696_v8 }
 0xd86   :  { %4615 = vmatprep.subr.bf16.mxu0 %v4694_v0 }
 0xd89   :  { %4617 = vmatpush3.bf16.msra.mxu0 %v4931_v16 }
 0xd8a   :  { %4404 = vmatprep.subr.mxu0 %v4696_v8 }
 0xd8c   :  { %4392 = vmatmul.mubr.msk.f32.vlgmr.msra.gmra.mrb[28].mxu0 %vm44_vm1, %v5173_v1 }
 0xd8d   :  { %4405 = vmatpush3.msra.mxu0 %v4950_v37  ;;  %4406 = vmatprep.mubr.msk.f32.mxu0 %vm4695_vm0, %v4696_v8 }
 0xd8e   :  { %4618 = vmatprep.subr.bf16.mxu0 %v4694_v0 }
 0xe3f   :  { %v1822_v9 = vpop.f32.mrb[20].mxu0 }
 0xe40   :  { %v4312_v13 = vpop.f32.mrb[21].mxu0  ;;  %4316 = vmatmul.mubr.msk.f32.vlgmr.msra.gmra.mrb[24].mxu1 %vm266_vm2, %v1822_v9 }
 0xe41   :  { %4590 = vmatpush3.bf16.msra.mxu1 %v4759_v4  ;;  %4337 = vmatprep.mubr.msk.f32.mxu1 %vm4695_vm0, %v4696_v8  ;;  %v5219_v4 = vld [vmem:[%s5391_s6] ss:$0 sm:$0xff] }
 0xe42   :  { %4591 = vmatprep.subr.bf16.mxu1 %v4694_v0 }
 0xe45   :  { %4593 = vmatpush3.bf16.msra.mxu1 %v4783_v12 }
 0xe46   :  { %4351 = vmatprep.subr.mxu1 %v4696_v8 }
 0xe47   :  { %v1986_v22 = vpop.f32.mrb[22].mxu0 }
 0xe48   :  { %4338 = vmatmul.mubr.msk.f32.vlgmr.msra.gmra.mrb[26].mxu1 %vm44_vm1, %v5173_v1  ;;  %v4328_v24 = vpop.f32.mrb[23].mxu0 }
 0xe49   :  { %4353 = vmatprep.mubr.msk.f32.mxu1 %vm4695_vm0, %v4696_v8 }
 0xe4f   :  { %v2134_v26 = vpop.f32.mrb[24].mxu0 }
 0xe50   :  { %v4350_v32 = vpop.f32.mrb[25].mxu0 }
 0xe57   :  { %v2379_v39 = vpop.f32.mrb[26].mxu0 }
 0xe58   :  { %v4371_v40 = vpop.f32.mrb[27].mxu0 }
 0xf13   :  { %v1897_v49 = vpop.f32.mrb[24].mxu1 }
 0xf14   :  { %v1901_v52 = vadd.f32 %v1897_v49, %v5118_v18  ;;  %v4317_v11 = vpop.f32.mrb[25].mxu1 }
 0xf16   :  { %v1908_v12 = vadd.f32 %v5219_v4, %v1901_v52 }
 0xf18   :  { %1909 = vst.msk [vmem:[#allocation2] sm:$0xff] %vm44_vm1, %v1908_v12 }
 0xf1b   :  { %v2060_v16 = vpop.f32.mrb[26].mxu1 }
 0xf1c   :  { %v4339_v37 = vpop.f32.mrb[27].mxu1  ;;  %4352 = vmatpush3.xpose.msk.msra.mxu1 %vm266_vm2, %v2060_v16 }
 0xf1d   :  { %4356 = vmatprep.subr.mxu1 %v4696_v8 }
 0xf1f   :  { %4354 = vmatmul.mubr.msk.f32.vlgmr.msra.gmra.mrb[28].mxu1 %vm266_vm2, %v1986_v22  ;;  %v2527_v22 = vpop.f32.mrb[28].mxu0 }
 0xf20   :  { %4358 = vmatprep.mubr.msk.f32.mxu1 %vm4695_vm0, %v4696_v8  ;;  %4357 = vmatpush3.msra.mxu1 %v2134_v26  ;;  %v4393_v24 = vpop.f32.mrb[29].mxu0 }
 0xf21   :  { %4606 = vmatprep.subr.bf16.mxu1 %v4694_v0 }
 0xff2   :  { %v2210_v10 = vpop.f32.mrb[28].mxu1 }
 0xff3   :  { %v2221_v15 = vsel %vm2220_vm7, -1e+20, %v2210_v10  ;;  %v4355_v18 = vpop.f32.mrb[29].mxu1 }
 0xff4   :  { %v2222_v20 = vsel %vm4849_vm5, %v2221_v15, -1e+20 }
 0xff5   :  { %v2223_v21 = vmul.f32 0.17677669, %v2222_v20 }
 0xff7   :  { %v2224_v23 = vsel %vm266_vm2, %v2223_v21, -inf }
 0xff8   :  { %2225 = vmax.xlane.f32.xlu0 %v2224_v23 }
0x1085   :  { %v2226_v25 = vpop.xlane.xlu0 %2225 }
0x1086   :  { %v2227_v29 = vsub.f32 %v2223_v21, %v2226_v25 }
0x1088   :  { %v2228_v2 = vmul.f32 1.442695, %v2227_v29 }
0x108a   :  { %4674 = vpow2.f32 %v2228_v2 }
0x1094   :  { %v4675_v27 = vpop.eup %4674 }
0x1095   :  { %v2230_v28 = vsel %vm266_vm2, %v4675_v27, 0.0 }
0x1096   :  { %2231 = vadd.xlane.f32.xlu1 %v2230_v28 }
0x1123   :  { %v2232_v35 = vpop.xlane.xlu1 %2231 }
0x1124   :  { %4676 = vrcp.f32 %v2232_v35 }
0x112e   :  { %v4677_v36 = vpop.eup %4676 }
0x112f   :  { %v2234_v38 = vmul.f32 %v4677_v36, %v4675_v27 }
0x1131   :  { %4359 = vmatmul.mubr.msk.f32.vlgmr.msra.gmra.mrb[30].mxu1 %vm266_vm2, %v2234_v38 }
0x1132   :  { %4608 = vmatpush3.bf16.msra.mxu1 %v4890_v57  ;;  %4380 = vmatprep.mubr.msk.f32.mxu1 %vm4695_vm0, %v4696_v8 }
0x1133   :  { %4609 = vmatprep.subr.bf16.mxu1 %v4694_v0 }
0x1136   :  { %4611 = vmatpush3.bf16.msra.mxu1 %v4900_v61 }
0x1137   :  { %4394 = vmatprep.subr.mxu1 %v4696_v8 }
0x1139   :  { %4381 = vmatmul.mubr.msk.f32.vlgmr.msra.gmra.mrb[32].mxu1 %vm44_vm1, %v5173_v1 }
0x113a   :  { %4396 = vmatprep.mubr.msk.f32.mxu1 %vm4695_vm0, %v4696_v8 }
0x1204   :  { %v2304_v43 = vpop.f32.mrb[30].mxu1 }
0x1205   :  { %v4360_v45 = vpop.f32.mrb[31].mxu1 }
0x1206   :  { %v3763_v45 = vld [vmem:[#allocation2] sm:$0xff] }
0x120c   :  { %v2453_v57 = vpop.f32.mrb[32].mxu1 }
0x120d   :  { %v4382_v46 = vpop.f32.mrb[33].mxu1  ;;  %4395 = vmatpush3.xpose.msk.msra.mxu1 %vm266_vm2, %v2453_v57  ;;  %v3765_v57 = vld [vmem:[%s5387_s0] sm:$0xff] }
0x120e   :  { %4399 = vmatprep.subr.mxu1 %v4696_v8 }
0x1210   :  { %4397 = vmatmul.mubr.msk.f32.vlgmr.msra.gmra.mrb[34].mxu1 %vm266_vm2, %v2379_v39 }
0x1211   :  { %4401 = vmatprep.mubr.msk.f32.mxu1 %vm4695_vm0, %v4696_v8  ;;  %4400 = vmatpush3.msra.mxu1 %v2527_v22 }
0x1212   :  { %4409 = vmatprep.subr.mxu1 %v4696_v8 }
0x12e3   :  { %v2603_v61 = vpop.f32.mrb[34].mxu1 }
0x12e4   :  { %v2607_v48 = vsel %vm2220_vm7, -1e+20, %v2603_v61  ;;  %v4398_v14 = vpop.f32.mrb[35].mxu1 }
0x12e5   :  { %v2608_v50 = vsel %vm4849_vm5, %v2607_v48, -1e+20  ;;  %v3767_v48 = vadd.f32 %v3765_v57, %v3763_v45 }
0x12e6   :  { %v2609_v54 = vmul.f32 0.17677669, %v2608_v50 }
0x12e8   :  { %v2610_v55 = vsel %vm266_vm2, %v2609_v54, -inf }
0x12e9   :  { %2611 = vmax.xlane.f32.xlu0 %v2610_v55 }
0x1376   :  { %v2612_v59 = vpop.xlane.xlu0 %2611 }
0x1377   :  { %v2613_v60 = vsub.f32 %v2609_v54, %v2612_v59 }
0x1379   :  { %v2614_v63 = vmul.f32 1.442695, %v2613_v60 }
0x137b   :  { %4678 = vpow2.f32 %v2614_v63 }
0x1385   :  { %v4679_v9 = vpop.eup %4678 }
0x1386   :  { %v2616_v13 = vsel %vm266_vm2, %v4679_v9, 0.0 }
0x1387   :  { %2617 = vadd.xlane.f32.xlu1 %v2616_v13 }
0x1414   :  { %v2618_v49 = vpop.xlane.xlu1 %2617 }
0x1415   :  { %4680 = vrcp.f32 %v2618_v49 }
0x141f   :  { %v4681_v52 = vpop.eup %4680 }
0x1420   :  { %v2620_v11 = vmul.f32 %v4681_v52, %v4679_v9 }
0x1422   :  { %4402 = vmatmul.mubr.msk.f32.vlgmr.msra.gmra.mrb[36].mxu1 %vm266_vm2, %v2620_v11 }
0x1423   :  { %4410 = vmatpush3.msra.mxu1 %v4957_v41  ;;  %4411 = vmatprep.mubr.msk.f32.mxu1 %vm4695_vm0, %v4696_v8 }
0x1424   :  { %4624 = vmatprep.subr.bf16.mxu1 %v4694_v0 }
0x1426   :  { %4412 = vmatmul.mubr.msk.f32.vlgmr.msra.gmra.mrb[38].mxu1 %vm266_vm2, %v2304_v43 }
0x1427   :  { %4626 = vmatpush3.bf16.msra.mxu1 %v4969_v44  ;;  %4433 = vmatprep.mubr.msk.f32.mxu1 %vm4695_vm0, %v4696_v8 }
0x1428   :  { %4627 = vmatprep.subr.bf16.mxu1 %v4694_v0 }
0x142b   :  { %4629 = vmatpush3.bf16.msra.mxu1 %v4983_v47 }
0x142c   :  { %4447 = vmatprep.subr.mxu1 %v4696_v8 }
0x142e   :  { %4434 = vmatmul.mubr.msk.f32.vlgmr.msra.gmra.mrb[40].mxu1 %vm44_vm1, %v5173_v1 }
0x142f   :  { %4449 = vmatprep.mubr.msk.f32.mxu1 %vm4695_vm0, %v4696_v8 }
0x14f5   :  { %v2690_v41 = vpop.f32.mrb[36].mxu1 }
0x14f6   :  { %v4403_v12 = vpop.f32.mrb[37].mxu1  ;;  %4407 = vmatmul.mubr.msk.f32.vlgmr.msra.gmra.mrb[30].mxu0 %vm266_vm2, %v2690_v41 }
0x14f7   :  { %4620 = vmatpush3.bf16.msra.mxu0 %v4997_v51  ;;  %4422 = vmatprep.mubr.msk.f32.mxu0 %vm4695_vm0, %v4696_v8  ;;  %v3956_v12 = vld [vmem:[%s5392_s7] ss:$0 sm:$0xff] }
0x14f8   :  { %4621 = vmatprep.subr.bf16.mxu0 %v4694_v0 }
0x14f9   :  { %v2837_v44 = vpop.f32.mrb[38].mxu1 }
0x14fa   :  { %v4413_v47 = vpop.f32.mrb[39].mxu1 }
0x14fb   :  { %4623 = vmatpush3.bf16.msra.mxu0 %v5007_v58 }
0x14fc   :  { %4630 = vmatprep.subr.bf16.mxu0 %v4694_v0 }
0x14fe   :  { %4423 = vmatmul.mubr.msk.f32.vlgmr.msra.gmra.mrb[32].mxu0 %vm44_vm1, %v5173_v1 }
0x14ff   :  { %4632 = vmatpush3.bf16.msra.mxu0 %v5034_v17  ;;  %4444 = vmatprep.mubr.msk.f32.mxu0 %vm4695_vm0, %v4696_v8 }
0x1500   :  { %4633 = vmatprep.subr.bf16.mxu0 %v4694_v0 }
0x1501   :  { %v2985_v51 = vpop.f32.mrb[40].mxu1 }
0x1502   :  { %v4435_v58 = vpop.f32.mrb[41].mxu1  ;;  %4448 = vmatpush3.xpose.msk.msra.mxu1 %vm266_vm2, %v2985_v51  ;;  %v3957_v51 = vld [vmem:[%s5393_s8] ss:$0 sm:$0xff] }
0x1503   :  { %4635 = vmatpush3.bf16.msra.mxu0 %v5040_v19  ;;  %4452 = vmatprep.subr.mxu1 %v4696_v8 }
0x1504   :  { %4457 = vmatprep.subr.mxu0 %v4696_v8 }
0x1506   :  { %4445 = vmatmul.mubr.msk.f32.vlgmr.msra.gmra.mrb[34].mxu0 %vm44_vm1, %v5173_v1 }
0x1507   :  { %4458 = vmatpush3.msra.mxu0 %v5059_v42  ;;  %4459 = vmatprep.mubr.msk.f32.mxu0 %vm4695_vm0, %v4696_v8 }
0x1508   :  { %4642 = vmatprep.subr.bf16.mxu0 %v4694_v0 }
0x15c9   :  { %v2764_v17 = vpop.f32.mrb[30].mxu0 }
0x15ca   :  { %v2838_v19 = vadd.f32 %v2837_v44, %v2764_v17  ;;  %v4408_v16 = vpop.f32.mrb[31].mxu0 }
0x15d1   :  { %v2911_v37 = vpop.f32.mrb[32].mxu0 }
0x15d2   :  { %v4424_v3 = vpop.f32.mrb[33].mxu0  ;;  %4450 = vmatmul.mubr.msk.f32.vlgmr.msra.gmra.mrb[42].mxu1 %vm266_vm2, %v2911_v37 }
0x15d3   :  { %4454 = vmatprep.mubr.msk.f32.mxu1 %vm4695_vm0, %v4696_v8 }
0x15d9   :  { %v3059_v27 = vpop.f32.mrb[34].mxu0 }
0x15da   :  { %v4446_v28 = vpop.f32.mrb[35].mxu0  ;;  %4453 = vmatpush3.msra.mxu1 %v3059_v27 }
0x15db   :  { %4636 = vmatprep.subr.bf16.mxu1 %v4694_v0 }
0x16a5   :  { %v3135_v42 = vpop.f32.mrb[42].mxu1 }
0x16a6   :  { %v3139_v5 = vsel %vm2220_vm7, -1e+20, %v3135_v42  ;;  %v4451_v10 = vpop.f32.mrb[43].mxu1 }
0x16a7   :  { %v3140_v15 = vsel %vm4849_vm5, %v3139_v5, -1e+20 }
0x16a8   :  { %v3141_v18 = vmul.f32 0.17677669, %v3140_v15 }
0x16aa   :  { %v3142_v20 = vsel %vm266_vm2, %v3141_v18, -inf }
0x16ab   :  { %3143 = vmax.xlane.f32.xlu0 %v3142_v20 }
0x1738   :  { %v3144_v21 = vpop.xlane.xlu0 %3143 }
0x1739   :  { %v3145_v23 = vsub.f32 %v3141_v18, %v3144_v21 }
0x173b   :  { %v3146_v25 = vmul.f32 1.442695, %v3145_v23 }
0x173d   :  { %4682 = vpow2.f32 %v3146_v25 }
0x1747   :  { %v4683_v29 = vpop.eup %4682 }
0x1748   :  { %v3148_v2 = vsel %vm266_vm2, %v4683_v29, 0.0 }
0x1749   :  { %3149 = vadd.xlane.f32.xlu1 %v3148_v2 }
0x17d6   :  { %v3150_v26 = vpop.xlane.xlu1 %3149 }
0x17d7   :  { %4684 = vrcp.f32 %v3150_v26 }
0x17e1   :  { %v4685_v32 = vpop.eup %4684 }
0x17e2   :  { %v3152_v35 = vmul.f32 %v4685_v32, %v4683_v29 }
0x17e4   :  { %4455 = vmatmul.mubr.msk.f32.vlgmr.msra.gmra.mrb[44].mxu1 %vm266_vm2, %v3152_v35 }
0x17e5   :  { %4638 = vmatpush3.bf16.msra.mxu1 %v5072_v53  ;;  %4470 = vmatprep.mubr.msk.f32.mxu1 %vm4695_vm0, %v4696_v8 }
0x17e6   :  { %4639 = vmatprep.subr.bf16.mxu1 %v4694_v0 }
0x17e9   :  { %4641 = vmatpush3.bf16.msra.mxu1 %v5082_v56 }
0x17ea   :  { %4648 = vmatprep.subr.bf16.mxu1 %v4694_v0 }
0x17ec   :  { %4471 = vmatmul.mubr.msk.f32.vlgmr.msra.gmra.mrb[46].mxu1 %vm44_vm1, %v5173_v1 }
0x17ed   :  { %4650 = vmatpush3.bf16.msra.mxu1 %v5134_v30  ;;  %4492 = vmatprep.mubr.msk.f32.mxu1 %vm4695_vm0, %v4696_v8 }
0x17ee   :  { %4651 = vmatprep.subr.bf16.mxu1 %v4694_v0 }
0x17f1   :  { %4653 = vmatpush3.bf16.msra.mxu1 %v5140_v34 }
0x17f2   :  { %4505 = vmatprep.subr.mxu1 %v4696_v8 }
0x17f4   :  { %4493 = vmatmul.mubr.msk.f32.vlgmr.msra.gmra.mrb[48].mxu1 %vm44_vm1, %v5173_v1 }
0x17f5   :  { %4506 = vmatpush3.msra.mxu1 %v5159_v31  ;;  %4507 = vmatprep.mubr.msk.f32.mxu1 %vm4695_vm0, %v4696_v8 }
0x18b7   :  { %v3222_v53 = vpop.f32.mrb[44].mxu1 }
0x18b8   :  { %v4456_v56 = vpop.f32.mrb[45].mxu1  ;;  %4460 = vmatmul.mubr.msk.f32.vlgmr.msra.gmra.mrb[36].mxu0 %vm266_vm2, %v3222_v53 }
0x18b9   :  { %4644 = vmatpush3.bf16.msra.mxu0 %v5096_v62  ;;  %4481 = vmatprep.mubr.msk.f32.mxu0 %vm4695_vm0, %v4696_v8 }
0x18ba   :  { %4645 = vmatprep.subr.bf16.mxu0 %v4694_v0 }
0x18bd   :  { %4647 = vmatpush3.bf16.msra.mxu0 %v5106_v6 }
0x18be   :  { %4495 = vmatprep.subr.mxu0 %v4696_v8 }
0x18bf   :  { %v3371_v30 = vpop.f32.mrb[46].mxu1 }
0x18c0   :  { %4482 = vmatmul.mubr.msk.f32.vlgmr.msra.gmra.mrb[38].mxu0 %vm44_vm1, %v5173_v1  ;;  %v4472_v34 = vpop.f32.mrb[47].mxu1 }
0x18c1   :  { %4497 = vmatprep.mubr.msk.f32.mxu0 %vm4695_vm0, %v4696_v8 }
0x18c7   :  { %v3519_v13 = vpop.f32.mrb[48].mxu1 }
0x18c8   :  { %v4494_v22 = vpop.f32.mrb[49].mxu1 }
0x198b   :  { %v3296_v31 = vpop.f32.mrb[36].mxu0 }
0x198c   :  { %v3300_v36 = vadd.f32 %v3296_v31, %v2838_v19  ;;  %v4461_v62 = vpop.f32.mrb[37].mxu0 }
0x1993   :  { %v3445_v38 = vpop.f32.mrb[38].mxu0 }
0x1994   :  { %v4483_v39 = vpop.f32.mrb[39].mxu0  ;;  %4496 = vmatpush3.xpose.msk.msra.mxu0 %vm266_vm2, %v3445_v38 }
0x1995   :  { %4500 = vmatprep.subr.mxu0 %v4696_v8 }
0x1997   :  { %4498 = vmatmul.mubr.msk.f32.vlgmr.msra.gmra.mrb[40].mxu0 %vm266_vm2, %v3371_v30 }
0x1998   :  { %4502 = vmatprep.mubr.msk.f32.mxu0 %vm4695_vm0, %v4696_v8  ;;  %v3769_v8 = vsel %vm44_vm1, %v3767_v48, 0.0  ;;  %4501 = vmatpush3.msra.mxu0 %v3519_v13 }
0x1a6a   :  { %v3595_v0 = vpop.f32.mrb[40].mxu0 }
0x1a6b   :  { %v3599_v6 = vsel %vm2220_vm7, -1e+20, %v3595_v0  ;;  %v4499_v40 = vpop.f32.mrb[41].mxu0 }
0x1a6c   :  { %v3600_v43 = vsel %vm4849_vm5, %v3599_v6, -1e+20 }
0x1a6d   :  { %v3601_v46 = vmul.f32 0.17677669, %v3600_v43 }
0x1a6f   :  { %v3602_v61 = vsel %vm266_vm2, %v3601_v46, -inf }
0x1a70   :  { %3603 = vmax.xlane.f32.xlu0 %v3602_v61 }
0x1a74   :  { %3770 = vadd.xlane.f32.xlu0 %v3769_v8 }
0x1afd   :  { %v3604_v14 = vpop.xlane.xlu0 %3603 }
0x1afe   :  { %v3605_v7 = vsub.f32 %v3601_v46, %v3604_v14 }
0x1b00   :  { %v3606_v50 = vmul.f32 1.442695, %v3605_v7 }
0x1b01   :  { %v3771_v54 = vpop.xlane.xlu0 %3770 }
0x1b02   :  { %4686 = vpow2.f32 %v3606_v50  ;;  %v3776_v33 = vmul.f32 0.03125, %v3771_v54 }
0x1b04   :  { %v3778_v55 = vsub.f32 %v3767_v48, %v3776_v33 }
0x1b06   :  { %v3780_v59 = vmul.f32 %v3778_v55, %v3778_v55 }
0x1b08   :  { %v3782_v60 = vsel %vm44_vm1, %v3780_v59, 0.0 }
0x1b09   :  { %3783 = vadd.xlane.f32.xlu0 %v3782_v60 }
0x1b0c   :  { %v4687_v63 = vpop.eup %4686 }
0x1b0d   :  { %v3608_v9 = vsel %vm266_vm2, %v4687_v63, 0.0 }
0x1b0e   :  { %3609 = vadd.xlane.f32.xlu1 %v3608_v9 }
0x1b96   :  { %v3784_v24 = vpop.xlane.xlu0 %3783 }
0x1b97   :  { %v3788_v49 = vmul.f32 0.03125, %v3784_v24 }
0x1b99   :  { %v3790_v52 = vadd.f32 1e-05, %v3788_v49 }
0x1b9b   :  { %4688 = vrsqrt.f32 %v3790_v52  ;;  %v3610_v11 = vpop.xlane.xlu1 %3609 }
0x1b9c   :  { %4690 = vrcp.f32 %v3610_v11 }
0x1ba5   :  { %v4689_v41 = vpop.eup %4688 }
0x1ba6   :  { %v4691_v44 = vpop.eup %4690  ;;  %v3794_v47 = vmul.f32 %v4689_v41, %v3778_v55 }
0x1ba7   :  { %v3612_v58 = vmul.f32 %v4691_v44, %v4687_v63 }
0x1ba8   :  { %v3803_v17 = vmul.f32 %v3956_v12, %v3794_v47 }
0x1ba9   :  { %4503 = vmatmul.mubr.msk.f32.vlgmr.msra.gmra.mrb[42].mxu0 %vm266_vm2, %v3612_v58 }
0x1baa   :  { %v3812_v19 = vadd.f32 %v3957_v51, %v3803_v17 }
0x1bac   :  { %3814 = vst.msk [vmem:[%s5394_s9] sm:$0xff] %vm44_vm1, %v3812_v19 }
0x1c7c   :  { %v3682_v16 = vpop.f32.mrb[42].mxu0 }
0x1c7d   :  { %v4504_v37 = vpop.f32.mrb[43].mxu0  ;;  %4508 = vmatmul.mubr.msk.f32.vlgmr.msra.gmra.mrb[50].mxu1 %vm266_vm2, %v3682_v16 }
0x1d50   :  { %v3756_v3 = vpop.f32.mrb[50].mxu1 }
0x1d51   :  { %v3760_v42 = vadd.f32 %v3756_v3, %v3300_v36  ;;  %v4509_v5 = vpop.f32.mrb[51].mxu1 }
0x1d53   :  { %v3761_v10 = vadd.f32 %v5219_v4, %v3760_v42 }
0x1d55   :  { %3762 = vst.msk [vmem:[#allocation2 + $0x8] sm:$0xff] %vm44_vm1, %v3761_v10 }
0x1d5c   :  { %v3764_v15 = vld [vmem:[#allocation2 + $0x8] sm:$0xff] }
0x1d5d   :  { %v3768_v18 = vadd.f32 %v3764_v15, %v5173_v1 }
0x1d5f   :  { %v3772_v20 = vsel %vm44_vm1, %v3768_v18, 0.0 }
0x1d60   :  { %3773 = vadd.xlane.f32.xlu1 %v3772_v20 }
0x1ded   :  { %v3774_v21 = vpop.xlane.xlu1 %3773 }
0x1dee   :  { %v3777_v23 = vmul.f32 0.03125, %v3774_v21 }
0x1df0   :  { %v3779_v25 = vsub.f32 %v3768_v18, %v3777_v23 }
0x1df2   :  { %v3781_v29 = vmul.f32 %v3779_v25, %v3779_v25 }
0x1df4   :  { %v3785_v2 = vsel %vm44_vm1, %v3781_v29, 0.0 }
0x1df5   :  { %3786 = vadd.xlane.f32.xlu1 %v3785_v2 }
0x1e82   :  { %v3787_v27 = vpop.xlane.xlu1 %3786 }
0x1e83   :  { %v3789_v28 = vmul.f32 0.03125, %v3787_v27 }
0x1e85   :  { %v3791_v26 = vadd.f32 1e-05, %v3789_v28 }
0x1e87   :  { %4692 = vrsqrt.f32 %v3791_v26 }
0x1e91   :  { %v4693_v4 = vpop.eup %4692 }
0x1e92   :  { %v3795_v32 = vmul.f32 %v4693_v4, %v3779_v25 }
0x1e94   :  { %v3804_v35 = vmul.f32 %v3956_v12, %v3795_v32 }
0x1e96   :  { %v3813_v53 = vadd.f32 %v3957_v51, %v3804_v35 }
0x1e98   :  { %3815 = vst.msk [vmem:[%s5394_s9 + $0x8] sm:$0xff] %vm44_vm1, %v3813_v53 }

// kernel: transformer_forward.7
= control target key start
LH: loop header
LB: loop body
LE: loop exit
PB: predicated region body
PF: predicated region fallthrough
CT: control target
= control target key end

     0   :  { %v5068_v0 = vmov 0.0|0.0   ;;  %vm5069_vm0 = vmmov 0   ;;  %v5070_v4 = vmov 0.0   ;;  %vm61_vm1 = vcmask 261120   ;;  %s5873_s3 = inlined_call_operand.vmem [shape: f32[4,32,8], index: 3, kind: input, shape index: {}]   ;;  %s5874_s4 = inlined_call_operand.vmem [shape: f32[4,32,8], index: 4, kind: input, shape index: {}]   ;;  %s5875_s0 = inlined_call_operand.vmem [shape: f32[16,32], index: 0, kind: input, shape index: {}, may-alias: {0,1}]   ;;  %s5876_s5 = inlined_call_operand.vmem [shape: f32[4,32,8], index: 5, kind: input, shape index: {}]   ;;  %s5877_s1 = inlined_call_operand.vmem [shape: f32[16,32], index: 1, kind: input, shape index: {}, may-alias: {0,1}]   ;;  %s5878_s2 = inlined_call_operand.vmem [shape: f32[2,1,8], index: 2, kind: input, shape index: {}]   ;;  %s5879_s6 = inlined_call_operand.vmem [shape: f32[4,8,32], index: 6, kind: input, shape index: {}]   ;;  %s5880_s7 = inlined_call_operand.vmem [shape: f32[1,32], index: 7, kind: input, shape index: {}]   ;;  %s5881_s8 = inlined_call_operand.vmem [shape: f32[1,32], index: 8, kind: input, shape index: {}]   ;;  %s5882_s9 = inlined_call_operand.vmem [shape: f32[1,32], index: 9, kind: input, shape index: {}]   ;;  %s5883_s10 = inlined_call_operand.vmem [shape: f32[32,128], index: 10, kind: input, shape index: {}]   ;;  %s5884_s12 = inlined_call_operand.vmem [shape: f32[128,32], index: 12, kind: input, shape index: {}]   ;;  %s5885_s11 = inlined_call_operand.vmem [shape: f32[1,128], index: 11, kind: input, shape index: {}]   ;;  %s5886_s13 = inlined_call_operand.vmem [shape: f32[1,32], index: 13, kind: input, shape index: {}]   ;;  %s5887_s14 = inlined_call_operand.vmem [shape: f32[1,32], index: 14, kind: input, shape index: {}]   ;;  %s5888_s15 = inlined_call_operand.vmem [shape: f32[1,32], index: 15, kind: input, shape index: {}]   ;;  %s5889_s16 = inlined_call_operand.vmem [shape: f32[16,32], index: 16, kind: output, shape index: {}]  }
   0x1   :  { %5891 = sst [smem:[#allocation3_spill]] %s5873_s3  ;;  %4840 = vmatprep.subr.bf16.mxu0 %v5068_v0  ;;  %4418 = vmatprep.mubr.msk.f32.mxu0 %vm5069_vm0, %v5070_v4  ;;  %v135_v8 = vld [vmem:[%s5874_s4] sm:$0xff]  ;;  %v136_v9 = vld [vmem:[%s5874_s4 + $0x8] sm:$0xff]  ;;  %v137_v12 = vld [vmem:[%s5874_s4 + $0x10] sm:$0xff]  ;;  %vm286_vm2 = vcmask 64512   ;;  %v365_v28 = vlaneseq  ;;  %v5071_v32 = vmov 0  }
   0x2   :  { %s5892_s23 = sld [smem:[#allocation3_spill]]  ;;  %4448 = vmatprep.subr.mxu1 %v5070_v4  ;;  %4450 = vmatprep.mubr.msk.f32.mxu1 %vm5069_vm0, %v5070_v4  ;;  %v5191_v10 = vld [vmem:[%s5875_s0] sm:$0xff]  ;;  %v5193_v11 = vpack.c.bf16 %v136_v9, %v135_v8  ;;  %v138_v13 = vld [vmem:[%s5874_s4 + $0x18] sm:$0xff]  ;;  %v213_v16 = vld [vmem:[%s5876_s5 + $0x8] sm:$0xff] }
   0x3   :  { %v5205_v14 = vpack.c.bf16 %v138_v13, %v137_v12  ;;  %v212_v15 = vld [vmem:[%s5876_s5] sm:$0xff]  ;;  %v214_v19 = vld [vmem:[%s5876_s5 + $0x10] sm:$0xff]  ;;  %v215_v20 = vld [vmem:[%s5876_s5 + $0x18] sm:$0xff]  ;;  %v5254_v30 = vshrl.u32 %v365_v28, 7 }
   0x4   :  { %v5220_v17 = vld [vmem:[%s5877_s1] sm:$0xff]  ;;  %v5222_v18 = vpack.c.bf16 %v213_v16, %v212_v15  ;;  %v5237_v21 = vpack.c.bf16 %v215_v20, %v214_v19  ;;  %v4086_v53 = vld [vmem:[%s5874_s4 + $0x28] sm:$0xff]  ;;  %v4087_v57 = vld [vmem:[%s5874_s4 + $0x30] sm:$0xff] }
   0x5   :  { %v56_v29 = vld [vmem:[%s5878_s2] sm:$0x1]  ;;  %v367_v31 = vsub.s32 0, %v5254_v30  ;;  %v4088_v58 = vld [vmem:[%s5874_s4 + $0x38] sm:$0xff]  ;;  %v4092_v8 = vld [vmem:[%s5876_s5 + $0x30] sm:$0xff] }
   0x6   :  { %vm363_vm3 = vcmp.eq.f32.partialorder %v56_v29, 0.0  ;;  %v4085_v52 = vld [vmem:[%s5874_s4 + $0x20] sm:$0xff]  ;;  %v5307_v59 = vpack.c.bf16 %v4088_v58, %v4087_v57  ;;  %v4093_v12 = vld [vmem:[%s5876_s5 + $0x38] sm:$0xff] }
   0x7   :  { %v364_v33 = vsel %vm363_vm3, 1, %v5071_v32  ;;  %v5297_v55 = vpack.c.bf16 %v4086_v53, %v4085_v52  ;;  %v5338_v13 = vpack.c.bf16 %v4093_v12, %v4092_v8  ;;  %v4113_v8 = vld [vmem:[%s5876_s5 + $0x50] sm:$0xff] }
   0x8   :  { %v57_v1 = vld [vmem:[%s5892_s23] sm:$0xff]  ;;  %v58_v2 = vld [vmem:[%s5892_s23 + $0x8] sm:$0xff]  ;;  %v59_v3 = vld [vmem:[%s5892_s23 + $0x10] sm:$0xff]  ;;  %v5260_v34 = vrot.slane %v364_v33, %v367_v31 }
   0x9   :  { %v5169_v5 = vpack.c.bf16 %v58_v2, %v57_v1  ;;  %v60_v6 = vld [vmem:[%s5892_s23 + $0x18] sm:$0xff]  ;;  %v4080_v45 = vld [vmem:[%s5892_s23 + $0x20] sm:$0xff]  ;;  %v4081_v46 = vld [vmem:[%s5892_s23 + $0x28] sm:$0xff] }
   0xa   :  { %v5178_v7 = vpack.c.bf16 %v60_v6, %v59_v3  ;;  %vm369_vm4 = vcmp.eq.s32.totalorder %v5260_v34, 1  ;;  %v5273_v47 = vpack.c.bf16 %v4081_v46, %v4080_v45  ;;  %v4082_v48 = vld [vmem:[%s5892_s23 + $0x30] sm:$0xff]  ;;  %v4083_v49 = vld [vmem:[%s5892_s23 + $0x38] sm:$0xff]  ;;  %v4090_v3 = vld [vmem:[%s5876_s5 + $0x20] sm:$0xff] }
   0xb   :  { %4842 = vmatpush3.bf16.msra.mxu0 %v5169_v5  ;;  %v5283_v50 = vpack.c.bf16 %v4083_v49, %v4082_v48  ;;  %v4091_v6 = vld [vmem:[%s5876_s5 + $0x28] sm:$0xff]  ;;  %v4101_v45 = vld [vmem:[%s5892_s23 + $0x40] sm:$0xff]  ;;  %v4103_v49 = vld [vmem:[%s5892_s23 + $0x50] sm:$0xff] }
   0xc   :  { %4843 = vmatprep.subr.bf16.mxu0 %v5068_v0  ;;  %v5332_v9 = vpack.c.bf16 %v4091_v6, %v4090_v3  ;;  %v5355_v33 = vld [vmem:[%s5879_s6 + $0x8] sm:$0xff]  ;;  %v4111_v3 = vld [vmem:[%s5876_s5 + $0x40] sm:$0xff]  ;;  %v5560_v34 = vld [vmem:[%s5879_s6 + $0x18] sm:$0xff] }
   0xd   :  { %v4102_v46 = vld [vmem:[%s5892_s23 + $0x48] sm:$0xff] }
   0xe   :  { %v5402_v48 = vpack.c.bf16 %v4102_v46, %v4101_v45  ;;  %v4112_v6 = vld [vmem:[%s5876_s5 + $0x48] sm:$0xff] }
   0xf   :  { %4845 = vmatpush3.bf16.msra.mxu0 %v5178_v7  ;;  %v5439_v12 = vpack.c.bf16 %v4112_v6, %v4111_v3  ;;  %v4122_v45 = vld [vmem:[%s5892_s23 + $0x68] sm:$0xff] }
  0x10   :  { %4846 = vmatprep.subr.bf16.mxu0 %v5068_v0 }
  0x12   :  { %4419 = vmatmul.mubr.msk.f32.vlgmr.msra.gmra.mrb[0].mxu0 %vm61_vm1, %v5191_v10 }
  0x13   :  { %4848 = vmatpush3.bf16.msra.mxu0 %v5193_v11  ;;  %4429 = vmatprep.mubr.msk.f32.mxu0 %vm5069_vm0, %v5070_v4 }
  0x14   :  { %4849 = vmatprep.subr.bf16.mxu0 %v5068_v0 }
  0x17   :  { %4851 = vmatpush3.bf16.msra.mxu0 %v5205_v14 }
  0x18   :  { %4852 = vmatprep.subr.bf16.mxu0 %v5068_v0 }
  0x1a   :  { %4430 = vmatmul.mubr.msk.f32.vlgmr.msra.gmra.mrb[2].mxu0 %vm61_vm1, %v5220_v17 }
  0x1b   :  { %4854 = vmatpush3.bf16.msra.mxu0 %v5222_v18  ;;  %4440 = vmatprep.mubr.msk.f32.mxu0 %vm5069_vm0, %v5070_v4 }
  0x1c   :  { %4855 = vmatprep.subr.bf16.mxu0 %v5068_v0 }
  0x1f   :  { %4857 = vmatpush3.bf16.msra.mxu0 %v5237_v21 }
  0x20   :  { %4443 = vmatprep.subr.mxu0 %v5070_v4 }
  0x22   :  { %4441 = vmatmul.mubr.msk.f32.vlgmr.msra.gmra.mrb[4].mxu0 %vm61_vm1, %v5220_v17 }
  0x23   :  { %4445 = vmatprep.mubr.msk.f32.mxu0 %vm5069_vm0, %v5070_v4 }
  0xe5   :  { %v131_v22 = vpop.f32.mrb[0].mxu0 }
  0xe6   :  { %v4420_v23 = vpop.f32.mrb[1].mxu0 }
  0xed   :  { %v208_v24 = vpop.f32.mrb[2].mxu0 }
  0xee   :  { %v4431_v25 = vpop.f32.mrb[3].mxu0  ;;  %4444 = vmatpush3.xpose.msk.msra.mxu0 %vm286_vm2, %v208_v24 }
  0xef   :  { %4858 = vmatprep.subr.bf16.mxu0 %v5068_v0 }
  0xf1   :  { %4446 = vmatmul.mubr.msk.f32.vlgmr.msra.gmra.mrb[6].mxu0 %vm286_vm2, %v131_v22 }
  0xf2   :  { %4461 = vmatprep.mubr.msk.f32.mxu0 %vm5069_vm0, %v5070_v4  ;;  %4860 = vmatpush3.bf16.msra.mxu0 %v5273_v47 }
  0xf3   :  { %4861 = vmatprep.subr.bf16.mxu0 %v5068_v0 }
  0xf5   :  { %v282_v26 = vpop.f32.mrb[4].mxu0 }
  0xf6   :  { %v4442_v27 = vpop.f32.mrb[5].mxu0  ;;  %4449 = vmatpush3.msra.mxu1 %v282_v26  ;;  %4863 = vmatpush3.bf16.msra.mxu0 %v5283_v50 }
  0xf7   :  { %4864 = vmatprep.subr.bf16.mxu1 %v5068_v0  ;;  %4870 = vmatprep.subr.bf16.mxu0 %v5068_v0 }
  0xf9   :  { %4462 = vmatmul.mubr.msk.f32.vlgmr.msra.gmra.mrb[8].mxu0 %vm61_vm1, %v5191_v10 }
  0xfa   :  { %4483 = vmatprep.mubr.msk.f32.mxu0 %vm5069_vm0, %v5070_v4  ;;  %4872 = vmatpush3.bf16.msra.mxu0 %v5332_v9 }
  0xfb   :  { %4873 = vmatprep.subr.bf16.mxu0 %v5068_v0 }
  0xfe   :  { %4875 = vmatpush3.bf16.msra.mxu0 %v5338_v13 }
  0xff   :  { %4496 = vmatprep.subr.mxu0 %v5070_v4 }
 0x101   :  { %4484 = vmatmul.mubr.msk.f32.vlgmr.msra.gmra.mrb[10].mxu0 %vm61_vm1, %v5220_v17 }
 0x102   :  { %4498 = vmatprep.mubr.msk.f32.mxu0 %vm5069_vm0, %v5070_v4  ;;  %4497 = vmatpush3.msra.mxu0 %v5355_v33 }
 0x103   :  { %4876 = vmatprep.subr.bf16.mxu0 %v5068_v0 }
 0x1c4   :  { %v359_v35 = vpop.f32.mrb[6].mxu0 }
 0x1c5   :  { %v370_v36 = vsel %vm369_vm4, -1e+20, %v359_v35  ;;  %v4447_v37 = vpop.f32.mrb[7].mxu0 }
 0x1c6   :  { %v371_v38 = vmul.f32 0.17677669, %v370_v36 }
 0x1c8   :  { %v372_v39 = vsel %vm286_vm2, %v371_v38, -inf }
 0x1c9   :  { %373 = vmax.xlane.f32.xlu0 %v372_v39  ;;  %v4106_v39 = vld [vmem:[%s5874_s4 + $0x40] sm:$0xff] }
 0x1cc   :  { %v528_v60 = vpop.f32.mrb[8].mxu0 }
 0x1cd   :  { %v4463_v61 = vpop.f32.mrb[9].mxu0 }
 0x1d4   :  { %v678_v28 = vpop.f32.mrb[10].mxu0 }
 0x1d5   :  { %v4485_v29 = vpop.f32.mrb[11].mxu0 }
 0x256   :  { %v374_v40 = vpop.xlane.xlu0 %373 }
 0x257   :  { %v375_v41 = vsub.f32 %v371_v38, %v374_v40  ;;  %v5362_v38 = vld [vmem:[%s5879_s6] sm:$0xff]  ;;  %v4107_v40 = vld [vmem:[%s5874_s4 + $0x48] sm:$0xff] }
 0x259   :  { %v376_v42 = vmul.f32 1.442695, %v375_v41  ;;  %v5374_v41 = vpack.c.bf16 %v4107_v40, %v4106_v39 }
 0x25b   :  { %5028 = vpow2.f32 %v376_v42  ;;  %v4108_v42 = vld [vmem:[%s5874_s4 + $0x50] sm:$0xff] }
 0x265   :  { %v5029_v43 = vpop.eup %5028 }
 0x266   :  { %v378_v44 = vsel %vm286_vm2, %v5029_v43, 0.0 }
 0x267   :  { %379 = vadd.xlane.f32.xlu0 %v378_v44 }
 0x2f4   :  { %v380_v51 = vpop.xlane.xlu0 %379 }
 0x2f5   :  { %5030 = vrcp.f32 %v380_v51  ;;  %v4104_v51 = vld [vmem:[%s5892_s23 + $0x58] sm:$0xff] }
 0x2ff   :  { %v5031_v54 = vpop.eup %5030 }
 0x300   :  { %v382_v56 = vmul.f32 %v5031_v54, %v5029_v43  ;;  %v4109_v43 = vld [vmem:[%s5874_s4 + $0x58] sm:$0xff]  ;;  %v5412_v54 = vpack.c.bf16 %v4104_v51, %v4103_v49  ;;  %v4123_v49 = vld [vmem:[%s5892_s23 + $0x70] sm:$0xff] }
 0x301   :  { %v5388_v44 = vpack.c.bf16 %v4109_v43, %v4108_v42  ;;  %v4121_v43 = vld [vmem:[%s5892_s23 + $0x60] sm:$0xff]  ;;  %v4124_v51 = vld [vmem:[%s5892_s23 + $0x78] sm:$0xff] }
 0x302   :  { %4451 = vmatmul.mubr.msk.f32.vlgmr.msra.gmra.mrb[0].mxu1 %vm286_vm2, %v382_v56  ;;  %v5475_v46 = vpack.c.bf16 %v4122_v45, %v4121_v43 }
 0x303   :  { %4866 = vmatpush3.bf16.msra.mxu1 %v5297_v55  ;;  %4472 = vmatprep.mubr.msk.f32.mxu1 %vm5069_vm0, %v5070_v4 }
 0x304   :  { %4867 = vmatprep.subr.bf16.mxu1 %v5068_v0 }
 0x307   :  { %4869 = vmatpush3.bf16.msra.mxu1 %v5307_v59 }
 0x308   :  { %4486 = vmatprep.subr.mxu1 %v5070_v4 }
 0x30a   :  { %4473 = vmatmul.mubr.msk.f32.vlgmr.msra.gmra.mrb[2].mxu1 %vm61_vm1, %v5220_v17 }
 0x30b   :  { %4488 = vmatprep.mubr.msk.f32.mxu1 %vm5069_vm0, %v5070_v4 }
 0x3d5   :  { %v452_v62 = vpop.f32.mrb[0].mxu1 }
 0x3d6   :  { %v4452_v63 = vpop.f32.mrb[1].mxu1 }
 0x3dd   :  { %v603_v1 = vpop.f32.mrb[2].mxu1 }
 0x3de   :  { %v4474_v2 = vpop.f32.mrb[3].mxu1  ;;  %4487 = vmatpush3.xpose.msk.msra.mxu1 %vm286_vm2, %v603_v1 }
 0x3df   :  { %4491 = vmatprep.subr.mxu1 %v5070_v4 }
 0x3e1   :  { %4489 = vmatmul.mubr.msk.f32.vlgmr.msra.gmra.mrb[4].mxu1 %vm286_vm2, %v528_v60 }
 0x3e2   :  { %4493 = vmatprep.mubr.msk.f32.mxu1 %vm5069_vm0, %v5070_v4  ;;  %4492 = vmatpush3.msra.mxu1 %v678_v28 }
 0x3e3   :  { %4501 = vmatprep.subr.mxu1 %v5070_v4 }
 0x4b4   :  { %v754_v15 = vpop.f32.mrb[4].mxu1 }
 0x4b5   :  { %v758_v16 = vsel %vm369_vm4, -1e+20, %v754_v15  ;;  %v4490_v19 = vpop.f32.mrb[5].mxu1  ;;  %v4114_v15 = vld [vmem:[%s5876_s5 + $0x58] sm:$0xff] }
 0x4b6   :  { %v759_v20 = vmul.f32 0.17677669, %v758_v16  ;;  %v5445_v16 = vpack.c.bf16 %v4114_v15, %v4113_v8 }
 0x4b8   :  { %v760_v22 = vsel %vm286_vm2, %v759_v20, -inf }
 0x4b9   :  { %761 = vmax.xlane.f32.xlu1 %v760_v22 }
 0x546   :  { %v762_v23 = vpop.xlane.xlu1 %761 }
 0x547   :  { %v763_v24 = vsub.f32 %v759_v20, %v762_v23 }
 0x549   :  { %v764_v25 = vmul.f32 1.442695, %v763_v24 }
 0x54b   :  { %5032 = vpow2.f32 %v764_v25 }
 0x555   :  { %v5033_v26 = vpop.eup %5032 }
 0x556   :  { %v766_v27 = vsel %vm286_vm2, %v5033_v26, 0.0 }
 0x557   :  { %767 = vadd.xlane.f32.xlu1 %v766_v27 }
 0x5e4   :  { %v768_v35 = vpop.xlane.xlu1 %767 }
 0x5e5   :  { %5034 = vrcp.f32 %v768_v35 }
 0x5ef   :  { %v5035_v36 = vpop.eup %5034 }
 0x5f0   :  { %v770_v37 = vmul.f32 %v5035_v36, %v5033_v26 }
 0x5f2   :  { %4494 = vmatmul.mubr.msk.f32.vlgmr.msra.gmra.mrb[6].mxu1 %vm286_vm2, %v770_v37  ;;  %v5462_v37 = vld [vmem:[%s5879_s6 + $0x10] sm:$0xff] }
 0x5f3   :  { %4502 = vmatpush3.msra.mxu1 %v5362_v38  ;;  %4503 = vmatprep.mubr.msk.f32.mxu1 %vm5069_vm0, %v5070_v4 }
 0x5f4   :  { %4882 = vmatprep.subr.bf16.mxu1 %v5068_v0 }
 0x5f6   :  { %4504 = vmatmul.mubr.msk.f32.vlgmr.msra.gmra.mrb[8].mxu1 %vm286_vm2, %v452_v62 }
 0x5f7   :  { %4884 = vmatpush3.bf16.msra.mxu1 %v5374_v41  ;;  %4525 = vmatprep.mubr.msk.f32.mxu1 %vm5069_vm0, %v5070_v4 }
 0x5f8   :  { %4885 = vmatprep.subr.bf16.mxu1 %v5068_v0 }
 0x5fb   :  { %4887 = vmatpush3.bf16.msra.mxu1 %v5388_v44 }
 0x5fc   :  { %4539 = vmatprep.subr.mxu1 %v5070_v4 }
 0x5fe   :  { %4526 = vmatmul.mubr.msk.f32.vlgmr.msra.gmra.mrb[10].mxu1 %vm61_vm1, %v5220_v17 }
 0x5ff   :  { %4541 = vmatprep.mubr.msk.f32.mxu1 %vm5069_vm0, %v5070_v4 }
 0x6c5   :  { %v840_v52 = vpop.f32.mrb[6].mxu1 }
 0x6c6   :  { %v4495_v53 = vpop.f32.mrb[7].mxu1  ;;  %4499 = vmatmul.mubr.msk.f32.vlgmr.msra.gmra.mrb[12].mxu0 %vm286_vm2, %v840_v52  ;;  %v5485_v52 = vpack.c.bf16 %v4124_v51, %v4123_v49 }
 0x6c7   :  { %4878 = vmatpush3.bf16.msra.mxu0 %v5402_v48  ;;  %4514 = vmatprep.mubr.msk.f32.mxu0 %vm5069_vm0, %v5070_v4  ;;  %v4126_v53 = vld [vmem:[%s5874_s4 + $0x60] sm:$0xff] }
 0x6c8   :  { %4879 = vmatprep.subr.bf16.mxu0 %v5068_v0 }
 0x6c9   :  { %v988_v56 = vpop.f32.mrb[8].mxu1 }
 0x6ca   :  { %v4505_v57 = vpop.f32.mrb[9].mxu1 }
 0x6cb   :  { %4881 = vmatpush3.bf16.msra.mxu0 %v5412_v54 }
 0x6cc   :  { %4888 = vmatprep.subr.bf16.mxu0 %v5068_v0 }
 0x6ce   :  { %4515 = vmatmul.mubr.msk.f32.vlgmr.msra.gmra.mrb[14].mxu0 %vm61_vm1, %v5191_v10 }
 0x6cf   :  { %4536 = vmatprep.mubr.msk.f32.mxu0 %vm5069_vm0, %v5070_v4  ;;  %4890 = vmatpush3.bf16.msra.mxu0 %v5439_v12 }
 0x6d0   :  { %4891 = vmatprep.subr.bf16.mxu0 %v5068_v0 }
 0x6d1   :  { %v1138_v58 = vpop.f32.mrb[10].mxu1 }
 0x6d2   :  { %v4527_v60 = vpop.f32.mrb[11].mxu1  ;;  %4540 = vmatpush3.xpose.msk.msra.mxu1 %vm286_vm2, %v1138_v58  ;;  %v4128_v58 = vld [vmem:[%s5874_s4 + $0x70] sm:$0xff] }
 0x6d3   :  { %4544 = vmatprep.subr.mxu1 %v5070_v4  ;;  %4893 = vmatpush3.bf16.msra.mxu0 %v5445_v16 }
 0x6d4   :  { %4549 = vmatprep.subr.mxu0 %v5070_v4 }
 0x6d6   :  { %4537 = vmatmul.mubr.msk.f32.vlgmr.msra.gmra.mrb[16].mxu0 %vm61_vm1, %v5220_v17 }
 0x6d7   :  { %4551 = vmatprep.mubr.msk.f32.mxu0 %vm5069_vm0, %v5070_v4  ;;  %4550 = vmatpush3.msra.mxu0 %v5462_v37 }
 0x6d8   :  { %4900 = vmatprep.subr.bf16.mxu0 %v5068_v0 }
 0x799   :  { %v915_v61 = vpop.f32.mrb[12].mxu0 }
 0x79a   :  { %v5425_v62 = vadd.f32 %v988_v56, %v915_v61  ;;  %v4500_v63 = vpop.f32.mrb[13].mxu0  ;;  %v4127_v56 = vld [vmem:[%s5874_s4 + $0x68] sm:$0xff] }
 0x79b   :  { %v5499_v57 = vpack.c.bf16 %v4127_v56, %v4126_v53  ;;  %v5574_v56 = vld [vmem:[%s5875_s0 + $0x8] sm:$0xff] }
 0x7a1   :  { %v1063_v1 = vpop.f32.mrb[14].mxu0 }
 0x7a2   :  { %v4516_v2 = vpop.f32.mrb[15].mxu0  ;;  %4542 = vmatmul.mubr.msk.f32.vlgmr.msra.gmra.mrb[12].mxu1 %vm286_vm2, %v1063_v1 }
 0x7a3   :  { %4546 = vmatprep.mubr.msk.f32.mxu1 %vm5069_vm0, %v5070_v4 }
 0x7a9   :  { %v1213_v35 = vpop.f32.mrb[16].mxu0 }
 0x7aa   :  { %v4538_v36 = vpop.f32.mrb[17].mxu0  ;;  %4545 = vmatpush3.msra.mxu1 %v1213_v35 }
 0x7ab   :  { %4894 = vmatprep.subr.bf16.mxu1 %v5068_v0 }
 0x875   :  { %v1289_v19 = vpop.f32.mrb[12].mxu1 }
 0x876   :  { %v1293_v20 = vsel %vm369_vm4, -1e+20, %v1289_v19  ;;  %v4543_v22 = vpop.f32.mrb[13].mxu1 }
 0x877   :  { %v1294_v23 = vmul.f32 0.17677669, %v1293_v20  ;;  %v4131_v20 = vld [vmem:[%s5876_s5 + $0x60] sm:$0xff]  ;;  %v4133_v22 = vld [vmem:[%s5876_s5 + $0x70] sm:$0xff] }
 0x879   :  { %v1295_v24 = vsel %vm286_vm2, %v1294_v23, -inf }
 0x87a   :  { %1296 = vmax.xlane.f32.xlu0 %v1295_v24  ;;  %v4134_v24 = vld [vmem:[%s5876_s5 + $0x78] sm:$0xff] }
 0x907   :  { %v1297_v25 = vpop.xlane.xlu0 %1296 }
 0x908   :  { %v1298_v26 = vsub.f32 %v1294_v23, %v1297_v25  ;;  %v5543_v25 = vpack.c.bf16 %v4134_v24, %v4133_v22 }
 0x90a   :  { %v1299_v27 = vmul.f32 1.442695, %v1298_v26 }
 0x90c   :  { %5036 = vpow2.f32 %v1299_v27 }
 0x916   :  { %v5037_v28 = vpop.eup %5036 }
 0x917   :  { %v1301_v29 = vsel %vm286_vm2, %v5037_v28, 0.0 }
 0x918   :  { %1302 = vadd.xlane.f32.xlu1 %v1301_v29 }
 0x9a5   :  { %v1303_v39 = vpop.xlane.xlu1 %1302 }
 0x9a6   :  { %5038 = vrcp.f32 %v1303_v39 }
 0x9b0   :  { %v5039_v40 = vpop.eup %5038 }
 0x9b1   :  { %v1305_v42 = vmul.f32 %v5039_v40, %v5037_v28 }
 0x9b3   :  { %4547 = vmatmul.mubr.msk.f32.vlgmr.msra.gmra.mrb[14].mxu1 %vm286_vm2, %v1305_v42 }
 0x9b4   :  { %4562 = vmatprep.mubr.msk.f32.mxu1 %vm5069_vm0, %v5070_v4  ;;  %4896 = vmatpush3.bf16.msra.mxu1 %v5475_v46 }
 0x9b5   :  { %4897 = vmatprep.subr.bf16.mxu1 %v5068_v0 }
 0x9b8   :  { %4899 = vmatpush3.bf16.msra.mxu1 %v5485_v52 }
 0x9b9   :  { %4906 = vmatprep.subr.bf16.mxu1 %v5068_v0 }
 0x9bb   :  { %4563 = vmatmul.mubr.msk.f32.vlgmr.msra.gmra.mrb[16].mxu1 %vm61_vm1, %v5191_v10  ;;  %v4129_v10 = vld [vmem:[%s5874_s4 + $0x78] sm:$0xff] }
 0x9bc   :  { %4584 = vmatprep.mubr.msk.f32.mxu1 %vm5069_vm0, %v5070_v4  ;;  %v5509_v63 = vpack.c.bf16 %v4129_v10, %v4128_v58  ;;  %v4142_v10 = vld [vmem:[%s5878_s2 + $0x1] sm:$0x1] }
 0x9bd   :  { %vm2234_vm5 = vcmp.eq.f32.partialorder %v4142_v10, 0.0 }
 0xa86   :  { %v1375_v60 = vpop.f32.mrb[14].mxu1 }
 0xa87   :  { %v4548_v61 = vpop.f32.mrb[15].mxu1  ;;  %4552 = vmatmul.mubr.msk.f32.vlgmr.msra.gmra.mrb[18].mxu0 %vm286_vm2, %v1375_v60  ;;  %v2235_v60 = vsel %vm2234_vm5, 1, %v5071_v32 }
 0xa88   :  { %4902 = vmatpush3.bf16.msra.mxu0 %v5499_v57  ;;  %4573 = vmatprep.mubr.msk.f32.mxu0 %vm5069_vm0, %v5070_v4  ;;  %v5641_v61 = vrot.slane %v2235_v60, %v367_v31 }
 0xa89   :  { %4903 = vmatprep.subr.bf16.mxu0 %v5068_v0 }
 0xa8a   :  { %vm2240_vm6 = vcmp.eq.s32.totalorder %v5641_v61, 1 }
 0xa8c   :  { %4905 = vmatpush3.bf16.msra.mxu0 %v5509_v63 }
 0xa8d   :  { %4587 = vmatprep.subr.mxu0 %v5070_v4 }
 0xa8e   :  { %v1526_v1 = vpop.f32.mrb[16].mxu1 }
 0xa8f   :  { %4574 = vmatmul.mubr.msk.f32.vlgmr.msra.gmra.mrb[20].mxu0 %vm61_vm1, %v5220_v17  ;;  %v4564_v2 = vpop.f32.mrb[17].mxu1 }
 0xa90   :  { %4589 = vmatprep.mubr.msk.f32.mxu0 %vm5069_vm0, %v5070_v4 }
 0xb5a   :  { %v1450_v3 = vpop.f32.mrb[18].mxu0 }
 0xb5b   :  { %v5521_v6 = vadd.f32 %v1450_v3, %v5425_v62  ;;  %v4553_v8 = vpop.f32.mrb[19].mxu0  ;;  %v4132_v62 = vld [vmem:[%s5876_s5 + $0x68] sm:$0xff] }
 0xb5c   :  { %v5537_v23 = vpack.c.bf16 %v4132_v62, %v4131_v20 }
 0xb5e   :  { %4908 = vmatpush3.bf16.msra.mxu1 %v5537_v23 }
 0xb5f   :  { %4909 = vmatprep.subr.bf16.mxu1 %v5068_v0 }
 0xb62   :  { %v1601_v15 = vpop.f32.mrb[20].mxu0  ;;  %4911 = vmatpush3.bf16.msra.mxu1 %v5543_v25 }
 0xb63   :  { %v4575_v19 = vpop.f32.mrb[21].mxu0  ;;  %4588 = vmatpush3.xpose.msk.msra.mxu0 %vm286_vm2, %v1601_v15  ;;  %4597 = vmatprep.subr.mxu1 %v5070_v4 }
 0xb64   :  { %4592 = vmatprep.subr.mxu0 %v5070_v4 }
 0xb65   :  { %4585 = vmatmul.mubr.msk.f32.vlgmr.msra.gmra.mrb[18].mxu1 %vm61_vm1, %v5220_v17 }
 0xb66   :  { %4590 = vmatmul.mubr.msk.f32.vlgmr.msra.gmra.mrb[22].mxu0 %vm286_vm2, %v1526_v1  ;;  %4599 = vmatprep.mubr.msk.f32.mxu1 %vm5069_vm0, %v5070_v4 }
 0xb67   :  { %4594 = vmatprep.mubr.msk.f32.mxu0 %vm5069_vm0, %v5070_v4  ;;  %4598 = vmatpush3.msra.mxu1 %v5560_v34 }
 0xb68   :  { %4918 = vmatprep.subr.bf16.mxu1 %v5068_v0 }
 0xc38   :  { %v1676_v17 = vpop.f32.mrb[18].mxu1 }
 0xc39   :  { %v1752_v26 = vpop.f32.mrb[22].mxu0  ;;  %v4586_v45 = vpop.f32.mrb[19].mxu1  ;;  %4593 = vmatpush3.msra.mxu0 %v1676_v17 }
 0xc3a   :  { %v1756_v27 = vsel %vm369_vm4, -1e+20, %v1752_v26  ;;  %v4591_v28 = vpop.f32.mrb[23].mxu0  ;;  %4912 = vmatprep.subr.bf16.mxu0 %v5068_v0 }
 0xc3b   :  { %v1757_v29 = vmul.f32 0.17677669, %v1756_v27 }
 0xc3d   :  { %v1758_v35 = vsel %vm286_vm2, %v1757_v29, -inf }
 0xc3e   :  { %1759 = vmax.xlane.f32.xlu0 %v1758_v35 }
 0xccb   :  { %v1760_v36 = vpop.xlane.xlu0 %1759 }
 0xccc   :  { %v1761_v39 = vsub.f32 %v1757_v29, %v1760_v36 }
 0xcce   :  { %v1762_v40 = vmul.f32 1.442695, %v1761_v39 }
 0xcd0   :  { %5040 = vpow2.f32 %v1762_v40 }
 0xcda   :  { %v5041_v42 = vpop.eup %5040 }
 0xcdb   :  { %v1764_v43 = vsel %vm286_vm2, %v5041_v42, 0.0 }
 0xcdc   :  { %1765 = vadd.xlane.f32.xlu1 %v1764_v43 }
 0xd69   :  { %v1766_v49 = vpop.xlane.xlu1 %1765 }
 0xd6a   :  { %5042 = vrcp.f32 %v1766_v49 }
 0xd74   :  { %v5043_v51 = vpop.eup %5042 }
 0xd75   :  { %v1768_v53 = vmul.f32 %v5043_v51, %v5041_v42 }
 0xd77   :  { %4595 = vmatmul.mubr.msk.f32.vlgmr.msra.gmra.mrb[24].mxu0 %vm286_vm2, %v1768_v53 }
 0xd78   :  { %4914 = vmatpush3.bf16.msra.mxu0 %v5169_v5  ;;  %4610 = vmatprep.mubr.msk.f32.mxu0 %vm5069_vm0, %v5070_v4  ;;  %v5587_v5 = vld [vmem:[%s5877_s1 + $0x8] sm:$0xff] }
 0xd79   :  { %4915 = vmatprep.subr.bf16.mxu0 %v5068_v0 }
 0xd7c   :  { %4917 = vmatpush3.bf16.msra.mxu0 %v5178_v7 }
 0xd7d   :  { %4924 = vmatprep.subr.bf16.mxu0 %v5068_v0 }
 0xd7f   :  { %4611 = vmatmul.mubr.msk.f32.vlgmr.msra.gmra.mrb[26].mxu0 %vm61_vm1, %v5574_v56 }
 0xd80   :  { %4926 = vmatpush3.bf16.msra.mxu0 %v5222_v18  ;;  %4632 = vmatprep.mubr.msk.f32.mxu0 %vm5069_vm0, %v5070_v4 }
 0xd81   :  { %4927 = vmatprep.subr.bf16.mxu0 %v5068_v0 }
 0xd84   :  { %4929 = vmatpush3.bf16.msra.mxu0 %v5237_v21 }
 0xd85   :  { %4930 = vmatprep.subr.bf16.mxu0 %v5068_v0 }
 0xd87   :  { %4633 = vmatmul.mubr.msk.f32.vlgmr.msra.gmra.mrb[28].mxu0 %vm61_vm1, %v5587_v5 }
 0xd88   :  { %4932 = vmatpush3.bf16.msra.mxu0 %v5273_v47  ;;  %4653 = vmatprep.mubr.msk.f32.mxu0 %vm5069_vm0, %v5070_v4 }
 0xd89   :  { %4933 = vmatprep.subr.bf16.mxu0 %v5068_v0 }
 0xd8c   :  { %4935 = vmatpush3.bf16.msra.mxu0 %v5283_v50 }
 0xd8d   :  { %4942 = vmatprep.subr.bf16.mxu0 %v5068_v0 }
 0xd8f   :  { %4654 = vmatmul.mubr.msk.f32.vlgmr.msra.gmra.mrb[30].mxu0 %vm61_vm1, %v5574_v56 }
 0xd90   :  { %4944 = vmatpush3.bf16.msra.mxu0 %v5332_v9  ;;  %4675 = vmatprep.mubr.msk.f32.mxu0 %vm5069_vm0, %v5070_v4 }
 0xd91   :  { %4945 = vmatprep.subr.bf16.mxu0 %v5068_v0 }
 0xd94   :  { %4947 = vmatpush3.bf16.msra.mxu0 %v5338_v13 }
 0xd95   :  { %4688 = vmatprep.subr.mxu0 %v5070_v4 }
 0xd97   :  { %4676 = vmatmul.mubr.msk.f32.vlgmr.msra.gmra.mrb[32].mxu0 %vm61_vm1, %v5587_v5 }
 0xd98   :  { %4689 = vmatpush3.msra.mxu0 %v5355_v33  ;;  %4690 = vmatprep.mubr.msk.f32.mxu0 %vm5069_vm0, %v5070_v4 }
 0xd99   :  { %4948 = vmatprep.subr.bf16.mxu0 %v5068_v0 }
 0xe4a   :  { %v1838_v7 = vpop.f32.mrb[24].mxu0 }
 0xe4b   :  { %v4596_v18 = vpop.f32.mrb[25].mxu0  ;;  %4600 = vmatmul.mubr.msk.f32.vlgmr.msra.gmra.mrb[20].mxu1 %vm286_vm2, %v1838_v7 }
 0xe4c   :  { %4920 = vmatpush3.bf16.msra.mxu1 %v5193_v11  ;;  %4621 = vmatprep.mubr.msk.f32.mxu1 %vm5069_vm0, %v5070_v4  ;;  %v5625_v11 = vld [vmem:[%s5880_s7] ss:$0 sm:$0xff] }
 0xe4d   :  { %4921 = vmatprep.subr.bf16.mxu1 %v5068_v0 }
 0xe50   :  { %4923 = vmatpush3.bf16.msra.mxu1 %v5205_v14 }
 0xe51   :  { %4635 = vmatprep.subr.mxu1 %v5070_v4 }
 0xe52   :  { %v2003_v21 = vpop.f32.mrb[26].mxu0 }
 0xe53   :  { %4622 = vmatmul.mubr.msk.f32.vlgmr.msra.gmra.mrb[22].mxu1 %vm61_vm1, %v5587_v5  ;;  %v4612_v47 = vpop.f32.mrb[27].mxu0 }
 0xe54   :  { %4637 = vmatprep.mubr.msk.f32.mxu1 %vm5069_vm0, %v5070_v4 }
 0xe5a   :  { %v2154_v31 = vpop.f32.mrb[28].mxu0 }
 0xe5b   :  { %v4634_v62 = vpop.f32.mrb[29].mxu0 }
 0xe62   :  { %v2398_v27 = vpop.f32.mrb[30].mxu0 }
 0xe63   :  { %v4655_v28 = vpop.f32.mrb[31].mxu0 }
 0xe6a   :  { %v2546_v7 = vpop.f32.mrb[32].mxu0 }
 0xe6b   :  { %v4677_v18 = vpop.f32.mrb[33].mxu0 }
 0xf1e   :  { %v1913_v50 = vpop.f32.mrb[20].mxu1 }
 0xf1f   :  { %v1917_v9 = vadd.f32 %v1913_v50, %v5521_v6  ;;  %v4601_v13 = vpop.f32.mrb[21].mxu1 }
 0xf21   :  { %v1924_v14 = vadd.f32 %v5625_v11, %v1917_v9 }
 0xf23   :  { %1925 = vst.msk [vmem:[#allocation2] sm:$0xff] %vm61_vm1, %v1924_v14 }
 0xf26   :  { %v2080_v33 = vpop.f32.mrb[22].mxu1 }
 0xf27   :  { %v4623_v58 = vpop.f32.mrb[23].mxu1  ;;  %4636 = vmatpush3.xpose.msk.msra.mxu1 %vm286_vm2, %v2080_v33 }
 0xf28   :  { %4640 = vmatprep.subr.mxu1 %v5070_v4 }
 0xf2a   :  { %4638 = vmatmul.mubr.msk.f32.vlgmr.msra.gmra.mrb[24].mxu1 %vm286_vm2, %v2003_v21 }
 0xf2b   :  { %4642 = vmatprep.mubr.msk.f32.mxu1 %vm5069_vm0, %v5070_v4  ;;  %4641 = vmatpush3.msra.mxu1 %v2154_v31 }
 0xf2c   :  { %4936 = vmatprep.subr.bf16.mxu1 %v5068_v0 }
 0xffd   :  { %v2230_v1 = vpop.f32.mrb[24].mxu1 }
 0xffe   :  { %v2241_v2 = vsel %vm2240_vm6, -1e+20, %v2230_v1  ;;  %v4639_v3 = vpop.f32.mrb[25].mxu1 }
 0xfff   :  { %v2242_v6 = vmul.f32 0.17677669, %v2241_v2 }
0x1001   :  { %v2243_v8 = vsel %vm286_vm2, %v2242_v6, -inf }
0x1002   :  { %2244 = vmax.xlane.f32.xlu0 %v2243_v8 }
0x108f   :  { %v2245_v15 = vpop.xlane.xlu0 %2244 }
0x1090   :  { %v2246_v19 = vsub.f32 %v2242_v6, %v2245_v15 }
0x1092   :  { %v2247_v20 = vmul.f32 1.442695, %v2246_v19 }
0x1094   :  { %5044 = vpow2.f32 %v2247_v20 }
0x109e   :  { %v5045_v32 = vpop.eup %5044 }
0x109f   :  { %v2249_v30 = vsel %vm286_vm2, %v5045_v32, 0.0 }
0x10a0   :  { %2250 = vadd.xlane.f32.xlu1 %v2249_v30 }
0x112d   :  { %v2251_v22 = vpop.xlane.xlu1 %2250 }
0x112e   :  { %5046 = vrcp.f32 %v2251_v22 }
0x1138   :  { %v5047_v24 = vpop.eup %5046 }
0x1139   :  { %v2253_v26 = vmul.f32 %v5047_v24, %v5045_v32 }
0x113b   :  { %4643 = vmatmul.mubr.msk.f32.vlgmr.msra.gmra.mrb[26].mxu1 %vm286_vm2, %v2253_v26  ;;  %v3779_v26 = vld [vmem:[#allocation2] sm:$0xff] }
0x113c   :  { %4938 = vmatpush3.bf16.msra.mxu1 %v5297_v55  ;;  %4664 = vmatprep.mubr.msk.f32.mxu1 %vm5069_vm0, %v5070_v4 }
0x113d   :  { %4939 = vmatprep.subr.bf16.mxu1 %v5068_v0 }
0x1140   :  { %4941 = vmatpush3.bf16.msra.mxu1 %v5307_v59 }
0x1141   :  { %4678 = vmatprep.subr.mxu1 %v5070_v4 }
0x1143   :  { %4665 = vmatmul.mubr.msk.f32.vlgmr.msra.gmra.mrb[28].mxu1 %vm61_vm1, %v5587_v5 }
0x1144   :  { %4680 = vmatprep.mubr.msk.f32.mxu1 %vm5069_vm0, %v5070_v4 }
0x120e   :  { %v2323_v29 = vpop.f32.mrb[26].mxu1 }
0x120f   :  { %v4644_v35 = vpop.f32.mrb[27].mxu1 }
0x1216   :  { %v2472_v55 = vpop.f32.mrb[28].mxu1 }
0x1217   :  { %v4666_v36 = vpop.f32.mrb[29].mxu1  ;;  %4679 = vmatpush3.xpose.msk.msra.mxu1 %vm286_vm2, %v2472_v55 }
0x1218   :  { %4683 = vmatprep.subr.mxu1 %v5070_v4 }
0x121a   :  { %4681 = vmatmul.mubr.msk.f32.vlgmr.msra.gmra.mrb[30].mxu1 %vm286_vm2, %v2398_v27  ;;  %v3781_v27 = vld [vmem:[%s5875_s0] sm:$0xff] }
0x121b   :  { %4685 = vmatprep.mubr.msk.f32.mxu1 %vm5069_vm0, %v5070_v4  ;;  %4684 = vmatpush3.msra.mxu1 %v2546_v7  ;;  %v3783_v35 = vadd.f32 %v3781_v27, %v3779_v26  ;;  %v3934_v27 = vld [vmem:[%s5884_s12 + $0x50] sm:$0xff] }
0x121c   :  { %4693 = vmatprep.subr.mxu1 %v5070_v4 }
0x121d   :  { %v3785_v55 = vsel %vm61_vm1, %v3783_v35, 0.0 }
0x12ed   :  { %v2622_v59 = vpop.f32.mrb[30].mxu1 }
0x12ee   :  { %v2626_v39 = vsel %vm2240_vm6, -1e+20, %v2622_v59  ;;  %v4682_v40 = vpop.f32.mrb[31].mxu1 }
0x12ef   :  { %v2627_v42 = vmul.f32 0.17677669, %v2626_v39 }
0x12f1   :  { %v2628_v43 = vsel %vm286_vm2, %v2627_v42, -inf }
0x12f2   :  { %2629 = vmax.xlane.f32.xlu0 %v2628_v43 }
0x137f   :  { %v2630_v17 = vpop.xlane.xlu0 %2629 }
0x1380   :  { %v2631_v45 = vsub.f32 %v2627_v42, %v2630_v17 }
0x1382   :  { %v2632_v49 = vmul.f32 1.442695, %v2631_v45 }
0x1384   :  { %5048 = vpow2.f32 %v2632_v49 }
0x138e   :  { %v5049_v51 = vpop.eup %5048 }
0x138f   :  { %v2634_v53 = vsel %vm286_vm2, %v5049_v51, 0.0 }
0x1390   :  { %2635 = vadd.xlane.f32.xlu1 %v2634_v53 }
0x141d   :  { %v2636_v21 = vpop.xlane.xlu1 %2635 }
0x141e   :  { %5050 = vrcp.f32 %v2636_v21 }
0x1428   :  { %v5051_v47 = vpop.eup %5050 }
0x1429   :  { %v2638_v50 = vmul.f32 %v5051_v47, %v5049_v51 }
0x142b   :  { %4686 = vmatmul.mubr.msk.f32.vlgmr.msra.gmra.mrb[32].mxu1 %vm286_vm2, %v2638_v50  ;;  %v5765_v50 = vld [vmem:[%s5881_s8] ss:$0 sm:$0xff] }
0x142c   :  { %4694 = vmatpush3.msra.mxu1 %v5362_v38  ;;  %4695 = vmatprep.mubr.msk.f32.mxu1 %vm5069_vm0, %v5070_v4 }
0x142d   :  { %4954 = vmatprep.subr.bf16.mxu1 %v5068_v0 }
0x142f   :  { %4696 = vmatmul.mubr.msk.f32.vlgmr.msra.gmra.mrb[34].mxu1 %vm286_vm2, %v2323_v29 }
0x1430   :  { %4956 = vmatpush3.bf16.msra.mxu1 %v5374_v41  ;;  %4717 = vmatprep.mubr.msk.f32.mxu1 %vm5069_vm0, %v5070_v4 }
0x1431   :  { %4957 = vmatprep.subr.bf16.mxu1 %v5068_v0 }
0x1434   :  { %4959 = vmatpush3.bf16.msra.mxu1 %v5388_v44 }
0x1435   :  { %4731 = vmatprep.subr.mxu1 %v5070_v4 }
0x1437   :  { %4718 = vmatmul.mubr.msk.f32.vlgmr.msra.gmra.mrb[36].mxu1 %vm61_vm1, %v5587_v5 }
0x1438   :  { %4733 = vmatprep.mubr.msk.f32.mxu1 %vm5069_vm0, %v5070_v4 }
0x14fe   :  { %v2708_v38 = vpop.f32.mrb[32].mxu1 }
0x14ff   :  { %v4687_v9 = vpop.f32.mrb[33].mxu1  ;;  %4691 = vmatmul.mubr.msk.f32.vlgmr.msra.gmra.mrb[34].mxu0 %vm286_vm2, %v2708_v38 }
0x1500   :  { %4950 = vmatpush3.bf16.msra.mxu0 %v5402_v48  ;;  %4706 = vmatprep.mubr.msk.f32.mxu0 %vm5069_vm0, %v5070_v4 }
0x1501   :  { %4951 = vmatprep.subr.bf16.mxu0 %v5068_v0 }
0x1502   :  { %v2855_v41 = vpop.f32.mrb[34].mxu1 }
0x1503   :  { %v4697_v44 = vpop.f32.mrb[35].mxu1 }
0x1504   :  { %4953 = vmatpush3.bf16.msra.mxu0 %v5412_v54  ;;  %v5770_v44 = vld [vmem:[%s5882_s9] ss:$0 sm:$0xff] }
0x1505   :  { %4960 = vmatprep.subr.bf16.mxu0 %v5068_v0 }
0x1507   :  { %4707 = vmatmul.mubr.msk.f32.vlgmr.msra.gmra.mrb[36].mxu0 %vm61_vm1, %v5574_v56 }
0x1508   :  { %4962 = vmatpush3.bf16.msra.mxu0 %v5439_v12  ;;  %4728 = vmatprep.mubr.msk.f32.mxu0 %vm5069_vm0, %v5070_v4 }
0x1509   :  { %4963 = vmatprep.subr.bf16.mxu0 %v5068_v0 }
0x150a   :  { %v3003_v48 = vpop.f32.mrb[36].mxu1 }
0x150b   :  { %v4719_v54 = vpop.f32.mrb[37].mxu1  ;;  %4732 = vmatpush3.xpose.msk.msra.mxu1 %vm286_vm2, %v3003_v48 }
0x150c   :  { %4965 = vmatpush3.bf16.msra.mxu0 %v5445_v16  ;;  %4736 = vmatprep.subr.mxu1 %v5070_v4 }
0x150d   :  { %4741 = vmatprep.subr.mxu0 %v5070_v4 }
0x150f   :  { %4729 = vmatmul.mubr.msk.f32.vlgmr.msra.gmra.mrb[38].mxu0 %vm61_vm1, %v5587_v5 }
0x1510   :  { %4742 = vmatpush3.msra.mxu0 %v5462_v37  ;;  %4743 = vmatprep.mubr.msk.f32.mxu0 %vm5069_vm0, %v5070_v4 }
0x1511   :  { %4972 = vmatprep.subr.bf16.mxu0 %v5068_v0 }
0x15d2   :  { %v2782_v12 = vpop.f32.mrb[34].mxu0 }
0x15d3   :  { %v2856_v16 = vadd.f32 %v2855_v41, %v2782_v12  ;;  %v4692_v13 = vpop.f32.mrb[35].mxu0 }
0x15da   :  { %v2929_v14 = vpop.f32.mrb[36].mxu0 }
0x15db   :  { %v4708_v33 = vpop.f32.mrb[37].mxu0  ;;  %4734 = vmatmul.mubr.msk.f32.vlgmr.msra.gmra.mrb[38].mxu1 %vm286_vm2, %v2929_v14 }
0x15dc   :  { %4738 = vmatprep.mubr.msk.f32.mxu1 %vm5069_vm0, %v5070_v4 }
0x15e2   :  { %v3077_v19 = vpop.f32.mrb[38].mxu0 }
0x15e3   :  { %v4730_v20 = vpop.f32.mrb[39].mxu0  ;;  %4737 = vmatpush3.msra.mxu1 %v3077_v19 }
0x15e4   :  { %4966 = vmatprep.subr.bf16.mxu1 %v5068_v0  ;;  %v3833_v20 = vld [vmem:[%s5883_s10 + $0x18] sm:$0xff] }
0x16ae   :  { %v3153_v37 = vpop.f32.mrb[38].mxu1 }
0x16af   :  { %v3157_v58 = vsel %vm2240_vm6, -1e+20, %v3153_v37  ;;  %v4735_v10 = vpop.f32.mrb[39].mxu1 }
0x16b0   :  { %v3158_v60 = vmul.f32 0.17677669, %v3157_v58 }
0x16b2   :  { %v3159_v1 = vsel %vm286_vm2, %v3158_v60, -inf }
0x16b3   :  { %3160 = vmax.xlane.f32.xlu0 %v3159_v1 }
0x1740   :  { %v3161_v2 = vpop.xlane.xlu0 %3160 }
0x1741   :  { %v3162_v3 = vsub.f32 %v3158_v60, %v3161_v2 }
0x1743   :  { %v3163_v6 = vmul.f32 1.442695, %v3162_v3 }
0x1745   :  { %5052 = vpow2.f32 %v3163_v6 }
0x174f   :  { %v5053_v8 = vpop.eup %5052 }
0x1750   :  { %v3165_v15 = vsel %vm286_vm2, %v5053_v8, 0.0 }
0x1751   :  { %3166 = vadd.xlane.f32.xlu1 %v3165_v15  ;;  %v3830_v15 = vld [vmem:[%s5883_s10] sm:$0xff] }
0x17de   :  { %v3167_v32 = vpop.xlane.xlu1 %3166 }
0x17df   :  { %5054 = vrcp.f32 %v3167_v32 }
0x17e9   :  { %v5055_v30 = vpop.eup %5054 }
0x17ea   :  { %v3169_v31 = vmul.f32 %v5055_v30, %v5053_v8  ;;  %v3924_v30 = vld [vmem:[%s5884_s12] sm:$0xff] }
0x17ec   :  { %4739 = vmatmul.mubr.msk.f32.vlgmr.msra.gmra.mrb[40].mxu1 %vm286_vm2, %v3169_v31  ;;  %v3925_v31 = vld [vmem:[%s5884_s12 + $0x8] sm:$0xff] }
0x17ed   :  { %4968 = vmatpush3.bf16.msra.mxu1 %v5475_v46  ;;  %4754 = vmatprep.mubr.msk.f32.mxu1 %vm5069_vm0, %v5070_v4 }
0x17ee   :  { %4969 = vmatprep.subr.bf16.mxu1 %v5068_v0 }
0x17f1   :  { %4971 = vmatpush3.bf16.msra.mxu1 %v5485_v52 }
0x17f2   :  { %4978 = vmatprep.subr.bf16.mxu1 %v5068_v0 }
0x17f4   :  { %4755 = vmatmul.mubr.msk.f32.vlgmr.msra.gmra.mrb[42].mxu1 %vm61_vm1, %v5574_v56 }
0x17f5   :  { %4980 = vmatpush3.bf16.msra.mxu1 %v5537_v23  ;;  %4776 = vmatprep.mubr.msk.f32.mxu1 %vm5069_vm0, %v5070_v4 }
0x17f6   :  { %4981 = vmatprep.subr.bf16.mxu1 %v5068_v0 }
0x17f9   :  { %4983 = vmatpush3.bf16.msra.mxu1 %v5543_v25 }
0x17fa   :  { %4789 = vmatprep.subr.mxu1 %v5070_v4 }
0x17fc   :  { %4777 = vmatmul.mubr.msk.f32.vlgmr.msra.gmra.mrb[44].mxu1 %vm61_vm1, %v5587_v5 }
0x17fd   :  { %4790 = vmatpush3.msra.mxu1 %v5560_v34  ;;  %4791 = vmatprep.mubr.msk.f32.mxu1 %vm5069_vm0, %v5070_v4 }
0x18bf   :  { %v3239_v46 = vpop.f32.mrb[40].mxu1 }
0x18c0   :  { %v4740_v52 = vpop.f32.mrb[41].mxu1  ;;  %4744 = vmatmul.mubr.msk.f32.vlgmr.msra.gmra.mrb[40].mxu0 %vm286_vm2, %v3239_v46  ;;  %v3926_v46 = vld [vmem:[%s5884_s12 + $0x10] sm:$0xff] }
0x18c1   :  { %4974 = vmatpush3.bf16.msra.mxu0 %v5499_v57  ;;  %4765 = vmatprep.mubr.msk.f32.mxu0 %vm5069_vm0, %v5070_v4  ;;  %v4992_v52 = vpack.c.bf16 %v3925_v31, %v3924_v30  ;;  %v4216_v30 = vld [vmem:[%s5887_s14] ss:$0 sm:$0xff] }
0x18c2   :  { %4975 = vmatprep.subr.bf16.mxu0 %v5068_v0 }
0x18c3   :  { %4993 = vmatprep.subr.bf16.mxu1 %v4992_v52 }
0x18c5   :  { %4977 = vmatpush3.bf16.msra.mxu0 %v5509_v63 }
0x18c6   :  { %4779 = vmatprep.subr.mxu0 %v5070_v4 }
0x18c7   :  { %v3388_v23 = vpop.f32.mrb[42].mxu1 }
0x18c8   :  { %4766 = vmatmul.mubr.msk.f32.vlgmr.msra.gmra.mrb[42].mxu0 %vm61_vm1, %v5587_v5  ;;  %v4756_v25 = vpop.f32.mrb[43].mxu1 }
0x18c9   :  { %4781 = vmatprep.mubr.msk.f32.mxu0 %vm5069_vm0, %v5070_v4 }
0x18cf   :  { %v3536_v49 = vpop.f32.mrb[44].mxu1 }
0x18d0   :  { %v4778_v51 = vpop.f32.mrb[45].mxu1 }
0x18d1   :  { %v4212_v51 = vld [vmem:[%s5885_s11] ss:$0 sm:$0xff] }
0x1993   :  { %v3313_v34 = vpop.f32.mrb[40].mxu0 }
0x1994   :  { %v3317_v62 = vadd.f32 %v3313_v34, %v2856_v16  ;;  %v4745_v57 = vpop.f32.mrb[41].mxu0  ;;  %v3928_v34 = vld [vmem:[%s5884_s12 + $0x20] sm:$0xff] }
0x199b   :  { %v3462_v22 = vpop.f32.mrb[42].mxu0 }
0x199c   :  { %v4767_v24 = vpop.f32.mrb[43].mxu0  ;;  %4780 = vmatpush3.xpose.msk.msra.mxu0 %vm286_vm2, %v3462_v22  ;;  %v3930_v22 = vld [vmem:[%s5884_s12 + $0x30] sm:$0xff] }
0x199d   :  { %4784 = vmatprep.subr.mxu0 %v5070_v4  ;;  %v3931_v24 = vld [vmem:[%s5884_s12 + $0x38] sm:$0xff] }
0x199f   :  { %4782 = vmatmul.mubr.msk.f32.vlgmr.msra.gmra.mrb[44].mxu0 %vm286_vm2, %v3388_v23  ;;  %v3927_v23 = vld [vmem:[%s5884_s12 + $0x18] sm:$0xff] }
0x19a0   :  { %4786 = vmatprep.mubr.msk.f32.mxu0 %vm5069_vm0, %v5070_v4  ;;  %4785 = vmatpush3.msra.mxu0 %v3536_v49  ;;  %v4996_v25 = vpack.c.bf16 %v3927_v23, %v3926_v46 }
0x1a72   :  { %v3612_v0 = vpop.f32.mrb[44].mxu0 }
0x1a73   :  { %v3616_v63 = vsel %vm2240_vm6, -1e+20, %v3612_v0  ;;  %v4783_v5 = vpop.f32.mrb[45].mxu0  ;;  %v5004_v0 = vpack.c.bf16 %v3931_v24, %v3930_v22 }
0x1a74   :  { %v3617_v28 = vmul.f32 0.17677669, %v3616_v63  ;;  %v3932_v63 = vld [vmem:[%s5884_s12 + $0x40] sm:$0xff]  ;;  %v3933_v5 = vld [vmem:[%s5884_s12 + $0x48] sm:$0xff] }
0x1a75   :  { %v5008_v26 = vpack.c.bf16 %v3933_v5, %v3932_v63 }
0x1a76   :  { %v3618_v29 = vsel %vm286_vm2, %v3617_v28, -inf }
0x1a77   :  { %3619 = vmax.xlane.f32.xlu0 %v3618_v29 }
0x1a7b   :  { %3786 = vadd.xlane.f32.xlu0 %v3785_v55  ;;  %v3937_v55 = vld [vmem:[%s5884_s12 + $0x68] sm:$0xff] }
0x1b04   :  { %v3620_v36 = vpop.xlane.xlu0 %3619 }
0x1b05   :  { %v3621_v4 = vsub.f32 %v3617_v28, %v3620_v36  ;;  %v3935_v28 = vld [vmem:[%s5884_s12 + $0x58] sm:$0xff] }
0x1b06   :  { %v5012_v29 = vpack.c.bf16 %v3935_v28, %v3934_v27 }
0x1b07   :  { %v3622_v59 = vmul.f32 1.442695, %v3621_v4 }
0x1b08   :  { %v3787_v39 = vpop.xlane.xlu0 %3786 }
0x1b09   :  { %5056 = vpow2.f32 %v3622_v59  ;;  %v3792_v61 = vmul.f32 0.03125, %v3787_v39 }
0x1b0b   :  { %v3794_v40 = vsub.f32 %v3783_v35, %v3792_v61  ;;  %v3936_v35 = vld [vmem:[%s5884_s12 + $0x60] sm:$0xff] }
0x1b0c   :  { %v5016_v36 = vpack.c.bf16 %v3937_v55, %v3936_v35 }
0x1b0d   :  { %v3796_v42 = vmul.f32 %v3794_v40, %v3794_v40 }
0x1b0f   :  { %v3798_v43 = vsel %vm61_vm1, %v3796_v42, 0.0 }
0x1b10   :  { %3799 = vadd.xlane.f32.xlu0 %v3798_v43 }
0x1b13   :  { %v5057_v17 = vpop.eup %5056 }
0x1b14   :  { %v3624_v45 = vsel %vm286_vm2, %v5057_v17, 0.0 }
0x1b15   :  { %3625 = vadd.xlane.f32.xlu1 %v3624_v45  ;;  %v3939_v45 = vld [vmem:[%s5884_s12 + $0x78] sm:$0xff] }
0x1b9d   :  { %v3800_v53 = vpop.xlane.xlu0 %3799 }
0x1b9e   :  { %v3804_v7 = vmul.f32 0.03125, %v3800_v53 }
0x1ba0   :  { %v3806_v18 = vadd.f32 1e-05, %v3804_v7 }
0x1ba2   :  { %5058 = vrsqrt.f32 %v3806_v18  ;;  %v3626_v21 = vpop.xlane.xlu1 %3625 }
0x1ba3   :  { %5060 = vrcp.f32 %v3626_v21 }
0x1bac   :  { %v5059_v47 = vpop.eup %5058 }
0x1bad   :  { %v5061_v38 = vpop.eup %5060  ;;  %v3810_v9 = vmul.f32 %v5059_v47, %v3794_v40 }
0x1bae   :  { %v3628_v41 = vmul.f32 %v5061_v38, %v5057_v17  ;;  %v3938_v17 = vld [vmem:[%s5884_s12 + $0x70] sm:$0xff]  ;;  %v4215_v38 = vld [vmem:[%s5886_s13] ss:$0 sm:$0xff] }
0x1baf   :  { %v3819_v48 = vmul.f32 %v5765_v50, %v3810_v9  ;;  %v5020_v49 = vpack.c.bf16 %v3939_v45, %v3938_v17 }
0x1bb0   :  { %4787 = vmatmul.mubr.msk.f32.vlgmr.msra.gmra.mrb[46].mxu0 %vm286_vm2, %v3628_v41 }
0x1bb1   :  { %v5775_v54 = vadd.f32 %v5770_v44, %v3819_v48 }
0x1bb3   :  { %4802 = vmatprep.mubr.msk.f32.mxu0 %vm61_vm1, %v5775_v54 }
0x1c83   :  { %v3698_v12 = vpop.f32.mrb[46].mxu0 }
0x1c84   :  { %v4788_v16 = vpop.f32.mrb[47].mxu0  ;;  %4792 = vmatmul.mubr.msk.f32.vlgmr.msra.gmra.mrb[46].mxu1 %vm286_vm2, %v3698_v12 }
0x1c85   :  { %4995 = vmatpush3.bf16.msra.mxu1 %v4992_v52  ;;  %v4217_v52 = vld [vmem:[%s5888_s15] ss:$0 sm:$0xff] }
0x1c86   :  { %4997 = vmatprep.subr.bf16.mxu1 %v4996_v25 }
0x1c89   :  { %4999 = vmatpush3.bf16.msra.mxu1 %v4996_v25 }
0x1d57   :  { %v3772_v13 = vpop.f32.mrb[46].mxu1 }
0x1d58   :  { %v3776_v14 = vadd.f32 %v3772_v13, %v3317_v62  ;;  %v4793_v33 = vpop.f32.mrb[47].mxu1  ;;  %v3929_v62 = vld [vmem:[%s5884_s12 + $0x28] sm:$0xff] }
0x1d59   :  { %v5000_v57 = vpack.c.bf16 %v3929_v62, %v3928_v34 }
0x1d5a   :  { %v3777_v37 = vadd.f32 %v5625_v11, %v3776_v14  ;;  %v3831_v11 = vld [vmem:[%s5883_s10 + $0x8] sm:$0xff] }
0x1d5b   :  { %v4984_v19 = vpack.c.bf16 %v3831_v11, %v3830_v15  ;;  %5001 = vmatprep.subr.bf16.mxu1 %v5000_v57 }
0x1d5c   :  { %3778 = vst.msk [vmem:[#allocation2 + $0x8] sm:$0xff] %vm61_vm1, %v3777_v37  ;;  %5003 = vmatpush3.bf16.msra.mxu1 %v5000_v57 }
0x1d5d   :  { %4985 = vmatprep.subr.bf16.mxu0 %v4984_v19  ;;  %5005 = vmatprep.subr.bf16.mxu1 %v5004_v0 }
0x1d5e   :  { %4987 = vmatpush3.bf16.msra.mxu0 %v4984_v19 }
0x1d60   :  { %5007 = vmatpush3.bf16.msra.mxu1 %v5004_v0 }
0x1d61   :  { %5009 = vmatprep.subr.bf16.mxu1 %v5008_v26 }
0x1d63   :  { %v3780_v58 = vld [vmem:[#allocation2 + $0x8] sm:$0xff] }
0x1d64   :  { %v3784_v10 = vadd.f32 %v3780_v58, %v5574_v56  ;;  %v3832_v56 = vld [vmem:[%s5883_s10 + $0x10] sm:$0xff]  ;;  %5011 = vmatpush3.bf16.msra.mxu1 %v5008_v26 }
0x1d65   :  { %v4988_v32 = vpack.c.bf16 %v3833_v20, %v3832_v56  ;;  %5013 = vmatprep.subr.bf16.mxu1 %v5012_v29 }
0x1d66   :  { %v3788_v60 = vsel %vm61_vm1, %v3784_v10, 0.0 }
0x1d67   :  { %3789 = vadd.xlane.f32.xlu1 %v3788_v60  ;;  %4989 = vmatprep.subr.bf16.mxu0 %v4988_v32 }
0x1d68   :  { %4991 = vmatpush3.bf16.msra.mxu0 %v4988_v32  ;;  %5015 = vmatpush3.bf16.msra.mxu1 %v5012_v29 }
0x1d69   :  { %5017 = vmatprep.subr.bf16.mxu1 %v5016_v36 }
0x1d6c   :  { %5019 = vmatpush3.bf16.msra.mxu1 %v5016_v36 }
0x1d6d   :  { %5021 = vmatprep.subr.bf16.mxu1 %v5020_v49 }
0x1d70   :  { %5023 = vmatpush3.bf16.msra.mxu1 %v5020_v49 }
0x1df4   :  { %v3790_v1 = vpop.xlane.xlu1 %3789 }
0x1df5   :  { %v3793_v2 = vmul.f32 0.03125, %v3790_v1 }
0x1df7   :  { %v3795_v3 = vsub.f32 %v3784_v10, %v3793_v2 }
0x1df9   :  { %v3797_v6 = vmul.f32 %v3795_v3, %v3795_v3 }
0x1dfb   :  { %v3801_v8 = vsel %vm61_vm1, %v3797_v6, 0.0 }
0x1dfc   :  { %3802 = vadd.xlane.f32.xlu1 %v3801_v8 }
0x1e89   :  { %v3803_v4 = vpop.xlane.xlu1 %3802 }
0x1e8a   :  { %v3805_v59 = vmul.f32 0.03125, %v3803_v4 }
0x1e8c   :  { %v3807_v39 = vadd.f32 1e-05, %v3805_v59 }
0x1e8e   :  { %5062 = vrsqrt.f32 %v3807_v39 }
0x1e98   :  { %v5063_v61 = vpop.eup %5062 }
0x1e99   :  { %v3811_v40 = vmul.f32 %v5063_v61, %v3795_v3 }
0x1e9b   :  { %v3820_v42 = vmul.f32 %v5765_v50, %v3811_v40 }
0x1e9d   :  { %v3829_v43 = vadd.f32 %v5770_v44, %v3820_v42 }
0x1e9f   :  { %4803 = vmatmul.mubr.msk.f32.vlgmr.msra.gmra.mrb[48].mxu0 %vm61_vm1, %v3829_v43 }
0x1f72   :  { %v4804_v53 = vpop.f32.mrb[48].mxu0 }
0x1f73   :  { %v3919_v7 = vadd.f32 %v4804_v53, %v4212_v51  ;;  %v3913_v18 = vpop.f32.mrb[49].mxu0 }
0x1f74   :  { %v3914_v21 = vadd.f32 %v4212_v51, %v3913_v18 }
0x1f75   :  { %v3923_v50 = vmax.f32 %v3919_v7, 0.0 }
0x1f76   :  { %v3922_v47 = vmax.f32 %v3914_v21, 0.0 }
0x1f78   :  { %4837 = vmatprep.mubr.f32.mxu1 %v3922_v47 }
0x1f79   :  { %4838 = vmatmul.mubr.f32.vlgmr.msra.gmra.mrb[48].mxu1 %v3923_v50 }
0x204c   :  { %v4839_v9 = vpop.f32.mrb[48].mxu1 }
0x204d   :  { %v4019_v41 = vadd.f32 %v4839_v9, %v4215_v38  ;;  %v4013_v44 = vpop.f32.mrb[49].mxu1 }
0x204e   :  { %v4014_v48 = vadd.f32 %v4215_v38, %v4013_v44 }
0x204f   :  { %v4023_v12 = vadd.f32 %v4019_v41, %v3829_v43 }
0x2050   :  { %v4022_v16 = vadd.f32 %v4014_v48, %v5775_v54 }
0x2051   :  { %v4027_v13 = vsel %vm61_vm1, %v4023_v12, 0.0 }
0x2052   :  { %4028 = vadd.xlane.f32.xlu1 %v4027_v13  ;;  %v4024_v14 = vsel %vm61_vm1, %v4022_v16, 0.0 }
0x2053   :  { %4025 = vadd.xlane.f32.xlu0 %v4024_v14 }
0x20df   :  { %v4029_v33 = vpop.xlane.xlu1 %4028 }
0x20e0   :  { %v4031_v37 = vmul.f32 0.03125, %v4029_v33  ;;  %v4026_v58 = vpop.xlane.xlu0 %4025 }
0x20e1   :  { %v4030_v10 = vmul.f32 0.03125, %v4026_v58 }
0x20e2   :  { %v4033_v60 = vsub.f32 %v4023_v12, %v4031_v37 }
0x20e3   :  { %v4032_v1 = vsub.f32 %v4022_v16, %v4030_v10 }
0x20e4   :  { %v4035_v2 = vmul.f32 %v4033_v60, %v4033_v60 }
0x20e5   :  { %v4034_v3 = vmul.f32 %v4032_v1, %v4032_v1 }
0x20e6   :  { %v4039_v6 = vsel %vm61_vm1, %v4035_v2, 0.0 }
0x20e7   :  { %4040 = vadd.xlane.f32.xlu1 %v4039_v6  ;;  %v4036_v8 = vsel %vm61_vm1, %v4034_v3, 0.0 }
0x20e8   :  { %4037 = vadd.xlane.f32.xlu0 %v4036_v8 }
0x2174   :  { %v4041_v54 = vpop.xlane.xlu1 %4040 }
0x2175   :  { %v4043_v15 = vmul.f32 0.03125, %v4041_v54  ;;  %v4038_v11 = vpop.xlane.xlu0 %4037 }
0x2176   :  { %v4042_v19 = vmul.f32 0.03125, %v4038_v11 }
0x2177   :  { %v4045_v56 = vadd.f32 1e-05, %v4043_v15 }
0x2178   :  { %v4044_v20 = vadd.f32 1e-05, %v4042_v19 }
0x2179   :  { %5064 = vrsqrt.f32 %v4045_v56 }
0x217a   :  { %5066 = vrsqrt.f32 %v4044_v20 }
0x2183   :  { %v5065_v32 = vpop.eup %5064 }
0x2184   :  { %v5067_v31 = vpop.eup %5066  ;;  %v4049_v46 = vmul.f32 %v5065_v32, %v4033_v60 }
0x2185   :  { %v4048_v23 = vmul.f32 %v5067_v31, %v4032_v1 }
0x2186   :  { %v4058_v25 = vmul.f32 %v4216_v30, %v4049_v46 }
0x2187   :  { %v4057_v34 = vmul.f32 %v4216_v30, %v4048_v23 }
0x2188   :  { %v4067_v62 = vadd.f32 %v4217_v52, %v4058_v25 }
0x2189   :  { %v4066_v57 = vadd.f32 %v4217_v52, %v4057_v34 }
0x218a   :  { %4069 = vst.msk [vmem:[%s5889_s16 + $0x8] sm:$0xff] %vm61_vm1, %v4067_v62 }
0x218b   :  { %4068 = vst.msk [vmem:[%s5889_s16] sm:$0xff] %vm61_vm1, %v4066_v57 }

</bundles_post_ra>
